<compile_context>
chip_gen: v6e
topology: v6e:2x2x1
jax: 0.10.0
libtpu: 0.0.40
codegen_flags: <defaults>
</compile_context>

<pallas_src>
import functools

import jax
import jax.numpy as jnp
from jax import lax
from jax.experimental import pallas as pl
from jax.experimental.pallas import tpu as pltpu


def _round_up(v, m):
    return (v + m - 1) // m * m


def _bottleneck_kernel(x_ref, w1_ref, s1_ref, b1_ref,
                       w2f_ref, s2_ref, b2_ref,
                       w3_ref, s3_ref, b3_ref,
                       out_ref, pad_ref, slab_ref,
                       *, H, W, TH, rate, w0, CR, off):
    """One (batch, H-tile) grid step:
         conv1(1x1)+bn1+relu -> conv2(3x3 dilated, via one K=9P im2col matmul)
         +bn2+relu -> conv3(1x1)+bn3 -> +residual -> relu."""
    Cin = x_ref.shape[-1]
    P = w1_ref.shape[-1]
    C4 = w3_ref.shape[-1]
    BH, Wp, _ = pad_ref.shape
    t = pl.program_id(1)
    row0 = t * TH                                   # first output row (absolute)

    # --- zero the halo borders of the pad scratch --------------------------
    # O(perimeter) only; re-done every step so it stays correct when the grid
    # is sharded across TensorCores (scratch is per-core and uninitialized).
    pad_ref[0:off, :, :] = jnp.zeros((off, Wp, P), jnp.bfloat16)
    pad_ref[BH - off:BH, :, :] = jnp.zeros((off, Wp, P), jnp.bfloat16)
    pad_ref[:, 0:w0, :] = jnp.zeros((BH, w0, P), jnp.bfloat16)
    pad_ref[:, w0 + W:Wp, :] = jnp.zeros((BH, Wp - w0 - W, P), jnp.bfloat16)

    # --- conv1 (1x1, no bias) + bn1 + relu over the tile + dilation halo ----
    # Halo rows of neighbouring tiles are recomputed (conv1 is cheap).  The
    # clipped start keeps the slice shape static; rows outside the image stay
    # zero from the border fill above.  x is read (and bf16-cast) here, at
    # point of use, so the big temporary's live range stays short.
    if CR == H:                                     # single spatial tile
        src = 0
        o = off
    else:
        src = jnp.clip(row0 - rate, 0, H - CR)
        o = src - row0 + off                        # in [0, 2*rate]
    xh = x_ref[0, pl.ds(src, CR), :, :].reshape(CR * W, Cin)
    y1 = jnp.dot(xh.astype(jnp.bfloat16), w1_ref[...],
                 preferred_element_type=jnp.float32)
    y1 = jnp.maximum(y1 * s1_ref[...] + b1_ref[...], 0.0)
    # Interior store: W-offset `w0` is a multiple of 8 -> sublane-aligned vst;
    # the dynamic row offset `o` is on a non-minor axis (alignment-free).
    pad_ref[pl.ds(o, CR), w0:w0 + W, :] = (
        y1.reshape(CR, W, P).astype(jnp.bfloat16))

    # --- conv2 (3x3, stride=1, dilation=rate, padding=rate) + bn2 + relu ----
    # im2col slab (TH*W, 9*P) bf16 + ONE matmul: accumulation happens inside
    # the MXU, no f32 VMEM read-modify-write passes.
    r0 = off - rate                                 # buffer row of dh=0 tap, out row 0
    for dh in range(3):
        for dw in range(3):
            k = dh * 3 + dw
            win = pad_ref[r0 + dh * rate:r0 + dh * rate + TH,
                          w0 + (dw - 1) * rate:w0 + (dw - 1) * rate + W, :]
            slab_ref[:, k * P:(k + 1) * P] = win.reshape(TH * W, P)
    y2 = jnp.dot(slab_ref[...], w2f_ref[...],
                 preferred_element_type=jnp.float32)
    y2 = jnp.maximum(y2 * s2_ref[...] + b2_ref[...], 0.0)

    # --- conv3 (1x1, no bias) + bn3 + residual add + relu -------------------
    y3 = jnp.dot(y2.astype(jnp.bfloat16), w3_ref[...],
                 preferred_element_type=jnp.float32)
    y3 = y3 * s3_ref[...] + b3_ref[...]
    res = x_ref[0, pl.ds(row0, TH), :, :].reshape(TH * W, Cin)   # f32 residual
    y3 = jnp.maximum(y3 + res, 0.0)                 # residual = x (downsample is None)
    out_ref[0] = y3.reshape(TH, W, C4)


def _vmem_limit_bytes():
    # Generation-dependent: ~75% of physical VMEM (96 MiB on 128-MiB v5e/v6e,
    # 48 MiB on 64-MiB/TC v7x), capped for safety.
    try:
        cap = int(pltpu.get_tpu_info().vmem_capacity_bytes)
    except Exception:
        cap = 128 * 1024 * 1024
    return min(cap * 3 // 4, 100 * 1024 * 1024)


def _pick_tile_h(H, rate, tile_h):
    if tile_h is None:
        tile_h = H if H <= 16 else 16
    tile_h = min(tile_h, H)
    # The multi-tile path needs an exact split and room for the dilation halo.
    if tile_h == H or H % tile_h != 0 or tile_h + 2 * rate > H:
        return H
    return tile_h


def bottleneck_forward(x_nhwc, params, *, rate=1, tile_h=None):
    """x_nhwc: (N, H, W, Cin) float32.  Returns (N, H, W, 4*planes) float32."""
    (w1, s1, b1, w2, s2, b2, w3, s3, b3) = params
    N, H, W, Cin = x_nhwc.shape
    P = w1.shape[1]
    C4 = w3.shape[1]
    assert Cin == C4, "downsample=None requires inplanes == 4 * planes"

    TH = _pick_tile_h(H, rate, tile_h)
    T = H // TH
    CR = H if T == 1 else TH + 2 * rate             # conv1 rows computed / step
    off = rate if T == 1 else 2 * rate              # top halo rows in pad scratch
    BH = TH + 2 * off

    # Sublane-aligned left halo and 8-aligned padded width for the W axis.
    w0 = max(8, _round_up(rate, 8))
    Wp = _round_up(w0 + W + rate, 8)

    w2_flat = w2.reshape(9 * P, P)                  # HWIO -> row (dh*3+dw)*P + cin

    kernel = functools.partial(_bottleneck_kernel, H=H, W=W, TH=TH, rate=rate,
                               w0=w0, CR=CR, off=off)

    def full_spec(shape):
        return pl.BlockSpec(shape, lambda n, t, _nd=len(shape): (0,) * _nd)

    flops = int(2 * N * (T * CR * W * Cin * P
                         + H * W * 9 * P * P
                         + H * W * P * C4))
    bytes_accessed = int(
        x_nhwc.size * 4 + N * H * W * C4 * 4
        + sum(int(a.size) * a.dtype.itemsize
              for a in (w1, w2_flat, w3, s1, b1, s2, b2, s3, b3)))

    grid_spec = pltpu.PrefetchScalarGridSpec(
        num_scalar_prefetch=0,
        grid=(N, T),
        in_specs=[
            # Whole image per batch element; the block index is constant in t,
            # so Pallas only re-DMAs x when n changes.  (If the DMA shows up
            # exposed at real shapes: pipeline_mode=pl.Buffered(3).)
            pl.BlockSpec((1, H, W, Cin), lambda n, t: (n, 0, 0, 0)),
            full_spec(w1.shape), full_spec(s1.shape), full_spec(b1.shape),
            full_spec(w2_flat.shape), full_spec(s2.shape), full_spec(b2.shape),
            full_spec(w3.shape), full_spec(s3.shape), full_spec(b3.shape),
        ],
        out_specs=pl.BlockSpec((1, TH, W, C4), lambda n, t: (n, t, 0, 0)),
        scratch_shapes=[
            pltpu.VMEM((BH, Wp, P), jnp.bfloat16),      # halo'd conv1 output
            pltpu.VMEM((TH * W, 9 * P), jnp.bfloat16),  # conv2 im2col slab
        ],
    )
    return pl.pallas_call(
        kernel,
        out_shape=jax.ShapeDtypeStruct((N, H, W, C4), jnp.float32),
        grid_spec=grid_spec,
        compiler_params=pltpu.CompilerParams(
            # Batch and spatial-tile steps are fully independent -> both TCs
            # on v7x stay busy even for N=1; no-op on single-TC v5e/v6e.
            dimension_semantics=("parallel", "parallel"),
            vmem_limit_bytes=_vmem_limit_bytes()),
        cost_estimate=pl.CostEstimate(
            flops=flops, transcendentals=0, bytes_accessed=bytes_accessed),
    )(x_nhwc, w1, s1, b1, w2_flat, s2, b2, w3, s3, b3)


def init_params(key, inplanes, planes, eps=1e-5):
    """Deterministic synthetic parameters matching the module's shapes.
    Conv weights are stored bf16 (MXU operands); folded BN scale/shift f32."""
    ks = jax.random.split(key, 12)

    def bn(kg, kb, km, kv, c):
        gamma = jax.random.uniform(kg, (c,), minval=0.5, maxval=1.5)
        beta = jax.random.normal(kb, (c,)) * 0.1
        mean = jax.random.normal(km, (c,)) * 0.1
        var = jax.random.uniform(kv, (c,), minval=0.5, maxval=1.5)
        scale = gamma / jnp.sqrt(var + eps)
        bias = beta - mean * scale
        return (scale.reshape(1, c).astype(jnp.float32),
                bias.reshape(1, c).astype(jnp.float32))

    w1 = (jax.random.normal(ks[0], (inplanes, planes)) * 0.1).astype(jnp.bfloat16)
    w2 = (jax.random.normal(ks[1], (3, 3, planes, planes)) * 0.1).astype(jnp.bfloat16)
    w3 = (jax.random.normal(ks[2], (planes, planes * 4)) * 0.1).astype(jnp.bfloat16)
    s1, b1 = bn(ks[3], ks[4], ks[5], ks[6], planes)
    s2, b2 = bn(ks[7], ks[8], ks[9], ks[10], planes)
    s3, b3 = bn(*jax.random.split(ks[11], 4), planes * 4)
    return (w1, s1, b1, w2, s2, b2, w3, s3, b3)


def reference_forward(x, params, rate=1):
    """Pure-JAX reference (same NHWC layout, same bf16 matmul operands)."""
    (w1, s1, b1, w2, s2, b2, w3, s3, b3) = params
    y = jnp.einsum('nhwc,cp->nhwp', x.astype(jnp.bfloat16), w1,
                   preferred_element_type=jnp.float32)
    y = jnp.maximum(y * s1[0] + b1[0], 0.0)
    y = lax.conv_general_dilated(
        y.astype(jnp.bfloat16), w2, window_strides=(1, 1),
        padding=[(rate, rate), (rate, rate)],
        rhs_dilation=(rate, rate),
        dimension_numbers=('NHWC', 'HWIO', 'NHWC'),
        preferred_element_type=jnp.float32)
    y = jnp.maximum(y * s2[0] + b2[0], 0.0)
    y = jnp.einsum('nhwp,pq->nhwq', y.astype(jnp.bfloat16), w3,
                   preferred_element_type=jnp.float32)
    y = y * s3[0] + b3[0] + x
    return jnp.maximum(y, 0.0)


if __name__ == "__main__":
    N, H, W = 2, 16, 16
    planes = 8
    inplanes = planes * 4          # 32, so residual add works (downsample=None)

    key = jax.random.PRNGKey(0)
    kx, kp = jax.random.split(key)
    # Original PyTorch layout is NCHW; build it that way and transpose once.
    x_nchw = jax.random.normal(kx, (N, inplanes, H, W), dtype=jnp.float32)
    x_nhwc = jnp.transpose(x_nchw, (0, 2, 3, 1))

    params = init_params(kp, inplanes, planes)

    # Exercise both the spatially tiled path (halo recompute) and the
    # whole-image path, plus a dilation rate > 1, against the JAX reference.
    for rate, tile_h in ((1, 8), (1, None), (2, 8)):
        out = bottleneck_forward(x_nhwc, params, rate=rate, tile_h=tile_h)
        out = jax.block_until_ready(out)
        ref = reference_forward(x_nhwc, params, rate=rate)
        assert out.shape == (N, H, W, planes * 4)
        assert jnp.allclose(out, ref, atol=2e-2, rtol=2e-2), (
            f"mismatch vs reference (rate={rate}, tile_h={tile_h})")

    print("KERNEL_OK")
</pallas_src>

<mosaic_0001>
module attributes {stable_mosaic.version = 11 : i64} {
  func.func @_bottleneck_kernel(%arg0: i32, %arg1: i32, %arg2: memref<1x16x16x32xf32, #tpu.memory_space<vmem>>, %arg3: memref<32x8xbf16, #tpu.memory_space<vmem>>, %arg4: memref<1x8xf32, #tpu.memory_space<vmem>>, %arg5: memref<1x8xf32, #tpu.memory_space<vmem>>, %arg6: memref<72x8xbf16, #tpu.memory_space<vmem>>, %arg7: memref<1x8xf32, #tpu.memory_space<vmem>>, %arg8: memref<1x8xf32, #tpu.memory_space<vmem>>, %arg9: memref<8x32xbf16, #tpu.memory_space<vmem>>, %arg10: memref<1x32xf32, #tpu.memory_space<vmem>>, %arg11: memref<1x32xf32, #tpu.memory_space<vmem>>, %arg12: memref<1x8x16x32xf32, #tpu.memory_space<vmem>>, %arg13: memref<12x32x8xbf16, #tpu.memory_space<vmem>>, %arg14: memref<128x72xbf16, #tpu.memory_space<vmem>>) attributes {dimension_semantics = [#tpu.dimension_semantics<parallel>, #tpu.dimension_semantics<parallel>], iteration_bounds = array<i64: 2, 2>, scalar_prefetch = 0 : i64, scratch_operands = 2 : i64, tpu.core_type = #tpu.core_type<tc>, window_params = [{transform_indices = @transform_0, window_bounds = array<i64: 1, 16, 16, 32>}, {pipeline_mode = #tpu.pipeline_mode<synchronous>, transform_indices = @transform_1, window_bounds = array<i64: 32, 8>}, {pipeline_mode = #tpu.pipeline_mode<synchronous>, transform_indices = @transform_2, window_bounds = array<i64: 1, 8>}, {pipeline_mode = #tpu.pipeline_mode<synchronous>, transform_indices = @transform_3, window_bounds = array<i64: 1, 8>}, {pipeline_mode = #tpu.pipeline_mode<synchronous>, transform_indices = @transform_4, window_bounds = array<i64: 72, 8>}, {pipeline_mode = #tpu.pipeline_mode<synchronous>, transform_indices = @transform_5, window_bounds = array<i64: 1, 8>}, {pipeline_mode = #tpu.pipeline_mode<synchronous>, transform_indices = @transform_6, window_bounds = array<i64: 1, 8>}, {pipeline_mode = #tpu.pipeline_mode<synchronous>, transform_indices = @transform_7, window_bounds = array<i64: 8, 32>}, {pipeline_mode = #tpu.pipeline_mode<synchronous>, transform_indices = @transform_8, window_bounds = array<i64: 1, 32>}, {pipeline_mode = #tpu.pipeline_mode<synchronous>, transform_indices = @transform_9, window_bounds = array<i64: 1, 32>}, {transform_indices = @transform_10, window_bounds = array<i64: 1, 8, 16, 32>}]} {
    %c8_i32 = arith.constant 8 : i32
    %0 = arith.muli %arg1, %c8_i32 : i32
    %cst = arith.constant 0.000000e+00 : bf16
    %1 = vector.broadcast %cst : bf16 to vector<2x32x8xbf16>
    %c0 = arith.constant 0 : index
    %c0_0 = arith.constant 0 : index
    %c0_1 = arith.constant 0 : index
    %2 = vector.load %arg13[%c0, %c0_0, %c0_1] : memref<12x32x8xbf16, #tpu.memory_space<vmem>>, vector<2x32x8xbf16>
    tpu.vector_store %arg13[%c0, %c0_0, %c0_1], %1 {strides = array<i32>} : memref<12x32x8xbf16, #tpu.memory_space<vmem>>, vector<2x32x8xbf16>,
    %cst_2 = arith.constant 0.000000e+00 : bf16
    %3 = vector.broadcast %cst_2 : bf16 to vector<2x32x8xbf16>
    %c10 = arith.constant 10 : index
    %c0_3 = arith.constant 0 : index
    %c0_4 = arith.constant 0 : index
    %4 = vector.load %arg13[%c10, %c0_3, %c0_4] : memref<12x32x8xbf16, #tpu.memory_space<vmem>>, vector<2x32x8xbf16>
    tpu.vector_store %arg13[%c10, %c0_3, %c0_4], %3 {strides = array<i32>} : memref<12x32x8xbf16, #tpu.memory_space<vmem>>, vector<2x32x8xbf16>,
    %cst_5 = arith.constant 0.000000e+00 : bf16
    %5 = vector.broadcast %cst_5 : bf16 to vector<12x8x8xbf16>
    %c0_6 = arith.constant 0 : index
    %c0_7 = arith.constant 0 : index
    %c0_8 = arith.constant 0 : index
    %6 = vector.load %arg13[%c0_6, %c0_7, %c0_8] : memref<12x32x8xbf16, #tpu.memory_space<vmem>>, vector<12x8x8xbf16>
    tpu.vector_store %arg13[%c0_6, %c0_7, %c0_8], %5 {strides = array<i32>} : memref<12x32x8xbf16, #tpu.memory_space<vmem>>, vector<12x8x8xbf16>,
    %cst_9 = arith.constant 0.000000e+00 : bf16
    %7 = vector.broadcast %cst_9 : bf16 to vector<12x8x8xbf16>
    %c0_10 = arith.constant 0 : index
    %c24 = arith.constant 24 : index
    %c0_11 = arith.constant 0 : index
    %8 = vector.load %arg13[%c0_10, %c24, %c0_11] : memref<12x32x8xbf16, #tpu.memory_space<vmem>>, vector<12x8x8xbf16>
    tpu.vector_store %arg13[%c0_10, %c24, %c0_11], %7 {strides = array<i32>} : memref<12x32x8xbf16, #tpu.memory_space<vmem>>, vector<12x8x8xbf16>,
    %c1_i32 = arith.constant 1 : i32
    %9 = arith.subi %0, %c1_i32 : i32
    %c0_i32 = arith.constant 0 : i32
    %c6_i32 = arith.constant 6 : i32
    %10 = arith.maxsi %c0_i32, %9 : i32
    %11 = arith.minsi %c6_i32, %10 : i32
    %12 = arith.subi %11, %0 : i32
    %c2_i32 = arith.constant 2 : i32
    %13 = arith.addi %12, %c2_i32 : i32
    %c0_12 = arith.constant 0 : index
    %14 = arith.index_cast %11 : i32 to index
    %c0_13 = arith.constant 0 : index
    %c0_14 = arith.constant 0 : index
    %15 = vector.load %arg2[%c0_12, %14, %c0_13, %c0_14] : memref<1x16x16x32xf32, #tpu.memory_space<vmem>>, vector<1x10x16x32xf32>
    %16 = vector.shape_cast %15 : vector<1x10x16x32xf32> to vector<10x16x32xf32>
    %17 = vector.shape_cast %16 : vector<10x16x32xf32> to vector<160x32xf32>
    %18 = arith.truncf %17 : vector<160x32xf32> to vector<160x32xbf16>
    %c0_15 = arith.constant 0 : index
    %c0_16 = arith.constant 0 : index
    %19 = vector.load %arg3[%c0_15, %c0_16] : memref<32x8xbf16, #tpu.memory_space<vmem>>, vector<32x8xbf16>
    %cst_17 = arith.constant dense<0.000000e+00> : vector<160x8xf32>
    %20 = tpu.matmul %18, %19, %cst_17 {dimension_numbers = #tpu.dot_dimension_numbers<[1], [0], [0], [1], [0, 0, 1, 1], [], []>} : vector<160x32xbf16>, vector<32x8xbf16>, vector<160x8xf32> -> vector<160x8xf32>
    %c0_18 = arith.constant 0 : index
    %c0_19 = arith.constant 0 : index
    %21 = vector.load %arg4[%c0_18, %c0_19] : memref<1x8xf32, #tpu.memory_space<vmem>>, vector<1x8xf32>
    %22 = vector.broadcast %21 : vector<1x8xf32> to vector<160x8xf32>
    %23 = arith.mulf %20, %22 : vector<160x8xf32>
    %c0_20 = arith.constant 0 : index
    %c0_21 = arith.constant 0 : index
    %24 = vector.load %arg5[%c0_20, %c0_21] : memref<1x8xf32, #tpu.memory_space<vmem>>, vector<1x8xf32>
    %25 = vector.broadcast %24 : vector<1x8xf32> to vector<160x8xf32>
    %26 = arith.addf %23, %25 : vector<160x8xf32>
    %cst_22 = arith.constant 0.000000e+00 : f32
    %27 = vector.broadcast %cst_22 : f32 to vector<160x8xf32>
    %28 = arith.maximumf %26, %27 : vector<160x8xf32>
    %29 = vector.shape_cast %28 : vector<160x8xf32> to vector<10x16x8xf32>
    %30 = arith.truncf %29 : vector<10x16x8xf32> to vector<10x16x8xbf16>
    %31 = arith.index_cast %13 : i32 to index
    %c8 = arith.constant 8 : index
    %c0_23 = arith.constant 0 : index
    %32 = vector.load %arg13[%31, %c8, %c0_23] : memref<12x32x8xbf16, #tpu.memory_space<vmem>>, vector<10x16x8xbf16>
    tpu.vector_store %arg13[%31, %c8, %c0_23], %30 {strides = array<i32>} : memref<12x32x8xbf16, #tpu.memory_space<vmem>>, vector<10x16x8xbf16>,
    %c1 = arith.constant 1 : index
    %c7 = arith.constant 7 : index
    %c0_24 = arith.constant 0 : index
    %33 = vector.load %arg13[%c1, %c7, %c0_24] : memref<12x32x8xbf16, #tpu.memory_space<vmem>>, vector<8x16x8xbf16>
    %34 = vector.shape_cast %33 : vector<8x16x8xbf16> to vector<128x8xbf16>
    %c0_25 = arith.constant 0 : index
    %c0_26 = arith.constant 0 : index
    %35 = vector.load %arg14[%c0_25, %c0_26] : memref<128x72xbf16, #tpu.memory_space<vmem>>, vector<128x8xbf16>
    tpu.vector_store %arg14[%c0_25, %c0_26], %34 {strides = array<i32>} : memref<128x72xbf16, #tpu.memory_space<vmem>>, vector<128x8xbf16>,
    %c1_27 = arith.constant 1 : index
    %c8_28 = arith.constant 8 : index
    %c0_29 = arith.constant 0 : index
    %36 = vector.load %arg13[%c1_27, %c8_28, %c0_29] : memref<12x32x8xbf16, #tpu.memory_space<vmem>>, vector<8x16x8xbf16>
    %37 = vector.shape_cast %36 : vector<8x16x8xbf16> to vector<128x8xbf16>
    %c0_30 = arith.constant 0 : index
    %c8_31 = arith.constant 8 : index
    %38 = vector.load %arg14[%c0_30, %c8_31] : memref<128x72xbf16, #tpu.memory_space<vmem>>, vector<128x8xbf16>
    tpu.vector_store %arg14[%c0_30, %c8_31], %37 {strides = array<i32>} : memref<128x72xbf16, #tpu.memory_space<vmem>>, vector<128x8xbf16>,
    %c1_32 = arith.constant 1 : index
    %c9 = arith.constant 9 : index
    %c0_33 = arith.constant 0 : index
    %39 = vector.load %arg13[%c1_32, %c9, %c0_33] : memref<12x32x8xbf16, #tpu.memory_space<vmem>>, vector<8x16x8xbf16>
    %40 = vector.shape_cast %39 : vector<8x16x8xbf16> to vector<128x8xbf16>
    %c0_34 = arith.constant 0 : index
    %c16 = arith.constant 16 : index
    %41 = vector.load %arg14[%c0_34, %c16] : memref<128x72xbf16, #tpu.memory_space<vmem>>, vector<128x8xbf16>
    tpu.vector_store %arg14[%c0_34, %c16], %40 {strides = array<i32>} : memref<128x72xbf16, #tpu.memory_space<vmem>>, vector<128x8xbf16>,
    %c2 = arith.constant 2 : index
    %c7_35 = arith.constant 7 : index
    %c0_36 = arith.constant 0 : index
    %42 = vector.load %arg13[%c2, %c7_35, %c0_36] : memref<12x32x8xbf16, #tpu.memory_space<vmem>>, vector<8x16x8xbf16>
    %43 = vector.shape_cast %42 : vector<8x16x8xbf16> to vector<128x8xbf16>
    %c0_37 = arith.constant 0 : index
    %c24_38 = arith.constant 24 : index
    %44 = vector.load %arg14[%c0_37, %c24_38] : memref<128x72xbf16, #tpu.memory_space<vmem>>, vector<128x8xbf16>
    tpu.vector_store %arg14[%c0_37, %c24_38], %43 {strides = array<i32>} : memref<128x72xbf16, #tpu.memory_space<vmem>>, vector<128x8xbf16>,
    %c2_39 = arith.constant 2 : index
    %c8_40 = arith.constant 8 : index
    %c0_41 = arith.constant 0 : index
    %45 = vector.load %arg13[%c2_39, %c8_40, %c0_41] : memref<12x32x8xbf16, #tpu.memory_space<vmem>>, vector<8x16x8xbf16>
    %46 = vector.shape_cast %45 : vector<8x16x8xbf16> to vector<128x8xbf16>
    %c0_42 = arith.constant 0 : index
    %c32 = arith.constant 32 : index
    %47 = vector.load %arg14[%c0_42, %c32] : memref<128x72xbf16, #tpu.memory_space<vmem>>, vector<128x8xbf16>
    tpu.vector_store %arg14[%c0_42, %c32], %46 {strides = array<i32>} : memref<128x72xbf16, #tpu.memory_space<vmem>>, vector<128x8xbf16>,
    %c2_43 = arith.constant 2 : index
    %c9_44 = arith.constant 9 : index
    %c0_45 = arith.constant 0 : index
    %48 = vector.load %arg13[%c2_43, %c9_44, %c0_45] : memref<12x32x8xbf16, #tpu.memory_space<vmem>>, vector<8x16x8xbf16>
    %49 = vector.shape_cast %48 : vector<8x16x8xbf16> to vector<128x8xbf16>
    %c0_46 = arith.constant 0 : index
    %c40 = arith.constant 40 : index
    %50 = vector.load %arg14[%c0_46, %c40] : memref<128x72xbf16, #tpu.memory_space<vmem>>, vector<128x8xbf16>
    tpu.vector_store %arg14[%c0_46, %c40], %49 {strides = array<i32>} : memref<128x72xbf16, #tpu.memory_space<vmem>>, vector<128x8xbf16>,
    %c3 = arith.constant 3 : index
    %c7_47 = arith.constant 7 : index
    %c0_48 = arith.constant 0 : index
    %51 = vector.load %arg13[%c3, %c7_47, %c0_48] : memref<12x32x8xbf16, #tpu.memory_space<vmem>>, vector<8x16x8xbf16>
    %52 = vector.shape_cast %51 : vector<8x16x8xbf16> to vector<128x8xbf16>
    %c0_49 = arith.constant 0 : index
    %c48 = arith.constant 48 : index
    %53 = vector.load %arg14[%c0_49, %c48] : memref<128x72xbf16, #tpu.memory_space<vmem>>, vector<128x8xbf16>
    tpu.vector_store %arg14[%c0_49, %c48], %52 {strides = array<i32>} : memref<128x72xbf16, #tpu.memory_space<vmem>>, vector<128x8xbf16>,
    %c3_50 = arith.constant 3 : index
    %c8_51 = arith.constant 8 : index
    %c0_52 = arith.constant 0 : index
    %54 = vector.load %arg13[%c3_50, %c8_51, %c0_52] : memref<12x32x8xbf16, #tpu.memory_space<vmem>>, vector<8x16x8xbf16>
    %55 = vector.shape_cast %54 : vector<8x16x8xbf16> to vector<128x8xbf16>
    %c0_53 = arith.constant 0 : index
    %c56 = arith.constant 56 : index
    %56 = vector.load %arg14[%c0_53, %c56] : memref<128x72xbf16, #tpu.memory_space<vmem>>, vector<128x8xbf16>
    tpu.vector_store %arg14[%c0_53, %c56], %55 {strides = array<i32>} : memref<128x72xbf16, #tpu.memory_space<vmem>>, vector<128x8xbf16>,
    %c3_54 = arith.constant 3 : index
    %c9_55 = arith.constant 9 : index
    %c0_56 = arith.constant 0 : index
    %57 = vector.load %arg13[%c3_54, %c9_55, %c0_56] : memref<12x32x8xbf16, #tpu.memory_space<vmem>>, vector<8x16x8xbf16>
    %58 = vector.shape_cast %57 : vector<8x16x8xbf16> to vector<128x8xbf16>
    %c0_57 = arith.constant 0 : index
    %c64 = arith.constant 64 : index
    %59 = vector.load %arg14[%c0_57, %c64] : memref<128x72xbf16, #tpu.memory_space<vmem>>, vector<128x8xbf16>
    tpu.vector_store %arg14[%c0_57, %c64], %58 {strides = array<i32>} : memref<128x72xbf16, #tpu.memory_space<vmem>>, vector<128x8xbf16>,
    %c0_58 = arith.constant 0 : index
    %c0_59 = arith.constant 0 : index
    %60 = vector.load %arg14[%c0_58, %c0_59] : memref<128x72xbf16, #tpu.memory_space<vmem>>, vector<128x72xbf16>
    %c0_60 = arith.constant 0 : index
    %c0_61 = arith.constant 0 : index
    %61 = vector.load %arg6[%c0_60, %c0_61] : memref<72x8xbf16, #tpu.memory_space<vmem>>, vector<72x8xbf16>
    %cst_62 = arith.constant dense<0.000000e+00> : vector<128x8xf32>
    %62 = tpu.matmul %60, %61, %cst_62 {dimension_numbers = #tpu.dot_dimension_numbers<[1], [0], [0], [1], [0, 0, 1, 1], [], []>} : vector<128x72xbf16>, vector<72x8xbf16>, vector<128x8xf32> -> vector<128x8xf32>
    %c0_63 = arith.constant 0 : index
    %c0_64 = arith.constant 0 : index
    %63 = vector.load %arg7[%c0_63, %c0_64] : memref<1x8xf32, #tpu.memory_space<vmem>>, vector<1x8xf32>
    %64 = vector.broadcast %63 : vector<1x8xf32> to vector<128x8xf32>
    %65 = arith.mulf %62, %64 : vector<128x8xf32>
    %c0_65 = arith.constant 0 : index
    %c0_66 = arith.constant 0 : index
    %66 = vector.load %arg8[%c0_65, %c0_66] : memref<1x8xf32, #tpu.memory_space<vmem>>, vector<1x8xf32>
    %67 = vector.broadcast %66 : vector<1x8xf32> to vector<128x8xf32>
    %68 = arith.addf %65, %67 : vector<128x8xf32>
    %cst_67 = arith.constant 0.000000e+00 : f32
    %69 = vector.broadcast %cst_67 : f32 to vector<128x8xf32>
    %70 = arith.maximumf %68, %69 : vector<128x8xf32>
    %71 = arith.truncf %70 : vector<128x8xf32> to vector<128x8xbf16>
    %c0_68 = arith.constant 0 : index
    %c0_69 = arith.constant 0 : index
    %72 = vector.load %arg9[%c0_68, %c0_69] : memref<8x32xbf16, #tpu.memory_space<vmem>>, vector<8x32xbf16>
    %cst_70 = arith.constant dense<0.000000e+00> : vector<128x32xf32>
    %73 = tpu.matmul %71, %72, %cst_70 {dimension_numbers = #tpu.dot_dimension_numbers<[1], [0], [0], [1], [0, 0, 1, 1], [], []>} : vector<128x8xbf16>, vector<8x32xbf16>, vector<128x32xf32> -> vector<128x32xf32>
    %c0_71 = arith.constant 0 : index
    %c0_72 = arith.constant 0 : index
    %74 = vector.load %arg10[%c0_71, %c0_72] : memref<1x32xf32, #tpu.memory_space<vmem>>, vector<1x32xf32>
    %75 = vector.broadcast %74 : vector<1x32xf32> to vector<128x32xf32>
    %76 = arith.mulf %73, %75 : vector<128x32xf32>
    %c0_73 = arith.constant 0 : index
    %c0_74 = arith.constant 0 : index
    %77 = vector.load %arg11[%c0_73, %c0_74] : memref<1x32xf32, #tpu.memory_space<vmem>>, vector<1x32xf32>
    %78 = vector.broadcast %77 : vector<1x32xf32> to vector<128x32xf32>
    %79 = arith.addf %76, %78 : vector<128x32xf32>
    %c0_75 = arith.constant 0 : index
    %80 = arith.index_cast %0 : i32 to index
    %c0_76 = arith.constant 0 : index
    %c0_77 = arith.constant 0 : index
    %81 = vector.load %arg2[%c0_75, %80, %c0_76, %c0_77] : memref<1x16x16x32xf32, #tpu.memory_space<vmem>>, vector<1x8x16x32xf32>
    %82 = vector.shape_cast %81 : vector<1x8x16x32xf32> to vector<8x16x32xf32>
    %83 = vector.shape_cast %82 : vector<8x16x32xf32> to vector<128x32xf32>
    %84 = arith.addf %79, %83 : vector<128x32xf32>
    %cst_78 = arith.constant 0.000000e+00 : f32
    %85 = vector.broadcast %cst_78 : f32 to vector<128x32xf32>
    %86 = arith.maximumf %84, %85 : vector<128x32xf32>
    %87 = vector.shape_cast %86 : vector<128x32xf32> to vector<8x16x32xf32>
    %c0_79 = arith.constant 0 : index
    %c0_80 = arith.constant 0 : index
    %c0_81 = arith.constant 0 : index
    %c0_82 = arith.constant 0 : index
    %88 = vector.load %arg12[%c0_79, %c0_80, %c0_81, %c0_82] : memref<1x8x16x32xf32, #tpu.memory_space<vmem>>, vector<1x8x16x32xf32>
    %89 = vector.shape_cast %88 : vector<1x8x16x32xf32> to vector<8x16x32xf32>
    %90 = vector.shape_cast %87 : vector<8x16x32xf32> to vector<1x8x16x32xf32>
    tpu.vector_store %arg12[%c0_79, %c0_80, %c0_81, %c0_82], %90 {strides = array<i32>} : memref<1x8x16x32xf32, #tpu.memory_space<vmem>>, vector<1x8x16x32xf32>,
    return
  }
  func.func @transform_0(%arg0: i32, %arg1: i32) -> (i32, i32, i32, i32) {
    %c0_i32 = arith.constant 0 : i32
    %c0_i32_0 = arith.constant 0 : i32
    %c0_i32_1 = arith.constant 0 : i32
    %c0_i32_2 = arith.constant 0 : i32
    return %arg0, %c0_i32, %c0_i32_0, %c0_i32_1 : i32, i32, i32, i32
  }
  func.func @transform_1(%arg0: i32, %arg1: i32) -> (i32, i32) {
    %c0_i32 = arith.constant 0 : i32
    %c0_i32_0 = arith.constant 0 : i32
    %c0_i32_1 = arith.constant 0 : i32
    return %c0_i32, %c0_i32_0 : i32, i32
  }
  func.func @transform_2(%arg0: i32, %arg1: i32) -> (i32, i32) {
    %c0_i32 = arith.constant 0 : i32
    %c0_i32_0 = arith.constant 0 : i32
    %c0_i32_1 = arith.constant 0 : i32
    return %c0_i32, %c0_i32_0 : i32, i32
  }
  func.func @transform_3(%arg0: i32, %arg1: i32) -> (i32, i32) {
    %c0_i32 = arith.constant 0 : i32
    %c0_i32_0 = arith.constant 0 : i32
    %c0_i32_1 = arith.constant 0 : i32
    return %c0_i32, %c0_i32_0 : i32, i32
  }
  func.func @transform_4(%arg0: i32, %arg1: i32) -> (i32, i32) {
    %c0_i32 = arith.constant 0 : i32
    %c0_i32_0 = arith.constant 0 : i32
    %c0_i32_1 = arith.constant 0 : i32
    return %c0_i32, %c0_i32_0 : i32, i32
  }
  func.func @transform_5(%arg0: i32, %arg1: i32) -> (i32, i32) {
    %c0_i32 = arith.constant 0 : i32
    %c0_i32_0 = arith.constant 0 : i32
    %c0_i32_1 = arith.constant 0 : i32
    return %c0_i32, %c0_i32_0 : i32, i32
  }
  func.func @transform_6(%arg0: i32, %arg1: i32) -> (i32, i32) {
    %c0_i32 = arith.constant 0 : i32
    %c0_i32_0 = arith.constant 0 : i32
    %c0_i32_1 = arith.constant 0 : i32
    return %c0_i32, %c0_i32_0 : i32, i32
  }
  func.func @transform_7(%arg0: i32, %arg1: i32) -> (i32, i32) {
    %c0_i32 = arith.constant 0 : i32
    %c0_i32_0 = arith.constant 0 : i32
    %c0_i32_1 = arith.constant 0 : i32
    return %c0_i32, %c0_i32_0 : i32, i32
  }
  func.func @transform_8(%arg0: i32, %arg1: i32) -> (i32, i32) {
    %c0_i32 = arith.constant 0 : i32
    %c0_i32_0 = arith.constant 0 : i32
    %c0_i32_1 = arith.constant 0 : i32
    return %c0_i32, %c0_i32_0 : i32, i32
  }
  func.func @transform_9(%arg0: i32, %arg1: i32) -> (i32, i32) {
    %c0_i32 = arith.constant 0 : i32
    %c0_i32_0 = arith.constant 0 : i32
    %c0_i32_1 = arith.constant 0 : i32
    return %c0_i32, %c0_i32_0 : i32, i32
  }
  func.func @transform_10(%arg0: i32, %arg1: i32) -> (i32, i32, i32, i32) {
    %c0_i32 = arith.constant 0 : i32
    %c0_i32_0 = arith.constant 0 : i32
    %c0_i32_1 = arith.constant 0 : i32
    return %arg0, %arg1, %c0_i32, %c0_i32_0 : i32, i32, i32, i32
  }
}

</mosaic_0001>

<bundles_post_ra>
// kernel: tpu_custom_call.1
= control target key start
LH: loop header
LB: loop body
LE: loop exit
PB: predicated region body
PF: predicated region fallthrough
CT: control target
= control target key end

     0   :  { %s5472_s0 = inlined_call_operand.hbm [shape: f32[2,16,16,32], index: 0, kind: input, shape index: {}]   ;;  %s5473_s1 = inlined_call_operand.vmem [shape: bf16[32,8], index: 1, kind: input, shape index: {}]   ;;  %s5474_s2 = inlined_call_operand.vmem [shape: f32[1,8], index: 2, kind: input, shape index: {}]   ;;  %s5475_s3 = inlined_call_operand.vmem [shape: f32[1,8], index: 3, kind: input, shape index: {}]   ;;  %s5476_s4 = inlined_call_operand.vmem [shape: bf16[72,8], index: 4, kind: input, shape index: {}]   ;;  %s5477_s5 = inlined_call_operand.vmem [shape: f32[1,8], index: 5, kind: input, shape index: {}]   ;;  %s5478_s6 = inlined_call_operand.vmem [shape: f32[1,8], index: 6, kind: input, shape index: {}]   ;;  %s5479_s7 = inlined_call_operand.vmem [shape: bf16[8,32], index: 7, kind: input, shape index: {}]   ;;  %s5480_s8 = inlined_call_operand.vmem [shape: f32[1,32], index: 8, kind: input, shape index: {}]   ;;  %s5481_s9 = inlined_call_operand.vmem [shape: f32[1,32], index: 9, kind: input, shape index: {}]   ;;  %s5482_s10 = inlined_call_operand.hbm [shape: f32[2,16,16,32], index: 10, kind: output, shape index: {}]  }
   0x1   :  { %5490 = sst [smem:[#allocation30_spill]] %s5478_s6 }
   0x2   :  { %5491 = sst [smem:[#allocation31_spill]] %s5480_s8 }
   0x3   :  { %5492 = sst [smem:[#allocation32_spill]] %s5481_s9 }
   0x4   :  { %5493 = sst [smem:[#allocation33_spill]] %s5482_s10 }
   0x5   :  { %15 = vsyncpa [#allocation5], 0 }
   0x6   :  { %17 = vsyncpa [#allocation5 + $0x1], 0 }
   0x7   :  { %18 = vsyncpa [#allocation6], 0 }
   0x8   :  { %20 = vsyncpa [#allocation6 + $0x1], 0  ;;  %s3974_s13 = smov 0   ;;  %s3976_s14 = smov 0  }
   0x9   :  { %s3978_s15 = smov 0   ;;  %s3980_s16 = smov 0  }
   0xa   :  { %s3982_s17 = smov 0   ;;  %s3984_s18 = smov 0  }
   0xb   :  { %s3986_s19 = smov 0   ;;  %s3988_s20 = smov 0  }
   0xc   :  { %s3990_s21 = smov 0   ;;  %s3992_s22 = smov 0  }
   0xd   :  { %s3994_s23 = smov 0  }
   0xe LB: > { %5494 = sst [smem:[#allocation10_spill]] %s3891_s20  ;;  %s3355_s24 = sadd.s32 4294967295, %s3903_s23   ;;  %s3903_s23 = sphi %s3994_s23, %s26_s23   ;;  %s3899_s22 = sphi %s3992_s22, %s5546_s22   ;;  %s3895_s21 = sphi %s3990_s21, %s5554_s21   ;;  %s3891_s20 = sphi %s3988_s20, %s5553_s20   ;;  %s3887_s19 = sphi %s3986_s19, %s5543_s19   ;;  %s3883_s18 = sphi %s3984_s18, %s5552_s18   ;;  %s3879_s17 = sphi %s3982_s17, %s5551_s17   ;;  %s3875_s16 = sphi %s3980_s16, %s5550_s16   ;;  %s3871_s15 = sphi %s3978_s15, %s5549_s15   ;;  %s3867_s14 = sphi %s3976_s14, %s5548_s14   ;;  %s3863_s13 = sphi %s3974_s13, %s5547_s13  }
   0xf   : > { %5495 = sst [smem:[#allocation11_spill]] %s3895_s21  ;;  %s3356_s25 = sadd.s32 4294967294, %s3903_s23  }
  0x10   : > { %5496 = sst [smem:[#allocation12_spill]] %s3899_s22  ;;  %s35_s26 = sadd.s32 1, %s3895_s21 }
  0x11   : > { %s38_s27 = sadd.s32 1, %s3899_s22  ;;  %p36_p0 = scmp.ge.s32.totalorder %s35_s26, 2 }
  0x12   : > { %s45_s28 = sadd.s32 1, %s3883_s18  ;;  %p52_p1 = scmp.ne.s32.totalorder %s3883_s18, %s3879_s17 }
  0x13   : > { %p53_p2 = scmp.eq.s32.totalorder %s3903_s23, 0  ;;  %s5556_s26 = smov (%p36_p0, %s35_s26), 0 }
  0x14   : > { %5497 = sst [smem:[#allocation13_spill]] %s5556_s26  ;;  %s5558_s27 = smov (!%p36_p0, %s38_s27), %s3899_s22 }
  0x15   : > { %p4038_p3 = por %p53_p2, %p52_p1  ;;  %p58_p4 = scmp.ne.s32.totalorder %s3879_s17, %s3875_s16 }
  0x16   : > { %p40_p5 = scmp.ge.s32.totalorder %s5558_s27, 2  ;;  %p59_p6 = scmp.eq.s32.totalorder %s3355_s24, 0 }
  0x17   : > { %s258_s30 = ssub.s32 %s3895_s21, %s5556_s26  ;;  %s262_s11 = sadd.s32 1, %s3871_s15 }
  0x18   : > { %s5560_s27 = smov (%p40_p5, %s5558_s27), 0  ;;  %p4048_p7 = por %p59_p6, %p58_p4 }
  0x19   : > { %5499 = sst [smem:[#allocation14_spill]] %s5560_s27  ;;  %p272_p8 = scmp.ne.s32.totalorder %s3871_s15, %s3867_s14 }
  0x1a   : > { %s42_s10 = ssub.s32 %s3899_s22, %s5560_s27  ;;  %p273_p9 = scmp.eq.s32.totalorder %s3355_s24, 3 }
  0x1b   : > { %p43_p10 = scmp.eq.s32.totalorder %s42_s10, 0  ;;  %s259_s16 = sor.u32 %s258_s30, %s42_s10 }
  0x1c   : > { %p260_p11 = scmp.eq.s32.totalorder %s259_s16, 0  ;;  %p4056_p12 = por %p273_p9, %p272_p8 }
  0x1d   : > { %s4061_s21 = scalar_select %p43_p10, %s3883_s18, %s45_s28  }
  0x1e   : > { %s5501_s26 = scalar_select %p4056_p12, 1, 0 }
  0x1f   : > { %s4064_s20 = scalar_select %p260_p11, %s3871_s15, %s262_s11  }
  0x20   : > { %5502 = sst [smem:[#allocation15_spill]] %s5501_s26  ;;  %p278_p13 = scmp.ne.s32.totalorder %s3867_s14, %s3863_s13 }
  0x21   : > { %p279_p0 = scmp.eq.s32.totalorder %s3356_s25, 3  ;;  %p3638_p1 = scmp.lt.s32.totalorder %s3903_s23, 4 }
  0x22   : > { %s326_s24 = sand.u32 1, %s3883_s18   ;;  %s3493_s30 = sshll.u32 %s3899_s22, 12 }
  0x23   : > { %p4069_p2 = por %p279_p0, %p278_p13  ;;  %s3359_s10 = sshll.u32 %s326_s24, 8 }
  0x24   : > { %s336_s8 = scalar_lea.hbm %s5472_s0, %s3493_s30  ;;  %s330_s6 = scalar_lea.vmem [#allocation4], %s3359_s10 }
  0x25   : > { %s337_s26 = sshll.u32 %s330_s6, 4  ;;  %p4080_p4 = pnand %p3638_p1, %p4038_p3  ;;  %s338_s26 = int_to_ptr.vmem [resolvable:$true] %s337_s26 }
  0x26   : > { %p3362_p5 = scmp.ge.s32.totalorder %s3903_s23, 1  ;;  %s327_s25 = scalar_lea.sflag [#allocation5], %s326_s24 }
  0x27   : > { %p3757_p6 = pneg %p4080_p4  ;;  %s3768_s11 = scalar_lea.vmem %s338_s26, 4096 }
  0x28   : > { %p3769_p8 = scmp.ne.s32.totalorder %s338_s26, %s3768_s11  ;;  %s3905_s22 = smov [#allocation4]  }
  0x29   : > { %s3773_s27 = sshll.u32 %s3905_s22, 4  ;;  %s3774_s27 = int_to_ptr.vmem [resolvable:$false] %s3773_s27 }
  0x2a   : > { %p3771_p9 = pnand %p3769_p8, %p3757_p6  ;;  %s3775_s10 = scalar_lea.vmem %s3774_s27, 8192 }
  0x2b   : > { %p3776_p11 = scmp.lt.s32.totalorder %s338_s26, %s3774_s27  ;;  %p3777_p13 = scmp.lt.s32.totalorder %s3775_s10, %s3768_s11 }
  0x2c   : > { %p3772_p10 = pneg %p3771_p9 }
  0x2d   : > { %p3778_p0 = por %p3777_p13, %p3776_p11 }
  0x2f   : > { %p3779_p3 = pnand %p3778_p0, %p3772_p10 }
  0x31   : > { %3782 = shalt.err (!%p3779_p3)
}
  0x32   : > { %s3906_s6 = smov 128   ;;  %s3907_s29 = smov 8  }
  0x33   : > { %3633 = dma.hbm_to_vmem [thread:$0]  (!%p4080_p4), %s336_s8, 4096, %s338_s26, %s327_s25, %s3906_s6, %s3906_s6, %s3907_s29  }
  0x34   : > { %p345_p1 = scmp.lt.s32.totalorder %s3903_s23, 5 }
  0x36   : > { %p346_p6 = pnand %p3362_p5, %p345_p1 }
  0x38   : > { %349 = sbr.rel (%p346_p6) target bundleno = 1112 (0x458), region = 60 }
  0x3d   : > { %s351_s22 = sand.u32 1, %s3879_s17  }
  0x3e   : > { %s4093_s24 = sshll.u32 %s351_s22, 8  ;;  %s352_s30 = scalar_lea.sflag [#allocation5], %s351_s22 }
  0x3f   : > { %s355_s16 = scalar_lea.vmem [#allocation4], %s4093_s24 }
  0x40   : > { %3854 = dma.done.wait (%p4048_p7), %s352_s30, 4096  }
  0x41   : > { %3856 = vsyncadd (%p4048_p7), %s352_s30, 4294963200  ;;  %s3365_s8 = sshll.u32 %s3887_s19, 3  ;;  %v3740_v0 = vld [vmem:[%s5473_s1 + $0x8] sm:$0xff]   ;;  %v3741_v1 = vld [vmem:[%s5473_s1] sm:$0xff]   ;;  %vm492_vm0 = vcmask 261120   ;;  %vm395_vm1 = vcmask 60416  }
  0x42   : > { %s3366_s26 = sadd.s32 4294967295, %s3365_s8  ;;  %3552 = vmatprep.subr.bf16.mxu0 %v3740_v0  ;;  %3620 = vmatprep.subr.bf16.mxu1 %v3740_v0  ;;  %v3908_v32 = vmov 0   ;;  %v4174_v33 = vld [vmem:[%s5474_s2] ss:$0 sm:$0xff]  ;;  %s3909_s25 = smov 8   ;;  %vm1129_vm5 = vcmask 126016  }
  0x43   : > { %p438_p4 = scmp.gt.s32.totalorder %s3366_s26, 0  ;;  %p3367_p5 = scmp.lt.s32.totalorder %s3366_s26, 6  ;;  %3553 = vmatpush3.bf16.msra.mxu0 %v3740_v0  ;;  %3622 = vmatpush3.bf16.msra.mxu1 %v3740_v0  ;;  %400 = vst.msk [vmem:[#allocation2 + $0x10] sm:$0xf] %vm395_vm1, %v3908_v32  ;;  %401 = vst.msk [vmem:[#allocation2 + $0x14] sm:$0xf] %vm395_vm1, %v3908_v32 }
  0x44   : > { %3554 = vmatprep.subr.bf16.mxu0 %v3741_v1  ;;  %3621 = vmatprep.subr.bf16.mxu1 %v3741_v1  ;;  %402 = vst.msk [vmem:[#allocation2 + $0x18] sm:$0xf] %vm395_vm1, %v3908_v32  ;;  %403 = vst.msk [vmem:[#allocation2 + $0x1c] sm:$0xf] %vm395_vm1, %v3908_v32  ;;  %v4179_v35 = vld [vmem:[%s5475_s3] ss:$0 sm:$0xff] }
  0x45   : > { %s5562_s26 = smov (!%p438_p4, %s3366_s26), 0  ;;  %405 = vst.msk [vmem:[#allocation2 + $0xa0] sm:$0xf] %vm395_vm1, %v3908_v32  ;;  %406 = vst.msk [vmem:[#allocation2 + $0xa4] sm:$0xf] %vm395_vm1, %v3908_v32  ;;  %s3910_s11 = smov 32  }
  0x46   : > { %s5564_s26 = smov (!%p3367_p5, %s5562_s26), 6  ;;  %407 = vst.msk [vmem:[#allocation2 + $0xa8] sm:$0xf] %vm395_vm1, %v3908_v32  ;;  %408 = vst.msk [vmem:[#allocation2 + $0xac] sm:$0xf] %vm395_vm1, %v3908_v32  ;;  %s3911_s27 = smov 56  }
  0x47   : > { %s4107_s10 = ssub.s32 %s5564_s26, %s3365_s8  ;;  %s3372_s12 = sshll.u32 %s5564_s26, 4  ;;  %3555 = vmatpush3.bf16.msra.mxu0 %v3741_v1  ;;  %3623 = vmatpush3.bf16.msra.mxu1 %v3741_v1  ;;  %415 = vst.msk [vmem:[#allocation2 + $0x20] sm:$0xf] %vm395_vm1, %v3908_v32  ;;  %416 = vst.msk [vmem:[#allocation2 + $0x30] sm:$0xf] %vm395_vm1, %v3908_v32  ;;  %vm2835_vm9 = vcmask 1043456  }
  0x48   : > { %s4111_s6 = scalar_lea.vmem %s355_s16, %s3372_s12 [#allocation4]  ;;  %417 = vst.msk [vmem:[#allocation2 + $0x40] sm:$0xf] %vm395_vm1, %v3908_v32  ;;  %418 = vst.msk [vmem:[#allocation2 + $0x50] sm:$0xf] %vm395_vm1, %v3908_v32  ;;  %s3407_s26 = sshll.u32 %s4107_s10, 4  ;;  %vm1413_vm10 = vcmask 191616  }
  0x49   : > { %v446_v2 = vld [vmem:[%s4111_s6] sm:$0xff]  ;;  %v447_v3 = vld [vmem:[%s4111_s6 + $0x8] sm:$0xff]  ;;  %v448_v4 = vld [vmem:[%s4111_s6 + $0x10] sm:$0xff]  ;;  %419 = vst.msk [vmem:[#allocation2 + $0x60] sm:$0xf] %vm395_vm1, %v3908_v32  ;;  %s4198_s28 = scalar_lea.vmem [#allocation2], %s3407_s26 }
  0x4a   : > { %v466_v5 = vpack.c.bf16 %v447_v3, %v446_v2  ;;  %v449_v6 = vld [vmem:[%s4111_s6 + $0x18] sm:$0xff]  ;;  %v458_v7 = vld [vmem:[%s4111_s6 + $0x60] sm:$0xff]  ;;  %v459_v8 = vld [vmem:[%s4111_s6 + $0x68] sm:$0xff]  ;;  %420 = vst.msk [vmem:[#allocation2 + $0x70] sm:$0xf] %vm395_vm1, %v3908_v32  ;;  %s3912_s10 = smov 24  }
  0x4b   : > { %v472_v9 = vpack.c.bf16 %v459_v8, %v458_v7  ;;  %v460_v10 = vld [vmem:[%s4111_s6 + $0x70] sm:$0xff]  ;;  %v461_v11 = vld [vmem:[%s4111_s6 + $0x78] sm:$0xff]  ;;  %v450_v12 = vld [vmem:[%s4111_s6 + $0x20] sm:$0xff]  ;;  %v467_v13 = vpack.c.bf16 %v449_v6, %v448_v4  ;;  %421 = vst.msk [vmem:[#allocation2 + $0x80] sm:$0xf] %vm395_vm1, %v3908_v32  ;;  %s3913_s12 = smov 48  }
  0x4c   : > { %3556 = vmatprep.mubr.msk.bf16.mxu0 %vm492_vm0, %v466_v5  ;;  %v473_v14 = vpack.c.bf16 %v461_v11, %v460_v10  ;;  %v451_v15 = vld [vmem:[%s4111_s6 + $0x28] sm:$0xff]  ;;  %v462_v17 = vld [vmem:[%s4111_s6 + $0x80] sm:$0xff]  ;;  %v452_v20 = vld [vmem:[%s4111_s6 + $0x30] sm:$0xff]  ;;  %422 = vst.msk [vmem:[#allocation2 + $0x90] sm:$0xf] %vm395_vm1, %v3908_v32  ;;  %s3915_s29 = smov 40  }
  0x4d   : > { %v468_v16 = vpack.c.bf16 %v451_v15, %v450_v12  ;;  %v463_v18 = vld [vmem:[%s4111_s6 + $0x88] sm:$0xff]  ;;  %3568 = vmatprep.mubr.msk.bf16.mxu1 %vm492_vm0, %v472_v9  ;;  %v453_v21 = vld [vmem:[%s4111_s6 + $0x38] sm:$0xff]  ;;  %v464_v22 = vld [vmem:[%s4111_s6 + $0x90] sm:$0xff]  ;;  %3557 = vmatmul.mubr.msk.bf16.vlgmr.msra.gmra.mxu0 %vm492_vm0, %v467_v13  ;;  %427 = vst.msk [vmem:[#allocation2 + $0x2c] sm:$0xf] %vm395_vm1, %v3908_v32  ;;  %s3916_s22 = smov 64  }
  0x4e   : > { %v474_v19 = vpack.c.bf16 %v463_v18, %v462_v17  ;;  %v465_v23 = vld [vmem:[%s4111_s6 + $0x98] sm:$0xff]  ;;  %3569 = vmatmul.mubr.msk.bf16.vlgmr.msra.gmra.mxu1 %vm492_vm0, %v473_v14  ;;  %v454_v24 = vld [vmem:[%s4111_s6 + $0x40] sm:$0xff]  ;;  %v455_v25 = vld [vmem:[%s4111_s6 + $0x48] sm:$0xff]  ;;  %v469_v26 = vpack.c.bf16 %v453_v21, %v452_v20  ;;  %428 = vst.msk [vmem:[#allocation2 + $0x3c] sm:$0xf] %vm395_vm1, %v3908_v32  ;;  %vm1679_vm11 = vcmask 257216  }
  0x4f   : > { %3560 = vmatprep.mubr.msk.bf16.mxu0 %vm492_vm0, %v468_v16  ;;  %v475_v27 = vpack.c.bf16 %v465_v23, %v464_v22  ;;  %v470_v28 = vpack.c.bf16 %v455_v25, %v454_v24  ;;  %v456_v29 = vld [vmem:[%s4111_s6 + $0x50] sm:$0xff]  ;;  %v457_v30 = vld [vmem:[%s4111_s6 + $0x58] sm:$0xff]  ;;  %429 = vst.msk [vmem:[#allocation2 + $0x4c] sm:$0xf] %vm395_vm1, %v3908_v32  ;;  %430 = vst.msk [vmem:[#allocation2 + $0x5c] sm:$0xf] %vm395_vm1, %v3908_v32 }
  0x50   : > { %3572 = vmatprep.mubr.msk.bf16.mxu1 %vm492_vm0, %v474_v19  ;;  %v471_v31 = vpack.c.bf16 %v457_v30, %v456_v29  ;;  %431 = vst.msk [vmem:[#allocation2 + $0x6c] sm:$0xf] %vm395_vm1, %v3908_v32  ;;  %432 = vst.msk [vmem:[#allocation2 + $0x7c] sm:$0xf] %vm395_vm1, %v3908_v32  ;;  %vm838_vm2 = vsmask.f32 256 }
  0x51   : > { %433 = vst.msk [vmem:[#allocation2 + $0x8c] sm:$0xf] %vm395_vm1, %v3908_v32  ;;  %434 = vst.msk [vmem:[#allocation2 + $0x9c] sm:$0xf] %vm395_vm1, %v3908_v32  ;;  %vm839_vm3 = vsmask.f32 4368 }
  0x52   : > { %414 = vst.msk [vmem:[#allocation2 + $0x10] sm:$0xf] %vm395_vm1, %v3908_v32  ;;  %423 = vst.msk [vmem:[#allocation2 + $0xa0] sm:$0xf] %vm395_vm1, %v3908_v32  ;;  %vm1170_vm6 = vsmask.f32 3328 }
  0x53   : > { %426 = vst.msk [vmem:[#allocation2 + $0x1c] sm:$0xf] %vm395_vm1, %v3908_v32  ;;  %435 = vst.msk [vmem:[#allocation2 + $0xac] sm:$0xf] %vm395_vm1, %v3908_v32  ;;  %vm1171_vm7 = vsmask.f32 7440 }
  0x54   : > { %vm4284_vm4 = vmor %vm838_vm2, %vm839_vm3  ;;  %s3914_s6 = smov 16   ;;  %vm1776_vm12 = vcmask 322816   ;;  %vm2057_vm13 = vcmask 388416   ;;  %vm2323_vm14 = vcmask 454016   ;;  %vm2420_vm15 = vcmask 519616   ;;  %s5538_s8 = sld [smem:[#allocation31_spill]] }
  0x55   : > { %3561 = vmatmul.mubr.msk.bf16.gmra.mxu0 %vm492_vm0, %v469_v26  ;;  %vm4683_vm8 = vmor %vm1170_vm6, %vm1171_vm7  ;;  %vm2810_vm2 = vcmask 588800   ;;  %vm3007_vm3 = vcmask 64512   ;;  %s5542_s26 = sld [smem:[#allocation33_spill]] }
  0x56   : > { %3573 = vmatmul.mubr.msk.bf16.gmra.mxu1 %vm492_vm0, %v475_v27  ;;  %3564 = vmatprep.mubr.msk.bf16.mxu0 %vm492_vm0, %v470_v28 }
  0x5d   : > { %3565 = vmatmul.mubr.msk.bf16.gmra.mxu0 %vm492_vm0, %v471_v31 }
 0x10d   : > { %v3558_v34 = vpop.f32.mrf.mxu0 }
 0x10e   : > { %v3570_v36 = vpop.f32.mrf.mxu1  ;;  %v645_v37 = vmul.f32 %v3558_v34, %v4174_v33 }
 0x10f   : > { %v657_v38 = vmul.f32 %v3570_v36, %v4174_v33  ;;  %v557_v39 = vpop.f32.mrf.mxu0 }
 0x110   : > { %v605_v40 = vpop.f32.mrf.mxu1  ;;  %v672_v41 = vadd.f32 %v4179_v35, %v645_v37  ;;  %v643_v42 = vmul.f32 %v4174_v33, %v557_v39 }
 0x111   : > { %v684_v43 = vadd.f32 %v4179_v35, %v657_v38  ;;  %v655_v44 = vmul.f32 %v4174_v33, %v605_v40  ;;  %v3559_v45 = vpop.f32.mrf.mxu0 }
 0x112   : > { %v3571_v46 = vpop.f32.mrf.mxu1  ;;  %v692_v47 = vmax.f32 %v672_v41, 0.0  ;;  %v670_v48 = vadd.f32 %v4179_v35, %v643_v42  ;;  %v646_v50 = vmul.f32 %v3559_v45, %v4174_v33 }
 0x113   : > { %v704_v49 = vmax.f32 %v684_v43, 0.0  ;;  %v682_v51 = vadd.f32 %v4179_v35, %v655_v44  ;;  %v560_v52 = vpop.f32.mrf.mxu0  ;;  %v658_v53 = vmul.f32 %v3571_v46, %v4174_v33 }
 0x114   : > { %v608_v54 = vpop.f32.mrf.mxu1  ;;  %v3498_v55 = vpack.c.bf16 %v692_v47, %v692_v47  ;;  %v690_v56 = vmax.f32 %v670_v48, 0.0  ;;  %v673_v58 = vadd.f32 %v4179_v35, %v646_v50  ;;  %v644_v60 = vmul.f32 %v4174_v33, %v560_v52 }
 0x115   : > { %v3510_v57 = vpack.c.bf16 %v704_v49, %v704_v49  ;;  %v702_v59 = vmax.f32 %v682_v51, 0.0  ;;  %v685_v61 = vadd.f32 %v4179_v35, %v658_v53  ;;  %v3562_v62 = vpop.f32.mrf.mxu0  ;;  %v656_v63 = vmul.f32 %v4174_v33, %v608_v54 }
 0x116   : > { %v3574_v0 = vpop.f32.mrf.mxu1  ;;  %v3496_v1 = vpack.c.bf16 %v690_v56, %v690_v56  ;;  %v693_v2 = vmax.f32 %v673_v58, 0.0  ;;  %v649_v3 = vmul.f32 %v3562_v62, %v4174_v33  ;;  %3410 = vst.msk [vmem:[%s4198_s28 + $0x34] sm:$0xf] %vm395_vm1, %v3498_v55  ;;  %v671_v6 = vadd.f32 %v4179_v35, %v644_v60 }
 0x117   : > { %v661_v4 = vmul.f32 %v3574_v0, %v4174_v33  ;;  %3422 = vst.msk [vmem:[%s4198_s28 + $0x94] sm:$0xf] %vm395_vm1, %v3510_v57  ;;  %v3508_v5 = vpack.c.bf16 %v702_v59, %v702_v59  ;;  %v705_v7 = vmax.f32 %v685_v61, 0.0  ;;  %v683_v8 = vadd.f32 %v4179_v35, %v656_v63  ;;  %v573_v9 = vpop.f32.mrf.mxu0 }
 0x118   : > { %v621_v10 = vpop.f32.mrf.mxu1  ;;  %v3499_v11 = vpack.c.bf16 %v693_v2, %v693_v2  ;;  %v676_v12 = vadd.f32 %v4179_v35, %v649_v3  ;;  %v647_v13 = vmul.f32 %v4174_v33, %v573_v9  ;;  %3408 = vst.msk [vmem:[%s4198_s28 + $0x24] sm:$0xf] %vm395_vm1, %v3496_v1  ;;  %v691_v15 = vmax.f32 %v671_v6, 0.0 }
 0x119   : > { %v688_v14 = vadd.f32 %v4179_v35, %v661_v4  ;;  %v3511_v16 = vpack.c.bf16 %v705_v7, %v705_v7  ;;  %v703_v17 = vmax.f32 %v683_v8, 0.0  ;;  %v3563_v18 = vpop.f32.mrf.mxu0  ;;  %v659_v19 = vmul.f32 %v4174_v33, %v621_v10  ;;  %3420 = vst.msk [vmem:[%s4198_s28 + $0x84] sm:$0xf] %vm395_vm1, %v3508_v5 }
 0x11a   : > { %v3575_v20 = vpop.f32.mrf.mxu1  ;;  %v696_v21 = vmax.f32 %v676_v12, 0.0  ;;  %v674_v22 = vadd.f32 %v4179_v35, %v647_v13  ;;  %v650_v24 = vmul.f32 %v3563_v18, %v4174_v33  ;;  %3411 = vst.msk [vmem:[%s4198_s28 + $0x38] sm:$0xf] %vm395_vm1, %v3499_v11  ;;  %v3497_v25 = vpack.c.bf16 %v691_v15, %v691_v15 }
 0x11b   : > { %v708_v23 = vmax.f32 %v688_v14, 0.0  ;;  %v3509_v26 = vpack.c.bf16 %v703_v17, %v703_v17  ;;  %v686_v27 = vadd.f32 %v4179_v35, %v659_v19  ;;  %v576_v28 = vpop.f32.mrf.mxu0  ;;  %v662_v29 = vmul.f32 %v3575_v20, %v4174_v33  ;;  %3423 = vst.msk [vmem:[%s4198_s28 + $0x98] sm:$0xf] %vm395_vm1, %v3511_v16 }
 0x11c   : > { %v624_v30 = vpop.f32.mrf.mxu1  ;;  %v3502_v31 = vpack.c.bf16 %v696_v21, %v696_v21  ;;  %v694_v32 = vmax.f32 %v674_v22, 0.0  ;;  %v677_v36 = vadd.f32 %v4179_v35, %v650_v24  ;;  %v648_v38 = vmul.f32 %v4174_v33, %v576_v28  ;;  %3409 = vst.msk [vmem:[%s4198_s28 + $0x28] sm:$0xf] %vm395_vm1, %v3497_v25 }
 0x11d   : > { %v3514_v34 = vpack.c.bf16 %v708_v23, %v708_v23  ;;  %v706_v37 = vmax.f32 %v686_v27, 0.0  ;;  %v689_v39 = vadd.f32 %v4179_v35, %v662_v29  ;;  %v3566_v40 = vpop.f32.mrf.mxu0  ;;  %v660_v41 = vmul.f32 %v4174_v33, %v624_v30  ;;  %3421 = vst.msk [vmem:[%s4198_s28 + $0x88] sm:$0xf] %vm395_vm1, %v3509_v26 }
 0x11e   : > { %v3500_v42 = vpack.c.bf16 %v694_v32, %v694_v32  ;;  %v697_v43 = vmax.f32 %v677_v36, 0.0  ;;  %v653_v44 = vmul.f32 %v3566_v40, %v4174_v33  ;;  %3414 = vst.msk [vmem:[%s4198_s28 + $0x54] sm:$0xf] %vm395_vm1, %v3502_v31  ;;  %v675_v46 = vadd.f32 %v4179_v35, %v648_v38 }
 0x11f   : > { %3426 = vst.msk [vmem:[%s4198_s28 + $0xb4] sm:$0xf] %vm395_vm1, %v3514_v34  ;;  %v3512_v45 = vpack.c.bf16 %v706_v37, %v706_v37  ;;  %v709_v47 = vmax.f32 %v689_v39, 0.0  ;;  %v687_v48 = vadd.f32 %v4179_v35, %v660_v41  ;;  %v589_v49 = vpop.f32.mrf.mxu0 }
 0x120   : > { %v3503_v50 = vpack.c.bf16 %v697_v43, %v697_v43  ;;  %v680_v51 = vadd.f32 %v4179_v35, %v653_v44  ;;  %v651_v52 = vmul.f32 %v4174_v33, %v589_v49  ;;  %3412 = vst.msk [vmem:[%s4198_s28 + $0x44] sm:$0xf] %vm395_vm1, %v3500_v42  ;;  %v695_v53 = vmax.f32 %v675_v46, 0.0 }
 0x121   : > { %v3515_v54 = vpack.c.bf16 %v709_v47, %v709_v47  ;;  %v707_v55 = vmax.f32 %v687_v48, 0.0  ;;  %v3567_v56 = vpop.f32.mrf.mxu0  ;;  %3424 = vst.msk [vmem:[%s4198_s28 + $0xa4] sm:$0xf] %vm395_vm1, %v3512_v45 }
 0x122   : > { %v700_v57 = vmax.f32 %v680_v51, 0.0  ;;  %v678_v58 = vadd.f32 %v4179_v35, %v651_v52  ;;  %v654_v59 = vmul.f32 %v3567_v56, %v4174_v33  ;;  %3415 = vst.msk [vmem:[%s4198_s28 + $0x58] sm:$0xf] %vm395_vm1, %v3503_v50  ;;  %v3501_v60 = vpack.c.bf16 %v695_v53, %v695_v53 }
 0x123   : > { %v3513_v61 = vpack.c.bf16 %v707_v55, %v707_v55  ;;  %v592_v62 = vpop.f32.mrf.mxu0  ;;  %3427 = vst.msk [vmem:[%s4198_s28 + $0xb8] sm:$0xf] %vm395_vm1, %v3515_v54 }
 0x124   : > { %v3506_v63 = vpack.c.bf16 %v700_v57, %v700_v57  ;;  %v698_v0 = vmax.f32 %v678_v58, 0.0  ;;  %v681_v1 = vadd.f32 %v4179_v35, %v654_v59  ;;  %v652_v2 = vmul.f32 %v4174_v33, %v592_v62  ;;  %3413 = vst.msk [vmem:[%s4198_s28 + $0x48] sm:$0xf] %vm395_vm1, %v3501_v60 }
 0x125   : > { %3425 = vst.msk [vmem:[%s4198_s28 + $0xa8] sm:$0xf] %vm395_vm1, %v3513_v61 }
 0x126   : > { %v3504_v3 = vpack.c.bf16 %v698_v0, %v698_v0  ;;  %v701_v4 = vmax.f32 %v681_v1, 0.0  ;;  %v679_v5 = vadd.f32 %v4179_v35, %v652_v2  ;;  %3418 = vst.msk [vmem:[%s4198_s28 + $0x74] sm:$0xf] %vm395_vm1, %v3506_v63 }
 0x128   : > { %v3507_v6 = vpack.c.bf16 %v701_v4, %v701_v4  ;;  %v699_v7 = vmax.f32 %v679_v5, 0.0  ;;  %3416 = vst.msk [vmem:[%s4198_s28 + $0x64] sm:$0xf] %vm395_vm1, %v3504_v3 }
 0x12a   : > { %v3505_v8 = vpack.c.bf16 %v699_v7, %v699_v7  ;;  %3419 = vst.msk [vmem:[%s4198_s28 + $0x78] sm:$0xf] %vm395_vm1, %v3507_v6 }
 0x12c   : > { %3417 = vst.msk [vmem:[%s4198_s28 + $0x68] sm:$0xf] %vm395_vm1, %v3505_v8  ;;  %s5539_s28 = sld [smem:[#allocation32_spill]] }
 0x133   : > { %v1051_v33 = vld [vmem:[#allocation2 + $0x24] sm:$0xf]  ;;  %v1049_v9 = vld [vmem:[#allocation2 + $0x14] sm:$0xf]  ;;  %v1052_v10 = vld [vmem:[#allocation2 + $0x28] sm:$0xf] }
 0x134   : > { %1085 = vrot.lane.b32.xlu1 %v1051_v33, %s3909_s25  ;;  %1081 = vrot.lane.b32.xlu0 %v1049_v9, %s3909_s25  ;;  %v1050_v35 = vld [vmem:[#allocation2 + $0x18] sm:$0xf]  ;;  %v1697_v11 = vld [vmem:[#allocation2 + $0x28] sm:$0xf]  ;;  %v1696_v12 = vld [vmem:[#allocation2 + $0x24] sm:$0xf] }
 0x135   : > { %v1699_v13 = vld [vmem:[#allocation2 + $0x38] sm:$0xf]  ;;  %v1698_v14 = vld [vmem:[#allocation2 + $0x34] sm:$0xf]  ;;  %v2343_v17 = vld [vmem:[#allocation2 + $0x48] sm:$0xf] }
 0x136   : > { %v2341_v15 = vld [vmem:[#allocation2 + $0x38] sm:$0xf]  ;;  %v2340_v16 = vld [vmem:[#allocation2 + $0x34] sm:$0xf]  ;;  %v2342_v18 = vld [vmem:[#allocation2 + $0x44] sm:$0xf] }
 0x137   : > { %v1054_v19 = vld [vmem:[#allocation2 + $0x38] sm:$0xf]  ;;  %v1053_v20 = vld [vmem:[#allocation2 + $0x34] sm:$0xf]  ;;  %v1056_v21 = vld [vmem:[#allocation2 + $0x48] sm:$0xf] }
 0x138   : > { %1087 = vrot.lane.b32.xlu1 %v1052_v10, %s3909_s25  ;;  %1083 = vrot.lane.b32.xlu0 %v1050_v35, %s3909_s25  ;;  %v1055_v22 = vld [vmem:[#allocation2 + $0x44] sm:$0xf]  ;;  %v817_v23 = vld [vmem:[#allocation2 + $0x20] sm:$0x8]  ;;  %v814_v25 = vld [vmem:[#allocation2 + $0x10] sm:$0x8] }
 0x139   : > { %v818_v24 = vld [vmem:[#allocation2 + $0x24] sm:$0xf]  ;;  %v815_v26 = vld [vmem:[#allocation2 + $0x14] sm:$0xf]  ;;  %v1701_v27 = vld [vmem:[#allocation2 + $0x48] sm:$0xf] }
 0x13a   : > { %v1700_v28 = vld [vmem:[#allocation2 + $0x44] sm:$0xf]  ;;  %v864_v29 = vshrl.u32 %v817_v23, 16  ;;  %v869_v30 = vshrl.u32 %v818_v24, 16  ;;  %v872_v32 = vshll.u32 %v818_v24, 16  ;;  %v842_v34 = vshrl.u32 %v814_v25, 16 }
 0x13b   : > { %v847_v36 = vshrl.u32 %v815_v26, 16  ;;  %v1703_v37 = vld [vmem:[#allocation2 + $0x58] sm:$0xf]  ;;  %v1702_v38 = vld [vmem:[#allocation2 + $0x54] sm:$0xf]  ;;  %v850_v43 = vshll.u32 %v815_v26, 16 }
 0x13c   : > { %1730 = vrot.lane.b32.xlu1 %v1697_v11, %s3910_s11  ;;  %1728 = vrot.lane.b32.xlu0 %v1696_v12, %s3910_s11  ;;  %v871_v31 = vrot.slane %v869_v30, 7  ;;  %v3429_v40 = vrot.slane %v864_v29, 11  ;;  %v819_v44 = vld [vmem:[#allocation2 + $0x28] sm:$0xf]  ;;  %v3428_v46 = vrot.slane %v842_v34, 11 }
 0x13d   : > { %v849_v42 = vrot.slane %v847_v36, 7  ;;  %v816_v48 = vld [vmem:[#allocation2 + $0x18] sm:$0xf]  ;;  %v878_v49 = vshrl.u32 %v819_v44, 16  ;;  %v2344_v51 = vld [vmem:[#allocation2 + $0x54] sm:$0xf] }
 0x13e   : > { %v874_v41 = vor.u32 %v872_v32, %v871_v31  ;;  %v2345_v50 = vld [vmem:[#allocation2 + $0x58] sm:$0xf]  ;;  %v876_v53 = vrot.slane %v871_v31, 4  ;;  %v881_v55 = vshll.u32 %v819_v44, 16  ;;  %v856_v56 = vshrl.u32 %v816_v48, 16 }
 0x13f   : > { %v852_v47 = vor.u32 %v850_v43, %v849_v42  ;;  %v880_v54 = vrot.slane %v878_v49, 7  ;;  %v854_v58 = vrot.slane %v849_v42, 4  ;;  %v859_v60 = vshll.u32 %v816_v48, 16  ;;  %v2347_v61 = vld [vmem:[#allocation2 + $0x68] sm:$0xf] }
 0x140   : > { %1734 = vrot.lane.b32.xlu1 %v1699_v13, %s3910_s11  ;;  %1732 = vrot.lane.b32.xlu0 %v1698_v14, %s3910_s11  ;;  %v875_v45 = vsel %vm4284_vm4, %v3429_v40, %v874_v41  ;;  %v858_v59 = vrot.slane %v856_v56, 7  ;;  %v2346_v62 = vld [vmem:[#allocation2 + $0x64] sm:$0xf]  ;;  %v1058_v2 = vld [vmem:[#allocation2 + $0x58] sm:$0xf] }
 0x141   : > { %1035 = vst.msk [vmem:[#allocation3 + $0x8] sm:$0xf] %vm395_vm1, %v875_v45  ;;  %v853_v52 = vsel %vm4284_vm4, %v3428_v46, %v852_v47  ;;  %v883_v57 = vor.u32 %v881_v55, %v880_v54  ;;  %v1057_v3 = vld [vmem:[#allocation2 + $0x54] sm:$0xf]  ;;  %v1060_v4 = vld [vmem:[#allocation2 + $0x68] sm:$0xf] }
 0x142   : > { %1033 = vst.msk [vmem:[#allocation3] sm:$0xf] %vm395_vm1, %v853_v52  ;;  %v861_v0 = vor.u32 %v859_v60, %v858_v59  ;;  %v1059_v5 = vld [vmem:[#allocation2 + $0x64] sm:$0xf]  ;;  %v821_v6 = vld [vmem:[#allocation2 + $0x34] sm:$0xf] }
 0x143   : > { %v884_v63 = vsel %vm4284_vm4, %v876_v53, %v883_v57  ;;  %v822_v7 = vld [vmem:[#allocation2 + $0x38] sm:$0xf]  ;;  %v1705_v8 = vld [vmem:[#allocation2 + $0x68] sm:$0xf]  ;;  %v1704_v33 = vld [vmem:[#allocation2 + $0x64] sm:$0xf] }
 0x144   : > { %2374 = vrot.lane.b32.xlu1 %v2341_v15, %s3911_s27  ;;  %2372 = vrot.lane.b32.xlu0 %v2340_v16, %s3911_s27  ;;  %1036 = vst.msk [vmem:[#allocation3 + $0xc] sm:$0xf] %vm395_vm1, %v884_v63  ;;  %v862_v1 = vsel %vm4284_vm4, %v854_v58, %v861_v0  ;;  %v891_v9 = vshrl.u32 %v821_v6, 16  ;;  %v820_v10 = vld [vmem:[#allocation2 + $0x30] sm:$0x8]  ;;  %v900_v35 = vshrl.u32 %v822_v7, 16 }
 0x145   : > { %1034 = vst.msk [vmem:[#allocation3 + $0x4] sm:$0xf] %vm395_vm1, %v862_v1  ;;  %v1707_v11 = vld [vmem:[#allocation2 + $0x78] sm:$0xf]  ;;  %v1706_v13 = vld [vmem:[#allocation2 + $0x74] sm:$0xf] }
 0x146   : > { %v893_v12 = vrot.slane %v891_v9, 7  ;;  %v902_v14 = vrot.slane %v900_v35, 7  ;;  %v903_v15 = vshll.u32 %v822_v7, 16  ;;  %v886_v16 = vshrl.u32 %v820_v10, 16  ;;  %v825_v23 = vld [vmem:[#allocation2 + $0x48] sm:$0xf] }
 0x147   : > { %v823_v24 = vld [vmem:[#allocation2 + $0x40] sm:$0x8]  ;;  %v2349_v25 = vld [vmem:[#allocation2 + $0x78] sm:$0xf]  ;;  %v2348_v26 = vld [vmem:[#allocation2 + $0x74] sm:$0xf] }
 0x148   : > { %2378 = vrot.lane.b32.xlu1 %v2343_v17, %s3911_s27  ;;  %2376 = vrot.lane.b32.xlu0 %v2342_v18, %s3911_s27  ;;  %v894_v17 = vshll.u32 %v821_v6, 16  ;;  %v898_v18 = vrot.slane %v893_v12, 4  ;;  %v922_v30 = vshrl.u32 %v825_v23, 16  ;;  %v908_v32 = vshrl.u32 %v823_v24, 16  ;;  %v2350_v40 = vld [vmem:[#allocation2 + $0x84] sm:$0xf] }
 0x149   : > { %v925_v36 = vshll.u32 %v825_v23, 16  ;;  %v1062_v47 = vld [vmem:[#allocation2 + $0x78] sm:$0xf]  ;;  %v1061_v48 = vld [vmem:[#allocation2 + $0x74] sm:$0xf] }
 0x14a   : > { %v924_v34 = vrot.slane %v922_v30, 7  ;;  %v3431_v43 = vrot.slane %v908_v32, 11  ;;  %v1432_v49 = vld [vmem:[#allocation2 + $0x24] sm:$0xf]  ;;  %v1064_v52 = vld [vmem:[#allocation2 + $0x88] sm:$0xf] }
 0x14b   : > { %v1431_v53 = vld [vmem:[#allocation2 + $0x20] sm:$0x8]  ;;  %v1063_v54 = vld [vmem:[#allocation2 + $0x84] sm:$0xf]  ;;  %v1461_v55 = vshrl.u32 %v1432_v49, 16  ;;  %v1464_v9 = vshll.u32 %v1432_v49, 16 }
 0x14c   : > { %1091 = vrot.lane.b32.xlu1 %v1054_v19, %s3909_s25  ;;  %1089 = vrot.lane.b32.xlu0 %v1053_v20, %s3909_s25  ;;  %v824_v19 = vld [vmem:[#allocation2 + $0x44] sm:$0xf]  ;;  %v905_v20 = vor.u32 %v903_v15, %v902_v14  ;;  %v927_v42 = vor.u32 %v925_v36, %v924_v34  ;;  %v1436_v57 = vld [vmem:[#allocation2 + $0x38] sm:$0xf]  ;;  %v1709_v59 = vld [vmem:[#allocation2 + $0x88] sm:$0xf] }
 0x14d   : > { %v913_v29 = vshrl.u32 %v824_v19, 16  ;;  %v1456_v60 = vshrl.u32 %v1431_v53, 16  ;;  %v1434_v63 = vld [vmem:[#allocation2 + $0x30] sm:$0x8]  ;;  %v1463_v0 = vrot.slane %v1461_v55, 7  ;;  %v1495_v10 = vshll.u32 %v1436_v57, 16 }
 0x14e   : > { %v4338_v6 = vld [vmem:[#allocation2 + $0x38] sm:$0xf]  ;;  %v1478_v35 = vshrl.u32 %v1434_v63, 16  ;;  %v826_v15 = vld [vmem:[#allocation2 + $0x50] sm:$0x8] }
 0x14f   : > { %v915_v31 = vrot.slane %v913_v29, 7  ;;  %v828_v7 = vld [vmem:[#allocation2 + $0x58] sm:$0xf]  ;;  %v930_v30 = vshrl.u32 %v826_v15, 16  ;;  %v2117_v53 = vshll.u32 %v4338_v6, 16 }
 0x150   : > { %1095 = vrot.lane.b32.xlu1 %v1056_v21, %s3909_s25  ;;  %1093 = vrot.lane.b32.xlu0 %v1055_v22, %s3909_s25  ;;  %v3430_v21 = vrot.slane %v886_v16, 11  ;;  %v896_v22 = vor.u32 %v894_v17, %v893_v12  ;;  %v1710_v16 = vld [vmem:[#allocation2 + $0x94] sm:$0xf]  ;;  %v1468_v17 = vrot.slane %v1463_v0, 4  ;;  %v947_v29 = vshll.u32 %v828_v7, 16 }
 0x151   : > { %v920_v41 = vrot.slane %v915_v31, 4  ;;  %v4352_v34 = vrot.slane %v1478_v35, 11 }
 0x153   : > { %v928_v45 = vsel %vm4284_vm4, %v920_v41, %v927_v42  ;;  %v2075_v41 = vld [vmem:[#allocation2 + $0x30] sm:$0x8] }
 0x154   : > { %1738 = vrot.lane.b32.xlu1 %v1701_v27, %s3910_s11  ;;  %1736 = vrot.lane.b32.xlu0 %v1700_v28, %s3910_s11  ;;  %v906_v27 = vsel %vm4284_vm4, %v898_v18, %v905_v20  ;;  %v897_v28 = vsel %vm4284_vm4, %v3430_v21, %v896_v22  ;;  %1040 = vst.msk [vmem:[#allocation3 + $0x1c] sm:$0xf] %vm395_vm1, %v928_v45  ;;  %v944_v20 = vshrl.u32 %v828_v7, 16  ;;  %v830_v45 = vld [vmem:[#allocation2 + $0x64] sm:$0xf] }
 0x155   : > { %1038 = vst.msk [vmem:[#allocation3 + $0x14] sm:$0xf] %vm395_vm1, %v906_v27  ;;  %1037 = vst.msk [vmem:[#allocation3 + $0x10] sm:$0xf] %vm395_vm1, %v897_v28  ;;  %v4346_v21 = vor.u32 %v1464_v9, %v1463_v0  ;;  %v4350_v27 = vld [vmem:[#allocation2 + $0x44] sm:$0xf] }
 0x156   : > { %v946_v28 = vrot.slane %v944_v20, 7  ;;  %v2127_v49 = vshrl.u32 %v4350_v27, 16  ;;  %v4395_v20 = vld [vmem:[#allocation2 + $0x54] sm:$0xf] }
 0x158   : > { %1742 = vrot.lane.b32.xlu1 %v1703_v37, %s3910_s11  ;;  %1740 = vrot.lane.b32.xlu0 %v1702_v38, %s3910_s11  ;;  %v916_v37 = vshll.u32 %v824_v19, 16  ;;  %v2351_v38 = vld [vmem:[#allocation2 + $0x88] sm:$0xf]  ;;  %v2114_v19 = vshrl.u32 %v4338_v6, 16  ;;  %v949_v42 = vor.u32 %v947_v29, %v946_v28 }
 0x15a   : > { %v918_v44 = vor.u32 %v916_v37, %v915_v31  ;;  %v4356_v37 = vld [vmem:[#allocation2 + $0x48] sm:$0xf] }
 0x15c   : > { %2382 = vrot.lane.b32.xlu1 %v2345_v50, %s3911_s27  ;;  %2380 = vrot.lane.b32.xlu0 %v2344_v51, %s3911_s27  ;;  %v919_v46 = vsel %vm4284_vm4, %v3431_v43, %v918_v44  ;;  %v1433_v50 = vld [vmem:[#allocation2 + $0x28] sm:$0xf]  ;;  %v1435_v51 = vld [vmem:[#allocation2 + $0x34] sm:$0xf]  ;;  %v3432_v43 = vrot.slane %v930_v30, 11 }
 0x15d   : > { %1039 = vst.msk [vmem:[#allocation3 + $0x18] sm:$0xf] %vm395_vm1, %v919_v46  ;;  %v1470_v56 = vshrl.u32 %v1433_v50, 16  ;;  %v1483_v58 = vshrl.u32 %v1435_v51, 16  ;;  %v1486_v12 = vshll.u32 %v1435_v51, 16 }
 0x15e   : > { %v2355_v51 = vld [vmem:[#allocation2 + $0xa8] sm:$0xf] }
 0x15f   : > { %v1472_v1 = vrot.slane %v1470_v56, 7 }
 0x160   : > { %2386 = vrot.lane.b32.xlu1 %v2347_v61, %s3911_s27  ;;  %2384 = vrot.lane.b32.xlu0 %v2346_v62, %s3911_s27  ;;  %v1708_v61 = vld [vmem:[#allocation2 + $0x84] sm:$0xf]  ;;  %v1492_v62 = vshrl.u32 %v1436_v57, 16  ;;  %v829_v57 = vld [vmem:[#allocation2 + $0x60] sm:$0x8] }
 0x161   : > { %v952_v7 = vshrl.u32 %v829_v57, 16 }
 0x163   : > { %v3433_v15 = vrot.slane %v952_v7, 11 }
 0x164   : > { %1099 = vrot.lane.b32.xlu1 %v1058_v2, %s3909_s25  ;;  %1097 = vrot.lane.b32.xlu0 %v1057_v3, %s3909_s25  ;;  %v4334_v2 = vld [vmem:[#allocation2 + $0x34] sm:$0xf] }
 0x165   : > { %v827_v3 = vld [vmem:[#allocation2 + $0x54] sm:$0xf] }
 0x166   : > { %v935_v14 = vshrl.u32 %v827_v3, 16  ;;  %v938_v31 = vshll.u32 %v827_v3, 16  ;;  %v1439_v3 = vld [vmem:[#allocation2 + $0x48] sm:$0xf] }
 0x168   : > { %1103 = vrot.lane.b32.xlu1 %v1060_v4, %s3909_s25  ;;  %1101 = vrot.lane.b32.xlu0 %v1059_v5, %s3909_s25  ;;  %v1473_v4 = vshll.u32 %v1433_v50, 16  ;;  %v1485_v5 = vrot.slane %v1483_v58, 7  ;;  %v937_v24 = vrot.slane %v935_v14, 7  ;;  %v831_v50 = vld [vmem:[#allocation2 + $0x68] sm:$0xf] }
 0x16a   : > { %v1475_v18 = vor.u32 %v1473_v4, %v1472_v1  ;;  %v1490_v22 = vrot.slane %v1485_v5, 4  ;;  %v4348_v23 = vor.u32 %v1486_v12, %v1485_v5  ;;  %v940_v44 = vor.u32 %v938_v31, %v937_v24 }
 0x16b   : > { %v2139_v1 = vshll.u32 %v4356_v37, 16  ;;  %v966_v4 = vshrl.u32 %v831_v50, 16  ;;  %v2129_v5 = vrot.slane %v2127_v49, 7  ;;  %v1514_v12 = vshrl.u32 %v1439_v3, 16 }
 0x16c   : > { %1746 = vrot.lane.b32.xlu1 %v1705_v8, %s3910_s11  ;;  %1744 = vrot.lane.b32.xlu0 %v1704_v33, %s3910_s11  ;;  %v1711_v8 = vld [vmem:[#allocation2 + $0x98] sm:$0xf]  ;;  %v4340_v33 = vrot.slane %v1456_v60, 11  ;;  %v1476_v46 = vsel %vm4284_vm4, %v1468_v17, %v1475_v18  ;;  %v941_v56 = vsel %vm4284_vm4, %v3432_v43, %v940_v44  ;;  %v2108_v60 = vshll.u32 %v4334_v2, 16 }
 0x16d   : > { %1041 = vst.msk [vmem:[#allocation3 + $0x20] sm:$0xf] %vm395_vm1, %v941_v56  ;;  %v968_v35 = vrot.slane %v966_v4, 7 }
 0x170   : > { %1750 = vrot.lane.b32.xlu1 %v1707_v11, %s3910_s11  ;;  %1748 = vrot.lane.b32.xlu0 %v1706_v13, %s3910_s11  ;;  %v1494_v11 = vrot.slane %v1492_v62, 7  ;;  %v2105_v13 = vshrl.u32 %v4334_v2, 16  ;;  %v957_v62 = vshrl.u32 %v830_v45, 16  ;;  %v2078_v2 = vld [vmem:[#allocation2 + $0x40] sm:$0x8] }
 0x171   : > { %v2122_v18 = vshrl.u32 %v2078_v2, 16 }
 0x172   : > { %v1497_v32 = vor.u32 %v1495_v10, %v1494_v11  ;;  %v4354_v36 = vrot.slane %v2105_v13, 7  ;;  %v959_v6 = vrot.slane %v957_v62, 7  ;;  %v4389_v10 = vld [vmem:[#allocation2 + $0x54] sm:$0xf]  ;;  %v969_v11 = vshll.u32 %v831_v50, 16 }
 0x173   : > { %v4391_v13 = vld [vmem:[#allocation2 + $0x58] sm:$0xf]  ;;  %v1527_v28 = vshrl.u32 %v4389_v10, 16  ;;  %v1530_v62 = vshll.u32 %v4389_v10, 16 }
 0x174   : > { %2390 = vrot.lane.b32.xlu1 %v2349_v25, %s3911_s27  ;;  %2388 = vrot.lane.b32.xlu0 %v2348_v26, %s3911_s27  ;;  %v2353_v25 = vld [vmem:[#allocation2 + $0x98] sm:$0xf]  ;;  %v2352_v26 = vld [vmem:[#allocation2 + $0x94] sm:$0xf]  ;;  %v1498_v58 = vsel %vm4284_vm4, %v1490_v22, %v1497_v32  ;;  %v2112_v63 = vrot.slane %v4354_v36, 4  ;;  %v964_v14 = vrot.slane %v959_v6, 4  ;;  %v2110_v17 = vor.u32 %v2108_v60, %v4354_v36 }
 0x175   : > { %v971_v22 = vor.u32 %v969_v11, %v968_v35  ;;  %v4403_v32 = vld [vmem:[#allocation2 + $0x64] sm:$0xf]  ;;  %v1529_v50 = vrot.slane %v1527_v28, 7  ;;  %v2152_v35 = vshll.u32 %v4395_v20, 16  ;;  %v1445_v11 = vld [vmem:[#allocation2 + $0x68] sm:$0xf] }
 0x176   : > { %v4450_v28 = vld [vmem:[#allocation2 + $0x78] sm:$0xf] }
 0x177   : > { %v972_v36 = vsel %vm4284_vm4, %v964_v14, %v971_v22 }
 0x178   : > { %2394 = vrot.lane.b32.xlu1 %v2351_v38, %s3911_s27  ;;  %2392 = vrot.lane.b32.xlu0 %v2350_v40, %s3911_s27  ;;  %v942_v38 = vrot.slane %v937_v24, 4  ;;  %v2116_v40 = vrot.slane %v2114_v19, 7  ;;  %v2130_v19 = vshll.u32 %v4350_v27, 16  ;;  %v1536_v27 = vshrl.u32 %v4391_v13, 16  ;;  %1044 = vst.msk [vmem:[#allocation3 + $0x2c] sm:$0xf] %vm395_vm1, %v972_v36 }
 0x179   : > { %v1446_v36 = vld [vmem:[#allocation2 + $0x70] sm:$0x8] }
 0x17a   : > { %v950_v55 = vsel %vm4284_vm4, %v942_v38, %v949_v42  ;;  %v2119_v0 = vor.u32 %v2117_v53, %v2116_v40  ;;  %v2132_v31 = vor.u32 %v2130_v19, %v2129_v5  ;;  %v1516_v38 = vrot.slane %v1514_v12, 7  ;;  %v2086_v42 = vld [vmem:[#allocation2 + $0x68] sm:$0xf] }
 0x17b   : > { %1042 = vst.msk [vmem:[#allocation3 + $0x24] sm:$0xf] %vm395_vm1, %v950_v55  ;;  %v2149_v40 = vshrl.u32 %v4395_v20, 16  ;;  %v1440_v55 = vld [vmem:[#allocation2 + $0x50] sm:$0x8]  ;;  %v2180_v56 = vshrl.u32 %v2086_v42, 16 }
 0x17c   : > { %1107 = vrot.lane.b32.xlu1 %v1062_v47, %s3909_s25  ;;  %1105 = vrot.lane.b32.xlu0 %v1061_v48, %s3909_s25  ;;  %v1467_v47 = vsel %vm4284_vm4, %v4340_v33, %v4346_v21  ;;  %v1489_v48 = vsel %vm4284_vm4, %v4352_v34, %v4348_v23  ;;  %v2083_v21 = vld [vmem:[#allocation2 + $0x58] sm:$0xf]  ;;  %v2120_v43 = vsel %vm4284_vm4, %v2112_v63, %v2119_v0  ;;  %v4427_v34 = vld [vmem:[#allocation2 + $0x64] sm:$0xf]  ;;  %v2081_v63 = vld [vmem:[#allocation2 + $0x50] sm:$0x8] }
 0x17d   : > { %v1534_v0 = vrot.slane %v1529_v50, 4  ;;  %v2182_v7 = vrot.slane %v2180_v56, 7  ;;  %v2144_v10 = vshrl.u32 %v2081_v63, 16  ;;  %v1443_v20 = vld [vmem:[#allocation2 + $0x60] sm:$0x8] }
 0x180   : > { %1111 = vrot.lane.b32.xlu1 %v1064_v52, %s3909_s25  ;;  %1109 = vrot.lane.b32.xlu0 %v1063_v54, %s3909_s25  ;;  %v2354_v52 = vld [vmem:[#allocation2 + $0xa4] sm:$0xf]  ;;  %v2136_v54 = vshrl.u32 %v4356_v37, 16 }
 0x182   : > { %v2138_v33 = vrot.slane %v2136_v54, 7  ;;  %v1538_v54 = vrot.slane %v1536_v27, 7 }
 0x184   : > { %1754 = vrot.lane.b32.xlu1 %v1709_v59, %s3910_s11  ;;  %1752 = vrot.lane.b32.xlu0 %v1708_v61, %s3910_s11  ;;  %v2100_v59 = vshrl.u32 %v2075_v41, 16  ;;  %v4380_v61 = vld [vmem:[#allocation2 + $0x44] sm:$0xf]  ;;  %v2141_v30 = vor.u32 %v2139_v1, %v2138_v33  ;;  %v2158_v41 = vshrl.u32 %v2083_v21, 16  ;;  %v1522_v1 = vshrl.u32 %v1440_v55, 16 }
 0x185   : > { %v1505_v9 = vshrl.u32 %v4380_v61, 16  ;;  %v1508_v49 = vshll.u32 %v4380_v61, 16  ;;  %v1539_v61 = vshll.u32 %v4391_v13, 16  ;;  %v2183_v13 = vshll.u32 %v2086_v42, 16 }
 0x186   : > { %v3444_v24 = vrot.slane %v2100_v59, 11  ;;  %v2151_v59 = vrot.slane %v2149_v40, 7  ;;  %v2160_v23 = vrot.slane %v2158_v41, 7  ;;  %v1544_v41 = vshrl.u32 %v1443_v20, 16 }
 0x187   : > { %v1507_v37 = vrot.slane %v1505_v9, 7  ;;  %v1541_v2 = vor.u32 %v1539_v61, %v1538_v54  ;;  %v2185_v22 = vor.u32 %v2183_v13, %v2182_v7  ;;  %v1552_v42 = vshll.u32 %v4427_v34, 16 }
 0x188   : > { %1758 = vrot.lane.b32.xlu1 %v1711_v8, %s3910_s11  ;;  %1756 = vrot.lane.b32.xlu0 %v1710_v16, %s3910_s11  ;;  %v960_v8 = vshll.u32 %v830_v45, 16  ;;  %v2111_v44 = vsel %vm4284_vm4, %v3444_v24, %v2110_v17  ;;  %v3445_v45 = vrot.slane %v2122_v18, 11  ;;  %v2156_v33 = vrot.slane %v2151_v59, 4 }
 0x189   : > { %v1512_v57 = vrot.slane %v1507_v37, 4  ;;  %v1510_v60 = vor.u32 %v1508_v49, %v1507_v37  ;;  %v3439_v17 = vrot.slane %v1522_v1, 11  ;;  %v4442_v18 = vor.u32 %v2152_v35, %v2151_v59  ;;  %v4458_v37 = vld [vmem:[#allocation2 + $0x74] sm:$0xf] }
 0x18a   : > { %v962_v16 = vor.u32 %v960_v8, %v959_v6  ;;  %v2133_v53 = vsel %vm4284_vm4, %v3445_v45, %v2132_v31  ;;  %v1532_v6 = vor.u32 %v1530_v62, %v1529_v50  ;;  %v1549_v8 = vshrl.u32 %v4427_v34, 16  ;;  %v832_v50 = vld [vmem:[#allocation2 + $0x70] sm:$0x8] }
 0x18b   : > { %v4487_v34 = vrot.slane %v1544_v41, 11  ;;  %v974_v61 = vshrl.u32 %v832_v50, 16 }
 0x18c   : > { %2398 = vrot.lane.b32.xlu1 %v2353_v25, %s3911_s27  ;;  %2396 = vrot.lane.b32.xlu0 %v2352_v26, %s3911_s27  ;;  %v2134_v25 = vrot.slane %v2129_v5, 4  ;;  %v1437_v26 = vld [vmem:[#allocation2 + $0x40] sm:$0x8]  ;;  %v963_v29 = vsel %vm4284_vm4, %v3433_v15, %v962_v16  ;;  %v2174_v15 = vshll.u32 %v4403_v32, 16  ;;  %v1533_v31 = vsel %vm4284_vm4, %v3439_v17, %v1532_v6 }
 0x18d   : > { %1043 = vst.msk [vmem:[#allocation3 + $0x28] sm:$0xf] %vm395_vm1, %v963_v29  ;;  %v2084_v5 = vld [vmem:[#allocation2 + $0x60] sm:$0x8]  ;;  %v833_v29 = vld [vmem:[#allocation2 + $0x74] sm:$0xf] }
 0x18e   : > { %v2166_v14 = vshrl.u32 %v2084_v5, 16  ;;  %v979_v49 = vshrl.u32 %v833_v29, 16  ;;  %v1583_v5 = vshll.u32 %v4450_v28, 16  ;;  %v982_v6 = vshll.u32 %v833_v29, 16  ;;  %v835_v17 = vld [vmem:[#allocation2 + $0x80] sm:$0x8] }
 0x18f   : > { %v4523_v29 = vld [vmem:[#allocation2 + $0x88] sm:$0xf] }
 0x190   : > { %2402 = vrot.lane.b32.xlu1 %v2355_v51, %s3911_s27  ;;  %2400 = vrot.lane.b32.xlu0 %v2354_v52, %s3911_s27  ;;  %v2171_v51 = vshrl.u32 %v4403_v32, 16  ;;  %v2142_v52 = vsel %vm4284_vm4, %v2134_v25, %v2141_v30  ;;  %v4448_v25 = vrot.slane %v1549_v8, 7  ;;  %v1542_v30 = vsel %vm4284_vm4, %v1534_v0, %v1541_v2  ;;  %v4495_v2 = vld [vmem:[#allocation2 + $0x70] sm:$0x8]  ;;  %s5537_s27 = sld [smem:[#allocation30_spill]] }
 0x191   : > { %v3446_v32 = vrot.slane %v2144_v10, 11  ;;  %v4462_v40 = vrot.slane %v2166_v14, 11  ;;  %v981_v59 = vrot.slane %v979_v49, 7 }
 0x192   : > { %v2173_v4 = vrot.slane %v2171_v51, 7  ;;  %v4481_v54 = vor.u32 %v1552_v42, %v4448_v25  ;;  %v2188_v42 = vshrl.u32 %v4495_v2, 16 }
 0x193   : > { %v2155_v45 = vsel %vm4284_vm4, %v3446_v32, %v4442_v18  ;;  %v986_v63 = vrot.slane %v981_v59, 4 }
 0x194   : > { %1633 = vrot.lane.b32.xlu1 %v1476_v46, %s3912_s10  ;;  %1631 = vrot.lane.b32.xlu0 %v1467_v47, %s3912_s10  ;;  %v1500_v46 = vshrl.u32 %v1437_v26, 16  ;;  %v1517_v47 = vshll.u32 %v1439_v3, 16  ;;  %v2161_v3 = vshll.u32 %v2083_v21, 16  ;;  %v2178_v19 = vrot.slane %v2173_v4, 4  ;;  %v4444_v21 = vld [vmem:[#allocation2 + $0x74] sm:$0xf] }
 0x195   : > { %v4446_v24 = vor.u32 %v2174_v15, %v2173_v4  ;;  %v1558_v26 = vshrl.u32 %v1445_v11, 16  ;;  %v1574_v14 = vshll.u32 %v4444_v21, 16  ;;  %v3434_v15 = vrot.slane %v974_v61, 11 }
 0x196   : > { %v2163_v9 = vor.u32 %v2161_v3, %v2160_v23  ;;  %v4474_v51 = vsel %vm4284_vm4, %v2178_v19, %v2185_v22  ;;  %v1556_v3 = vrot.slane %v4448_v25, 4  ;;  %v4512_v22 = vld [vmem:[#allocation2 + $0x84] sm:$0xf]  ;;  %v4514_v25 = vld [vmem:[#allocation2 + $0x88] sm:$0xf] }
 0x197   : > { %v2215_v50 = vshrl.u32 %v4512_v22, 16 }
 0x198   : > { %1637 = vrot.lane.b32.xlu1 %v1498_v58, %s3912_s10  ;;  %1635 = vrot.lane.b32.xlu0 %v1489_v48, %s3912_s10  ;;  %v1519_v58 = vor.u32 %v1517_v47, %v1516_v38  ;;  %v3438_v48 = vrot.slane %v1500_v46, 11  ;;  %v2164_v27 = vsel %vm4284_vm4, %v2156_v33, %v2163_v9  ;;  %v4460_v38 = vld [vmem:[#allocation2 + $0x78] sm:$0xf]  ;;  %v1561_v46 = vshll.u32 %v1445_v11, 16  ;;  %v836_v11 = vld [vmem:[#allocation2 + $0x84] sm:$0xf] }
 0x199   : > { %v1580_v47 = vshrl.u32 %v4450_v28, 16  ;;  %v1555_v33 = vsel %vm4284_vm4, %v4487_v34, %v4481_v54  ;;  %v2205_v20 = vshll.u32 %v4460_v38, 16  ;;  %v4521_v28 = vld [vmem:[#allocation2 + $0x84] sm:$0xf]  ;;  %v1004_v49 = vshll.u32 %v836_v11, 16 }
 0x19a   : > { %v1520_v12 = vsel %vm4284_vm4, %v1512_v57, %v1519_v58  ;;  %v1511_v16 = vsel %vm4284_vm4, %v3438_v48, %v1510_v60  ;;  %v2193_v57 = vshrl.u32 %v4458_v37, 16  ;;  %v2202_v58 = vshrl.u32 %v4460_v38, 16 }
 0x19b   : > { %v1566_v60 = vshrl.u32 %v1446_v36, 16  ;;  %v1582_v62 = vrot.slane %v1580_v47, 7  ;;  %v2217_v2 = vrot.slane %v2215_v50, 7 }
 0x19c   : > { %2277 = vrot.lane.b32.xlu1 %v2120_v43, %s3913_s12  ;;  %2275 = vrot.lane.b32.xlu0 %v2111_v44, %s3913_s12  ;;  %v1571_v43 = vshrl.u32 %v4444_v21, 16  ;;  %v834_v44 = vld [vmem:[#allocation2 + $0x78] sm:$0xf]  ;;  %v4501_v9 = vrot.slane %v2193_v57, 7  ;;  %v2204_v10 = vrot.slane %v2202_v58, 7 }
 0x19d   : > { %v988_v23 = vshrl.u32 %v834_v44, 16  ;;  %v991_v1 = vshll.u32 %v834_v44, 16  ;;  %v1585_v18 = vor.u32 %v1583_v5, %v1582_v62  ;;  %v4509_v19 = vrot.slane %v1566_v60, 11  ;;  %v4535_v44 = vld [vmem:[#allocation2 + $0x94] sm:$0xf] }
 0x19e   : > { %v4489_v48 = vrot.slane %v1571_v43, 7  ;;  %v2200_v38 = vrot.slane %v4501_v9, 4  ;;  %v2207_v41 = vor.u32 %v2205_v20, %v2204_v10  ;;  %v996_v43 = vshrl.u32 %v835_v17, 16  ;;  %v1454_v57 = vld [vmem:[#allocation2 + $0x98] sm:$0xf] }
 0x19f   : > { %v990_v0 = vrot.slane %v988_v23, 7  ;;  %v1615_v61 = vshrl.u32 %v4535_v44, 16  ;;  %v2227_v10 = vshll.u32 %v4514_v25, 16  ;;  %v1452_v17 = vld [vmem:[#allocation2 + $0x90] sm:$0x8]  ;;  %v2222_v20 = vrot.slane %v2217_v2, 4 }
 0x1a0   : > { %2281 = vrot.lane.b32.xlu1 %v2142_v52, %s3913_s12  ;;  %2279 = vrot.lane.b32.xlu0 %v2133_v53, %s3913_s12  ;;  %v2177_v52 = vsel %vm4284_vm4, %v4462_v40, %v4446_v24  ;;  %v1560_v53 = vrot.slane %v1558_v26, 7  ;;  %v1578_v13 = vrot.slane %v4489_v48, 4  ;;  %v4519_v21 = vor.u32 %v1574_v14, %v4489_v48 }
 0x1a1   : > { %v993_v35 = vor.u32 %v991_v1, %v990_v0  ;;  %v3435_v23 = vrot.slane %v996_v43, 11  ;;  %v1449_v0 = vld [vmem:[#allocation2 + $0x80] sm:$0x8]  ;;  %v1624_v1 = vshrl.u32 %v1454_v57, 16  ;;  %v1605_v14 = vshll.u32 %v4523_v29, 16 }
 0x1a2   : > { %v1563_v4 = vor.u32 %v1561_v46, %v1560_v53  ;;  %v2224_v53 = vshrl.u32 %v4514_v25, 16  ;;  %v1586_v40 = vsel %vm4284_vm4, %v1578_v13, %v1585_v18  ;;  %v1577_v62 = vsel %vm4284_vm4, %v4509_v19, %v4519_v21  ;;  %v4596_v21 = vld [vmem:[#allocation2 + $0xa4] sm:$0xf] }
 0x1a3   : > { %v994_v26 = vsel %vm4284_vm4, %v986_v63, %v993_v35  ;;  %v2090_v63 = vld [vmem:[#allocation2 + $0x80] sm:$0x8]  ;;  %v1617_v13 = vrot.slane %v1615_v61, 7 }
 0x1a4   : > { %1641 = vrot.lane.b32.xlu1 %v1520_v12, %s3912_s10  ;;  %1639 = vrot.lane.b32.xlu0 %v1511_v16, %s3912_s10  ;;  %v837_v12 = vld [vmem:[#allocation2 + $0x88] sm:$0xf]  ;;  %v984_v16 = vor.u32 %v982_v6, %v981_v59  ;;  %1046 = vst.msk [vmem:[#allocation3 + $0x34] sm:$0xf] %vm395_vm1, %v994_v26  ;;  %v1564_v24 = vsel %vm4284_vm4, %v1556_v3, %v1563_v4  ;;  %v2226_v6 = vrot.slane %v2224_v53, 7 }
 0x1a5   : > { %v1013_v47 = vshll.u32 %v837_v12, 16  ;;  %v4594_v26 = vld [vmem:[#allocation2 + $0x98] sm:$0xf] }
 0x1a6   : > { %v1086_v55 = vpop.permute.xlu1 %1085  ;;  %v1082_v56 = vpop.permute.xlu0 %1081  ;;  %v2229_v25 = vor.u32 %v2227_v10, %v2226_v6  ;;  %v2246_v53 = vshrl.u32 %v4594_v26, 16  ;;  %v1149_v6 = vld [vmem:[#allocation2 + $0x24] sm:$0xf] }
 0x1a7   : > { %1132 = vst.msk [vmem:[#allocation3 + $0x8] sm:$0xf] %vm1129_vm5, %v1086_v55  ;;  %1130 = vst.msk [vmem:[#allocation3] sm:$0xf] %vm1129_vm5, %v1082_v56  ;;  %v1593_v55 = vshrl.u32 %v4521_v28, 16  ;;  %v1602_v56 = vshrl.u32 %v4523_v29, 16 }
 0x1a8   : > { %1645 = vrot.lane.b32.xlu1 %v1542_v30, %s3912_s10  ;;  %1643 = vrot.lane.b32.xlu0 %v1533_v31, %s3912_s10  ;;  %v985_v30 = vsel %vm4284_vm4, %v3434_v15, %v984_v16  ;;  %v1001_v31 = vshrl.u32 %v836_v11, 16  ;;  %v1596_v15 = vshll.u32 %v4521_v28, 16  ;;  %v1626_v16 = vrot.slane %v1624_v1, 7 }
 0x1a9   : > { %1045 = vst.msk [vmem:[#allocation3 + $0x30] sm:$0xf] %vm395_vm1, %v985_v30  ;;  %v1595_v35 = vrot.slane %v1593_v55, 7  ;;  %v1604_v11 = vrot.slane %v1602_v56, 7  ;;  %v2259_v55 = vshrl.u32 %v4596_v21, 16  ;;  %v1618_v56 = vshll.u32 %v4535_v44, 16 }
 0x1aa   : > { %v1088_v7 = vpop.permute.xlu1 %1087  ;;  %v1084_v8 = vpop.permute.xlu0 %1083 }
 0x1ab   : > { %1133 = vst.msk [vmem:[#allocation3 + $0xc] sm:$0xf] %vm1129_vm5, %v1088_v7  ;;  %1131 = vst.msk [vmem:[#allocation3 + $0x4] sm:$0xf] %vm1129_vm5, %v1084_v8  ;;  %v4575_v7 = vld [vmem:[#allocation2 + $0x94] sm:$0xf]  ;;  %v2208_v8 = vsel %vm4284_vm4, %v2200_v38, %v2207_v41  ;;  %v1607_v28 = vor.u32 %v1605_v14, %v1604_v11  ;;  %v4598_v30 = vor.u32 %v1596_v15, %v1595_v35 }
 0x1ac   : > { %2285 = vrot.lane.b32.xlu1 %v2164_v27, %s3913_s12  ;;  %2283 = vrot.lane.b32.xlu0 %v2155_v45, %s3913_s12  ;;  %v1010_v27 = vshrl.u32 %v837_v12, 16  ;;  %v1003_v45 = vrot.slane %v1001_v31, 7  ;;  %v1588_v12 = vshrl.u32 %v1449_v0, 16  ;;  %v2237_v18 = vshrl.u32 %v4575_v7, 16  ;;  %v4600_v38 = vld [vmem:[#allocation2 + $0xa8] sm:$0xf] }
 0x1ad   : > { %v1600_v29 = vrot.slane %v1595_v35, 4  ;;  %v1627_v31 = vshll.u32 %v1454_v57, 16  ;;  %v2249_v0 = vshll.u32 %v4594_v26, 16  ;;  %v2240_v1 = vshll.u32 %v4575_v7, 16  ;;  %v2096_v35 = vld [vmem:[#allocation2 + $0xa0] sm:$0x8] }
 0x1ae   : > { %v4528_v32 = vpop.permute.xlu1 %1730  ;;  %v4530_v36 = vpop.permute.xlu0 %1728  ;;  %v1012_v46 = vrot.slane %v1010_v27, 7  ;;  %v1008_v58 = vrot.slane %v1003_v45, 4  ;;  %v2093_v27 = vld [vmem:[#allocation2 + $0x90] sm:$0x8]  ;;  %v4606_v50 = vrot.slane %v2237_v18, 7  ;;  %v2271_v10 = vshll.u32 %v4600_v38, 16 }
 0x1af   : > { %v2232_v57 = vshrl.u32 %v2093_v27, 16 }
 0x1b0   : > { %2289 = vrot.lane.b32.xlu1 %v4474_v51, %s3913_s12  ;;  %2287 = vrot.lane.b32.xlu0 %v2177_v52, %s3913_s12  ;;  %v1015_v59 = vor.u32 %v1013_v47, %v1012_v46  ;;  %v1006_v51 = vor.u32 %v1004_v49, %v1003_v45  ;;  %v2196_v52 = vshll.u32 %v4458_v37, 16  ;;  %v3448_v37 = vrot.slane %v2188_v42, 11 }
 0x1b1   : > { %v3442_v45 = vrot.slane %v1588_v12, 11  ;;  %v1622_v46 = vrot.slane %v1617_v13, 4  ;;  %v1610_v47 = vshrl.u32 %v1452_v17, 16  ;;  %v1629_v49 = vor.u32 %v1627_v31, %v1626_v16 }
 0x1b2   : > { %v4549_v48 = vpop.permute.xlu1 %1734  ;;  %v4551_v60 = vpop.permute.xlu0 %1732  ;;  %v1016_v5 = vsel %vm4284_vm4, %v1008_v58, %v1015_v59  ;;  %v1007_v3 = vsel %vm4284_vm4, %v3435_v23, %v1006_v51  ;;  %v2198_v4 = vor.u32 %v2196_v52, %v4501_v9  ;;  %v2218_v9 = vshll.u32 %v4512_v22, 16  ;;  %v1146_v52 = vld [vmem:[#allocation2 + $0x14] sm:$0xf] }
 0x1b3   : > { %1048 = vst.msk [vmem:[#allocation3 + $0x3c] sm:$0xf] %vm395_vm1, %v1016_v5  ;;  %1047 = vst.msk [vmem:[#allocation3 + $0x38] sm:$0xf] %vm395_vm1, %v1007_v3  ;;  %v2268_v58 = vshrl.u32 %v4600_v38, 16  ;;  %v2230_v59 = vsel %vm4284_vm4, %v2222_v20, %v2229_v25  ;;  %v1608_v51 = vsel %vm4284_vm4, %v1600_v29, %v1607_v28  ;;  %v1630_v3 = vsel %vm4284_vm4, %v1622_v46, %v1629_v49 }
 0x1b4   : > { %1649 = vrot.lane.b32.xlu1 %v1564_v24, %s3912_s10  ;;  %1647 = vrot.lane.b32.xlu0 %v1555_v33, %s3912_s10  ;;  %v2210_v33 = vshrl.u32 %v2090_v63, 16  ;;  %v2199_v19 = vsel %vm4284_vm4, %v3448_v37, %v2198_v4  ;;  %v2220_v22 = vor.u32 %v2218_v9, %v2217_v2  ;;  %v1599_v24 = vsel %vm4284_vm4, %v3442_v45, %v4598_v30  ;;  %v1150_v5 = vld [vmem:[#allocation2 + $0x28] sm:$0xf]  ;;  %v1793_v38 = vld [vmem:[#allocation2 + $0x24] sm:$0xf] }
 0x1b5   : > { %v1620_v63 = vor.u32 %v1618_v56, %v1617_v13  ;;  %v2244_v37 = vrot.slane %v4606_v50, 4  ;;  %v2248_v4 = vrot.slane %v2246_v53, 7  ;;  %v2261_v2 = vrot.slane %v2259_v55, 7  ;;  %v1794_v28 = vld [vmem:[#allocation2 + $0x28] sm:$0xf] }
 0x1b6   : > { %v4582_v54 = vpop.permute.xlu1 %2374  ;;  %v4584_v34 = vpop.permute.xlu0 %2372  ;;  %v3449_v43 = vrot.slane %v2210_v33, 11  ;;  %v2270_v7 = vrot.slane %v2268_v58, 7  ;;  %v1148_v33 = vld [vmem:[#allocation2 + $0x1c] sm:$0x1]  ;;  %v1174_v12 = vshrl.u32 %v1146_v52, 16  ;;  %v1177_v13 = vshll.u32 %v1146_v52, 16 }
 0x1b7   : > { %v1207_v14 = vshll.u32 %v1150_v5, 16  ;;  %v2262_v17 = vshll.u32 %v4596_v21, 16  ;;  %v1211_v18 = vshrl.u32 %v1150_v5, 16  ;;  %v1201_v20 = vshll.u32 %v1149_v6, 16 }
 0x1b8   : > { %1653 = vrot.lane.b32.xlu1 %v1586_v40, %s3912_s10  ;;  %1651 = vrot.lane.b32.xlu0 %v1577_v62, %s3912_s10  ;;  %v2221_v23 = vsel %vm4284_vm4, %v3449_v43, %v2220_v22  ;;  %v1147_v40 = vld [vmem:[#allocation2 + $0x18] sm:$0xf]  ;;  %v3443_v62 = vrot.slane %v1610_v47, 11  ;;  %v2251_v25 = vor.u32 %v2249_v0, %v2248_v4  ;;  %v2242_v22 = vor.u32 %v2240_v1, %v4606_v50 }
 0x1b9   : > { %v1183_v11 = vshll.u32 %v1147_v40, 16  ;;  %v1187_v9 = vshrl.u32 %v1147_v40, 16  ;;  %v2266_v26 = vrot.slane %v2261_v2, 4  ;;  %v2254_v29 = vshrl.u32 %v2096_v35, 16  ;;  %v2437_v35 = vld [vmem:[#allocation2 + $0x34] sm:$0xf] }
 0x1ba   : > { %v4602_v41 = vpop.permute.xlu1 %2378  ;;  %v4604_v42 = vpop.permute.xlu0 %2376  ;;  %v2273_v30 = vor.u32 %v2271_v10, %v2270_v7  ;;  %v4641_v31 = vor.u32 %v2262_v17, %v2261_v2  ;;  %v1193_v27 = vshll.u32 %v1148_v33, 16  ;;  %v1176_v45 = vrot.slane %v1174_v12, 4  ;;  %v1795_v12 = vld [vmem:[#allocation2 + $0x2c] sm:$0x1] }
 0x1bb   : > { %v4643_v21 = vrot.slane %v1183_v11, 5  ;;  %v1189_v43 = vrot.slane %v1187_v9, 4  ;;  %v1179_v46 = vrot.slane %v1177_v13, 5  ;;  %v4645_v47 = vrot.slane %v1207_v14, 5 }
 0x1bc   : > { %2293 = vrot.lane.b32.xlu1 %v2208_v8, %s3913_s12  ;;  %2291 = vrot.lane.b32.xlu0 %v2199_v19, %s3913_s12  ;;  %v4632_v8 = vrot.slane %v2232_v57, 11  ;;  %v1198_v19 = vshrl.u32 %v1149_v6, 16  ;;  %v1213_v53 = vrot.slane %v1211_v18, 4  ;;  %v1203_v56 = vrot.slane %v1201_v20, 5 }
 0x1bd   : > { %v1827_v57 = vshll.u32 %v1794_v28, 16  ;;  %v1621_v58 = vsel %vm4284_vm4, %v3443_v62, %v1620_v63  ;;  %v2252_v40 = vsel %vm4284_vm4, %v2244_v37, %v2251_v25  ;;  %v1797_v62 = vld [vmem:[#allocation2 + $0x38] sm:$0xf]  ;;  %v1190_v0 = vor.u32 %v1189_v43, %v4643_v21 }
 0x1be   : > { %v1092_v61 = vpop.permute.xlu1 %1091  ;;  %v1090_v44 = vpop.permute.xlu0 %1089  ;;  %v1200_v55 = vrot.slane %v1198_v19, 4  ;;  %v2243_v52 = vsel %vm4284_vm4, %v4632_v8, %v2242_v22  ;;  %v4666_v1 = vrot.slane %v1193_v27, 5  ;;  %v1180_v5 = vor.u32 %v1179_v46, %v1176_v45  ;;  %v2438_v37 = vld [vmem:[#allocation2 + $0x38] sm:$0xf] }
 0x1bf   : > { %1135 = vst.msk [vmem:[#allocation3 + $0x14] sm:$0xf] %vm1129_vm5, %v1092_v61  ;;  %1134 = vst.msk [vmem:[#allocation3 + $0x10] sm:$0xf] %vm1129_vm5, %v1090_v44  ;;  %v2274_v61 = vsel %vm4284_vm4, %v2266_v26, %v2273_v30  ;;  %v1821_v44 = vshll.u32 %v1793_v38, 16  ;;  %v1214_v6 = vor.u32 %v1213_v53, %v4645_v47  ;;  %v4673_v10 = vrot.slane %v1827_v57, 5 }
 0x1c0   : > { %2297 = vrot.lane.b32.xlu1 %v2230_v59, %s3913_s12  ;;  %2295 = vrot.lane.b32.xlu0 %v2221_v23, %s3913_s12  ;;  %v3451_v59 = vrot.slane %v2254_v29, 11  ;;  %v1151_v23 = vld [vmem:[#allocation2 + $0x2c] sm:$0x1]  ;;  %v1204_v7 = vor.u32 %v1203_v56, %v1200_v55  ;;  %v1851_v33 = vshll.u32 %v1797_v62, 16  ;;  %v1855_v9 = vshrl.u32 %v1797_v62, 16 }
 0x1c1   : > { %v1217_v8 = vshll.u32 %v1151_v23, 16  ;;  %v1823_v13 = vrot.slane %v1821_v44, 5  ;;  %v1191_v17 = vrot.slane %v1190_v0, 4  ;;  %v2475_v18 = vshrl.u32 %v2438_v37, 16  ;;  %v1798_v55 = vld [vmem:[#allocation2 + $0x3c] sm:$0x1] }
 0x1c2   : > { %v1096_v15 = vpop.permute.xlu1 %1095  ;;  %v1094_v16 = vpop.permute.xlu0 %1093  ;;  %v2265_v63 = vsel %vm4284_vm4, %v3451_v59, %v4641_v31  ;;  %v2462_v19 = vshrl.u32 %v2437_v35, 16  ;;  %v2465_v20 = vshll.u32 %v2437_v35, 16  ;;  %v1181_v26 = vrot.slane %v1180_v5, 4  ;;  %v2441_v31 = vld [vmem:[#allocation2 + $0x48] sm:$0xf] }
 0x1c3   : > { %1137 = vst.msk [vmem:[#allocation3 + $0x1c] sm:$0xf] %vm1129_vm5, %v1096_v15  ;;  %1136 = vst.msk [vmem:[#allocation3 + $0x18] sm:$0xf] %vm1129_vm5, %v1094_v16  ;;  %v2471_v16 = vshll.u32 %v2438_v37, 16  ;;  %v1215_v29 = vrot.slane %v1214_v6, 4 }
 0x1c4   : > { %1657 = vrot.lane.b32.xlu1 %v1608_v51, %s3912_s10  ;;  %1655 = vrot.lane.b32.xlu0 %v1599_v24, %s3912_s10  ;;  %v1831_v51 = vshrl.u32 %v1794_v28, 16  ;;  %v1818_v24 = vshrl.u32 %v1793_v38, 16  ;;  %v1219_v28 = vrot.slane %v1217_v8, 5  ;;  %v1205_v30 = vrot.slane %v1204_v7, 4  ;;  %v2439_v59 = vld [vmem:[#allocation2 + $0x3c] sm:$0x1] }
 0x1c5   : > { %v1837_v43 = vshll.u32 %v1795_v12, 16  ;;  %v4688_v45 = vrot.slane %v1851_v33, 5  ;;  %v1857_v46 = vrot.slane %v1855_v9, 4  ;;  %v2477_v23 = vrot.slane %v2475_v18, 4  ;;  %v2440_v5 = vld [vmem:[#allocation2 + $0x44] sm:$0xf] }
 0x1c6   : > { %v4647_v49 = vpop.permute.xlu1 %1738  ;;  %v4649_v50 = vpop.permute.xlu0 %1736  ;;  %v1833_v39 = vrot.slane %v1831_v51, 4  ;;  %v1820_v11 = vrot.slane %v1818_v24, 4  ;;  %v2464_v51 = vrot.slane %v2462_v19, 4  ;;  %v2467_v24 = vrot.slane %v2465_v20, 5  ;;  %v1153_v7 = vld [vmem:[#allocation2 + $0x38] sm:$0xf] }
 0x1c7   : > { %v1186_v62 = vsel %vm4683_vm8, %v1181_v26, %v4643_v21  ;;  %v2499_v0 = vshrl.u32 %v2441_v31, 16  ;;  %v1839_v6 = vrot.slane %v1837_v43, 5  ;;  %v1861_v8 = vshll.u32 %v1798_v55, 16 }
 0x1c8   : > { %1661 = vrot.lane.b32.xlu1 %v1630_v3, %s3912_s10  ;;  %1659 = vrot.lane.b32.xlu0 %v1621_v58, %s3912_s10  ;;  %v1796_v3 = vld [vmem:[#allocation2 + $0x34] sm:$0xf]  ;;  %v1834_v38 = vor.u32 %v1833_v39, %v4673_v10  ;;  %v1824_v53 = vor.u32 %v1823_v13, %v1820_v11  ;;  %v4692_v58 = vrot.slane %v2471_v16, 5  ;;  %v1858_v21 = vor.u32 %v1857_v46, %v4688_v45  ;;  %v1156_v46 = vld [vmem:[#allocation2 + $0x48] sm:$0xf]  ;;  %s3516_s10 = sshll.u32 %s3887_s19, 7 }
 0x1c9   : > { %v1842_v14 = vshrl.u32 %v1796_v3, 16  ;;  %v1845_v15 = vshll.u32 %v1796_v3, 16  ;;  %v1210_v3 = vsel %vm4683_vm8, %v1205_v30, %v4645_v47  ;;  %v2481_v39 = vshll.u32 %v2439_v59, 16  ;;  %v1152_v11 = vld [vmem:[#allocation2 + $0x34] sm:$0xf] }
 0x1ca   : > { %v4668_v4 = vpop.permute.xlu1 %1742  ;;  %v4670_v2 = vpop.permute.xlu0 %1740  ;;  %v1835_v37 = vrot.slane %v1834_v38, 4  ;;  %v2478_v33 = vor.u32 %v2477_v23, %v4692_v58  ;;  %v2468_v9 = vor.u32 %v2467_v24, %v2464_v51  ;;  %v2486_v47 = vshrl.u32 %v2440_v5, 16  ;;  %v1155_v59 = vld [vmem:[#allocation2 + $0x44] sm:$0xf] }
 0x1cb   : > { %v1844_v56 = vrot.slane %v1842_v14, 4  ;;  %v1847_v57 = vrot.slane %v1845_v15, 5  ;;  %v2442_v15 = vld [vmem:[#allocation2 + $0x4c] sm:$0x1]  ;;  %v2501_v16 = vrot.slane %v2499_v0, 4  ;;  %v1231_v18 = vshll.u32 %v1153_v7, 16 }
 0x1cc   : > { %2301 = vrot.lane.b32.xlu1 %v2252_v40, %s3913_s12  ;;  %2299 = vrot.lane.b32.xlu0 %v2243_v52, %s3913_s12  ;;  %v2495_v40 = vshll.u32 %v2441_v31, 16  ;;  %v1235_v19 = vshrl.u32 %v1153_v7, 16  ;;  %v1840_v20 = vsel %vm4683_vm8, %v1835_v37, %v1839_v6  ;;  %v1863_v26 = vrot.slane %v1861_v8, 5 }
 0x1cd   : > { %v1848_v35 = vor.u32 %v1847_v57, %v1844_v56  ;;  %v1859_v31 = vrot.slane %v1858_v21, 4  ;;  %v4724_v43 = vrot.slane %v2481_v39, 5  ;;  %v4728_v55 = vrot.slane %v2468_v9, 4 }
 0x1ce   : > { %v4677_v25 = vpop.permute.xlu1 %2382  ;;  %v4679_v22 = vpop.permute.xlu0 %2380  ;;  %v4713_v12 = vrot.slane %v2495_v40, 5  ;;  %v2505_v56 = vshll.u32 %v2442_v15, 16  ;;  %v2488_v57 = vrot.slane %v2486_v47, 4  ;;  %v1246_v37 = vshrl.u32 %v1155_v59, 16 }
 0x1cf   : > { %v1849_v38 = vrot.slane %v1848_v35, 4  ;;  %v1249_v6 = vshll.u32 %v1155_v59, 16  ;;  %v1864_v8 = vsel %vm4683_vm8, %v1859_v31, %v1863_v26  ;;  %v1800_v35 = vld [vmem:[#allocation2 + $0x48] sm:$0xf]  ;;  %vm2701_vm1 = vcmask 585216  }
 0x1d0   : > { %2305 = vrot.lane.b32.xlu1 %v2274_v61, %s3913_s12  ;;  %2303 = vrot.lane.b32.xlu0 %v2265_v63, %s3913_s12  ;;  %v1196_v61 = vsel %vm4683_vm8, %v1191_v17, %v4666_v1  ;;  %v1220_v63 = vsel %vm4683_vm8, %v1215_v29, %v1219_v28  ;;  %v1825_v1 = vrot.slane %v1824_v53, 4  ;;  %v2489_v17 = vshll.u32 %v2440_v5, 16 }
 0x1d1   : > { %v1222_v29 = vshrl.u32 %v1152_v11, 16  ;;  %v1225_v28 = vshll.u32 %v1152_v11, 16  ;;  %v4726_v53 = vrot.slane %v2478_v33, 4  ;;  %v2502_v24 = vor.u32 %v2501_v16, %v4713_v12 }
 0x1d2   : > { %v4694_v52 = vpop.permute.xlu1 %2386  ;;  %v4696_v44 = vpop.permute.xlu0 %2384  ;;  %v1830_v30 = vsel %vm4683_vm8, %v1825_v1, %v4673_v10  ;;  %v2491_v40 = vrot.slane %v2489_v17, 5  ;;  %v1237_v10 = vrot.slane %v1235_v19, 4  ;;  %v1255_v5 = vshll.u32 %v1156_v46, 16  ;;  %v1802_v19 = vld [vmem:[#allocation2 + $0x54] sm:$0xf] }
 0x1d3   : > { %v1227_v0 = vrot.slane %v1225_v28, 5  ;;  %v1854_v7 = vsel %vm4683_vm8, %v1849_v38, %v4688_v45  ;;  %v2484_v1 = vsel %vm4683_vm8, %v4726_v53, %v4724_v43  ;;  %v2507_v21 = vrot.slane %v2505_v56, 5  ;;  %v1799_v45 = vld [vmem:[#allocation2 + $0x44] sm:$0xf] }
 0x1d4   : > { %1367 = vrot.lane.b32.xlu1 %v1196_v61, %s3914_s6  ;;  %1365 = vrot.lane.b32.xlu0 %v1186_v62, %s3914_s6  ;;  %v4731_v61 = vrot.slane %v1231_v18, 5  ;;  %v1154_v62 = vld [vmem:[#allocation2 + $0x3c] sm:$0x1]  ;;  %v2474_v33 = vsel %vm4683_vm8, %v4728_v55, %v4692_v58  ;;  %v2503_v9 = vrot.slane %v2502_v24, 4  ;;  %v2492_v47 = vor.u32 %v2491_v40, %v2488_v57 }
 0x1d5   : > { %v4755_v17 = vrot.slane %v1255_v5, 5  ;;  %v1248_v26 = vrot.slane %v1246_v37, 4  ;;  %v1875_v58 = vshll.u32 %v1800_v35, 16  ;;  %v1879_v28 = vshrl.u32 %v1800_v35, 16  ;;  %v1801_v37 = vld [vmem:[#allocation2 + $0x4c] sm:$0x1] }
 0x1d6   : > { %v1100_v13 = vpop.permute.xlu1 %1099  ;;  %v1098_v14 = vpop.permute.xlu0 %1097  ;;  %v1238_v15 = vor.u32 %v1237_v10, %v4731_v61  ;;  %v1869_v31 = vshll.u32 %v1799_v45, 16  ;;  %v2493_v55 = vrot.slane %v2492_v47, 4  ;;  %v1890_v57 = vshrl.u32 %v1802_v19, 16  ;;  %v2444_v10 = vld [vmem:[#allocation2 + $0x58] sm:$0xf] }
 0x1d7   : > { %1139 = vst.msk [vmem:[#allocation3 + $0x24] sm:$0xf] %vm1129_vm5, %v1100_v13  ;;  %1138 = vst.msk [vmem:[#allocation3 + $0x20] sm:$0xf] %vm1129_vm5, %v1098_v14  ;;  %v1241_v13 = vshll.u32 %v1154_v62, 16  ;;  %v1893_v59 = vshll.u32 %v1802_v19, 16 }
 0x1d8   : > { %1371 = vrot.lane.b32.xlu1 %v1220_v63, %s3914_s6  ;;  %1369 = vrot.lane.b32.xlu0 %v1210_v3, %s3914_s6  ;;  %v1224_v63 = vrot.slane %v1222_v29, 4  ;;  %v1259_v3 = vshrl.u32 %v1156_v46, 16  ;;  %v1803_v14 = vld [vmem:[#allocation2 + $0x58] sm:$0xf]  ;;  %v1251_v29 = vrot.slane %v1249_v6, 5  ;;  %v1881_v5 = vrot.slane %v1879_v28, 4 }
 0x1d9   : > { %v1899_v38 = vshll.u32 %v1803_v14, 16  ;;  %v1903_v43 = vshrl.u32 %v1803_v14, 16  ;;  %v1243_v56 = vrot.slane %v1241_v13, 5  ;;  %v1892_v47 = vrot.slane %v1890_v57, 4 }
 0x1da   : > { %v1104_v23 = vpop.permute.xlu1 %1103  ;;  %v1102_v51 = vpop.permute.xlu0 %1101  ;;  %v1228_v16 = vor.u32 %v1227_v0, %v1224_v63  ;;  %v1261_v18 = vrot.slane %v1259_v3, 4  ;;  %v1252_v63 = vor.u32 %v1251_v29, %v1248_v26  ;;  %v4768_v0 = vrot.slane %v1875_v58, 5  ;;  %v2443_v3 = vld [vmem:[#allocation2 + $0x54] sm:$0xf]  ;;  %v2447_v58 = vld [vmem:[#allocation2 + $0x68] sm:$0xf] }
 0x1db   : > { %1141 = vst.msk [vmem:[#allocation3 + $0x2c] sm:$0xf] %vm1129_vm5, %v1104_v23  ;;  %1140 = vst.msk [vmem:[#allocation3 + $0x28] sm:$0xf] %vm1129_vm5, %v1102_v51  ;;  %v2508_v23 = vsel %vm4683_vm8, %v2503_v9, %v2507_v21  ;;  %v1239_v51 = vrot.slane %v1238_v15, 4  ;;  %v1905_v21 = vrot.slane %v1903_v43, 4  ;;  %v2498_v14 = vsel %vm4683_vm8, %v2493_v55, %v4713_v12 }
 0x1dc   : > { %2011 = vrot.lane.b32.xlu1 %v1840_v20, %s3915_s29  ;;  %2009 = vrot.lane.b32.xlu0 %v1830_v30, %s3915_s29  ;;  %v1157_v20 = vld [vmem:[#allocation2 + $0x4c] sm:$0x1]  ;;  %v1866_v30 = vshrl.u32 %v1799_v45, 16  ;;  %v1229_v24 = vrot.slane %v1228_v16, 4  ;;  %v1262_v62 = vor.u32 %v1261_v18, %v4755_v17  ;;  %v2519_v13 = vshll.u32 %v2444_v10, 16 }
 0x1dd   : > { %v1265_v40 = vshll.u32 %v1157_v20, 16  ;;  %v2523_v45 = vshrl.u32 %v2444_v10, 16  ;;  %v1244_v15 = vsel %vm4683_vm8, %v1239_v51, %v1243_v56  ;;  %v2510_v16 = vshrl.u32 %v2443_v3, 16 }
 0x1de   : > { %v4746_v39 = vpop.permute.xlu1 %1746  ;;  %v4748_v11 = vpop.permute.xlu0 %1744  ;;  %v1868_v6 = vrot.slane %v1866_v30, 4  ;;  %v2513_v18 = vshll.u32 %v2443_v3, 16  ;;  %v1234_v19 = vsel %vm4683_vm8, %v1229_v24, %v4731_v61  ;;  %v1263_v20 = vrot.slane %v1262_v62, 4 }
 0x1df   : > { %v1267_v26 = vrot.slane %v1265_v40, 5  ;;  %v1253_v29 = vrot.slane %v1252_v63, 4  ;;  %v1882_v28 = vor.u32 %v1881_v5, %v4768_v0  ;;  %v1885_v12 = vshll.u32 %v1801_v37, 16 }
 0x1e0   : > { %2015 = vrot.lane.b32.xlu1 %v1864_v8, %s3915_s29  ;;  %2013 = vrot.lane.b32.xlu0 %v1854_v7, %s3915_s29  ;;  %v1871_v8 = vrot.slane %v1869_v31, 5  ;;  %v4770_v7 = vrot.slane %v1899_v38, 5  ;;  %v2446_v38 = vld [vmem:[#allocation2 + $0x64] sm:$0xf]  ;;  %v2525_v61 = vrot.slane %v2523_v45, 4  ;;  %v2512_v51 = vrot.slane %v2510_v16, 4 }
 0x1e1   : > { %v2515_v24 = vrot.slane %v2513_v18, 5  ;;  %v2543_v40 = vshll.u32 %v2447_v58, 16  ;;  %v2547_v10 = vshrl.u32 %v2447_v58, 16  ;;  %v1268_v62 = vsel %vm4683_vm8, %v1263_v20, %v1267_v26  ;;  %v2448_v18 = vld [vmem:[#allocation2 + $0x6c] sm:$0x1] }
 0x1e2   : > { %v4759_v46 = vpop.permute.xlu1 %1750  ;;  %v4761_v53 = vpop.permute.xlu0 %1748  ;;  %v1872_v30 = vor.u32 %v1871_v8, %v1868_v6  ;;  %v1906_v56 = vor.u32 %v1905_v21, %v4770_v7  ;;  %v2534_v63 = vshrl.u32 %v2446_v38, 16  ;;  %v2537_v5 = vshll.u32 %v2446_v38, 16  ;;  %v1159_v21 = vld [vmem:[#allocation2 + $0x58] sm:$0xf]  ;;  %v3742_v26 = vld [vmem:[%s5476_s4 + $0x20] ss:$0 sps:$4 sm:$0xff]  }
 0x1e3   : > { %5509 = vst [vmem:[#allocation16_spill] sm:$0xff] %v4759_v46  ;;  %5510 = vst [vmem:[#allocation17_spill] sm:$0xff] %v4761_v53  ;;  %v1258_v3 = vsel %vm4683_vm8, %v1253_v29, %v4755_v17  ;;  %v1883_v37 = vrot.slane %v1882_v28, 4  ;;  %v1887_v6 = vrot.slane %v1885_v12, 5  ;;  %v2516_v16 = vor.u32 %v2515_v24, %v2512_v51  ;;  %3624 = vmatprep.subr.msk.bf16.mxu1 %vm2835_vm9, %v3742_v26 }
 0x1e4   : > { %2655 = vrot.lane.b32.xlu1 %v2484_v1, %s3916_s22  ;;  %2653 = vrot.lane.b32.xlu0 %v2474_v33, %s3916_s22  ;;  %v1804_v1 = vld [vmem:[#allocation2 + $0x5c] sm:$0x1]  ;;  %v1895_v33 = vrot.slane %v1893_v59, 5  ;;  %v4792_v59 = vrot.slane %v2519_v13, 5  ;;  %v1873_v8 = vrot.slane %v1872_v30, 4  ;;  %v2549_v20 = vrot.slane %v2547_v10, 4 }
 0x1e5   : > { %v1909_v31 = vshll.u32 %v1804_v1, 16  ;;  %v2536_v29 = vrot.slane %v2534_v63, 4  ;;  %v2539_v58 = vrot.slane %v2537_v5, 5  ;;  %v1279_v28 = vshll.u32 %v1159_v21, 16  ;;  %v1161_v10 = vld [vmem:[#allocation2 + $0x64] sm:$0xf] }
 0x1e6   : > { %v4772_v35 = vpop.permute.xlu1 %2390  ;;  %v4774_v9 = vpop.permute.xlu0 %2388  ;;  %v1896_v57 = vor.u32 %v1895_v33, %v1892_v47  ;;  %v4801_v33 = vrot.slane %v1906_v56, 4  ;;  %v2526_v17 = vor.u32 %v2525_v61, %v4792_v59  ;;  %v1283_v12 = vshrl.u32 %v1159_v21, 16 }
 0x1e7   : > { %5511 = vst [vmem:[#allocation18_spill] sm:$0xff] %v4772_v35  ;;  %5512 = vst [vmem:[#allocation19_spill] sm:$0xff] %v4774_v9  ;;  %v4803_v13 = vrot.slane %v1909_v31, 5  ;;  %v1888_v30 = vsel %vm4683_vm8, %v1883_v37, %v1887_v6  ;;  %v1878_v31 = vsel %vm4683_vm8, %v1873_v8, %v4768_v0  ;;  %v2517_v5 = vrot.slane %v2516_v16, 4 }
 0x1e8   : > { %2659 = vrot.lane.b32.xlu1 %v2508_v23, %s3916_s22  ;;  %2657 = vrot.lane.b32.xlu0 %v2498_v14, %s3916_s22  ;;  %v2445_v23 = vld [vmem:[#allocation2 + $0x5c] sm:$0x1]  ;;  %v4805_v45 = vrot.slane %v1896_v57, 4  ;;  %v1162_v57 = vld [vmem:[#allocation2 + $0x68] sm:$0xf]  ;;  %v2527_v63 = vrot.slane %v2526_v17, 4  ;;  %v2540_v8 = vor.u32 %v2539_v58, %v2536_v29 }
 0x1e9   : > { %v2529_v14 = vshll.u32 %v2445_v23, 16  ;;  %v1912_v51 = vsel %vm4683_vm8, %v4801_v33, %v4803_v13  ;;  %v2837_v37 = vsel %vm2835_vm9, %v3742_v26, 0  ;;  %v4842_v21 = vrot.slane %v1279_v28, 5  ;;  %v1160_v33 = vld [vmem:[#allocation2 + $0x5c] sm:$0x1] }
 0x1ea   : > { %v4787_v43 = vpop.permute.xlu1 %2394  ;;  %v4789_v55 = vpop.permute.xlu0 %2392  ;;  %v1902_v0 = vsel %vm4683_vm8, %v4805_v45, %v4770_v7  ;;  %v1303_v45 = vshll.u32 %v1162_v57, 16  ;;  %3577 = vmatpush3.bf16.msra.mxu1 %v2837_v37  ;;  %v1294_v16 = vshrl.u32 %v1161_v10, 16 }
 0x1eb   : > { %5513 = vst [vmem:[#allocation20_spill] sm:$0xff] %v4787_v43  ;;  %5514 = vst [vmem:[#allocation21_spill] sm:$0xff] %v4789_v55  ;;  %v4826_v24 = vrot.slane %v2529_v14, 5  ;;  %v1307_v14 = vshrl.u32 %v1162_v57, 16  ;;  %v1289_v57 = vshll.u32 %v1160_v33, 16 }
 0x1ec   : > { %1375 = vrot.lane.b32.xlu1 %v1244_v15, %s3914_s6  ;;  %1373 = vrot.lane.b32.xlu0 %v1234_v19, %s3914_s6  ;;  %v1158_v15 = vld [vmem:[#allocation2 + $0x54] sm:$0xf]  ;;  %v4810_v19 = vrot.slane %v2543_v40, 5  ;;  %v2553_v40 = vshll.u32 %v2448_v18, 16  ;;  %v1297_v18 = vshll.u32 %v1161_v10, 16  ;;  %v2541_v10 = vrot.slane %v2540_v8, 4 }
 0x1ed   : > { %v1270_v38 = vshrl.u32 %v1158_v15, 16  ;;  %v1273_v56 = vshll.u32 %v1158_v15, 16  ;;  %v2532_v29 = vsel %vm4683_vm8, %v2527_v63, %v4826_v24  ;;  %v4860_v24 = vrot.slane %v1303_v45, 5  ;;  %v1808_v63 = vld [vmem:[#allocation2 + $0x74] sm:$0xf] }
 0x1ee   : > { %v1108_v1 = vpop.permute.xlu1 %1107  ;;  %v1106_v47 = vpop.permute.xlu0 %1105  ;;  %v2550_v6 = vor.u32 %v2549_v20, %v4810_v19  ;;  %v3744_v20 = vld [vmem:[%s5476_s4 + $0x10] sm:$0xff]   ;;  %v2555_v58 = vrot.slane %v2553_v40, 5  ;;  %v1309_v40 = vrot.slane %v1307_v14, 4  ;;  %v1296_v37 = vrot.slane %v1294_v16, 4  ;;  %v1807_v8 = vld [vmem:[#allocation2 + $0x6c] sm:$0x1] }
 0x1ef   : > { %1143 = vst.msk [vmem:[#allocation3 + $0x34] sm:$0xf] %vm1129_vm5, %v1108_v1  ;;  %1142 = vst.msk [vmem:[#allocation3 + $0x30] sm:$0xf] %vm1129_vm5, %v1106_v47  ;;  %v1285_v1 = vrot.slane %v1283_v12, 4  ;;  %v1272_v7 = vrot.slane %v1270_v38, 4 }
 0x1f0   : > { %1379 = vrot.lane.b32.xlu1 %v1268_v62, %s3914_s6  ;;  %1377 = vrot.lane.b32.xlu0 %v1258_v3, %s3914_s6  ;;  %v3743_v62 = vld [vmem:[%s5476_s4 + $0x18] sm:$0xff]   ;;  %v1806_v3 = vld [vmem:[#allocation2 + $0x68] sm:$0xf]  ;;  %v1805_v47 = vld [vmem:[#allocation2 + $0x64] sm:$0xf]  ;;  %v1275_v13 = vrot.slane %v1273_v56, 5 }
 0x1f1   : > { %v1923_v26 = vshll.u32 %v1806_v3, 16  ;;  %3578 = vmatprep.subr.bf16.mxu1 %v3743_v62  ;;  %v1914_v28 = vshrl.u32 %v1805_v47, 16  ;;  %v1917_v12 = vshll.u32 %v1805_v47, 16  ;;  %v2551_v38 = vrot.slane %v2550_v6, 4  ;;  %v3745_v6 = vld [vmem:[%s5476_s4 + $0x8] sm:$0xff]  }
 0x1f2   : > { %v1112_v61 = vpop.permute.xlu1 %1111  ;;  %v1110_v23 = vpop.permute.xlu0 %1109  ;;  %v1286_v56 = vor.u32 %v1285_v1, %v4842_v21  ;;  %3579 = vmatpush3.bf16.msra.mxu1 %v3743_v62  ;;  %v1299_v47 = vrot.slane %v1297_v18, 5  ;;  %v1291_v62 = vrot.slane %v1289_v57, 5  ;;  %v1938_v45 = vshrl.u32 %v1808_v63, 16 }
 0x1f3   : > { %1145 = vst.msk [vmem:[#allocation3 + $0x3c] sm:$0xf] %vm1129_vm5, %v1112_v61  ;;  %1144 = vst.msk [vmem:[#allocation3 + $0x38] sm:$0xf] %vm1129_vm5, %v1110_v23  ;;  %v1163_v61 = vld [vmem:[#allocation2 + $0x6c] sm:$0x1]  ;;  %3580 = vmatprep.subr.bf16.mxu1 %v3744_v20  ;;  %v2556_v16 = vsel %vm4683_vm8, %v2551_v38, %v2555_v58  ;;  %v2546_v18 = vsel %vm4683_vm8, %v2541_v10, %v4810_v19 }
 0x1f4   : > { %2019 = vrot.lane.b32.xlu1 %v1888_v30, %s3915_s29  ;;  %2017 = vrot.lane.b32.xlu0 %v1878_v31, %s3915_s29  ;;  %v1927_v30 = vshrl.u32 %v1806_v3, 16  ;;  %v2522_v31 = vsel %vm4683_vm8, %v2517_v5, %v4792_v59  ;;  %v1809_v23 = vld [vmem:[#allocation2 + $0x78] sm:$0xf]  ;;  %v1276_v3 = vor.u32 %v1275_v13, %v1272_v7  ;;  %v4866_v59 = vrot.slane %v1923_v26, 5  ;;  %v3746_v58 = vld [vmem:[%s5476_s4] sm:$0xff]  }
 0x1f5   : > { %v1916_v1 = vrot.slane %v1914_v28, 4  ;;  %v1919_v33 = vrot.slane %v1917_v12, 5  ;;  %v1947_v7 = vshll.u32 %v1809_v23, 16  ;;  %v1951_v13 = vshrl.u32 %v1809_v23, 16  ;;  %v2450_v28 = vld [vmem:[#allocation2 + $0x78] sm:$0xf] }
 0x1f6   : > { %v4844_v15 = vpop.permute.xlu1 %1754  ;;  %v4846_v17 = vpop.permute.xlu0 %1752  ;;  %v1929_v5 = vrot.slane %v1927_v30, 4  ;;  %v1941_v14 = vshll.u32 %v1808_v63, 16  ;;  %v1287_v26 = vrot.slane %v1286_v56, 4  ;;  %v1313_v30 = vshll.u32 %v1163_v61, 16  ;;  %3581 = vmatpush3.bf16.msra.mxu1 %v3744_v20  ;;  %v1810_v61 = vld [vmem:[#allocation2 + $0x7c] sm:$0x1] }
 0x1f7   : > { %5515 = vst [vmem:[#allocation22_spill] sm:$0xff] %v4844_v15  ;;  %5516 = vst [vmem:[#allocation23_spill] sm:$0xff] %v4846_v17  ;;  %v1300_v57 = vor.u32 %v1299_v47, %v1296_v37  ;;  %v1933_v63 = vshll.u32 %v1807_v8, 16  ;;  %3582 = vmatprep.subr.bf16.mxu1 %v3745_v6  ;;  %v1920_v38 = vor.u32 %v1919_v33, %v1916_v1  ;;  %v4887_v56 = vrot.slane %v1947_v7, 5 }
 0x1f8   : > { %2023 = vrot.lane.b32.xlu1 %v1912_v51, %s3915_s29  ;;  %2021 = vrot.lane.b32.xlu0 %v1902_v0, %s3915_s29  ;;  %v1930_v19 = vor.u32 %v1929_v5, %v4866_v59  ;;  %v1953_v20 = vrot.slane %v1951_v13, 4  ;;  %v1940_v10 = vrot.slane %v1938_v45, 4  ;;  %v2571_v37 = vshrl.u32 %v2450_v28, 16  ;;  %v2453_v45 = vld [vmem:[#allocation2 + $0x88] sm:$0xf] }
 0x1f9   : > { %v1315_v47 = vrot.slane %v1313_v30, 5  ;;  %v1292_v1 = vsel %vm4683_vm8, %v1287_v26, %v1291_v62  ;;  %v1935_v13 = vrot.slane %v1933_v63, 5  ;;  %v2591_v63 = vshll.u32 %v2453_v45, 16 }
 0x1fa   : > { %v4862_v51 = vpop.permute.xlu1 %1758  ;;  %v4864_v0 = vpop.permute.xlu0 %1756  ;;  %3583 = vmatpush3.bf16.msra.mxu1 %v3745_v6  ;;  %v2452_v6 = vld [vmem:[#allocation2 + $0x84] sm:$0xf]  ;;  %v1954_v30 = vor.u32 %v1953_v20, %v4887_v56 }
 0x1fb   : > { %5517 = vst [vmem:[#allocation24_spill] sm:$0xff] %v4862_v51  ;;  %5518 = vst [vmem:[#allocation25_spill] sm:$0xff] %v4864_v0  ;;  %v2449_v0 = vld [vmem:[#allocation2 + $0x74] sm:$0xf]  ;;  %3584 = vmatprep.subr.bf16.mxu1 %v3746_v58 }
 0x1fc   : > { %2663 = vrot.lane.b32.xlu1 %v2532_v29, %s3916_s22  ;;  %2661 = vrot.lane.b32.xlu0 %v2522_v31, %s3916_s22  ;;  %v1277_v29 = vrot.slane %v1276_v3, 4  ;;  %v1310_v31 = vor.u32 %v1309_v40, %v4860_v24  ;;  %v1943_v3 = vrot.slane %v1941_v14, 5  ;;  %v2567_v40 = vshll.u32 %v2450_v28, 16 }
 0x1fd   : > { %v2558_v8 = vshrl.u32 %v2449_v0, 16  ;;  %v1301_v14 = vrot.slane %v1300_v57, 4  ;;  %v2573_v28 = vrot.slane %v2571_v37, 4  ;;  %v1955_v37 = vrot.slane %v1954_v30, 4 }
 0x1fe   : > { %v4878_v12 = vpop.permute.xlu1 %2398  ;;  %v4880_v23 = vpop.permute.xlu0 %2396  ;;  %v1282_v33 = vsel %vm4683_vm8, %v1277_v29, %v4842_v21  ;;  %v1311_v7 = vrot.slane %v1310_v31, 4  ;;  %v1944_v62 = vor.u32 %v1943_v3, %v1940_v10  ;;  %v4903_v26 = vrot.slane %v2567_v40, 5  ;;  %v2451_v21 = vld [vmem:[#allocation2 + $0x7c] sm:$0x1]  ;;  %3585 = vmatpush3.bf16.msra.mxu1 %v3746_v58  ;;  %v1165_v3 = vld [vmem:[#allocation2 + $0x78] sm:$0xf] }
 0x1ff   : > { %5519 = vst [vmem:[#allocation26_spill] sm:$0xff] %v4878_v12  ;;  %5520 = vst [vmem:[#allocation27_spill] sm:$0xff] %v4880_v23  ;;  %v2561_v23 = vshll.u32 %v2449_v0, 16  ;;  %v1957_v0 = vshll.u32 %v1810_v61, 16  ;;  %v2560_v29 = vrot.slane %v2558_v8, 4  ;;  %v2585_v61 = vshll.u32 %v2452_v6, 16 }
 0x200   : > { %2667 = vrot.lane.b32.xlu1 %v2556_v16, %s3916_s22  ;;  %2665 = vrot.lane.b32.xlu0 %v2546_v18, %s3916_s22  ;;  %v1931_v16 = vrot.slane %v1930_v19, 4  ;;  %v1921_v18 = vrot.slane %v1920_v38, 4  ;;  %v2582_v38 = vshrl.u32 %v2452_v6, 16  ;;  %v1306_v20 = vsel %vm4683_vm8, %v1301_v14, %v4860_v24  ;;  %v1164_v40 = vld [vmem:[#allocation2 + $0x74] sm:$0xf] }
 0x201   : > { %v2563_v31 = vrot.slane %v2561_v23, 5  ;;  %v1959_v23 = vrot.slane %v1957_v0, 5  ;;  %v2577_v8 = vshll.u32 %v2451_v21, 16  ;;  %v2574_v24 = vor.u32 %v2573_v28, %v4903_v26  ;;  %v1167_v14 = vld [vmem:[#allocation2 + $0x84] sm:$0xf] }
 0x202   : > { %v4891_v12 = vpop.permute.xlu1 %2402  ;;  %v4893_v5 = vpop.permute.xlu0 %2400  ;;  %v1936_v10 = vsel %vm4683_vm8, %v1931_v16, %v1935_v13  ;;  %v1926_v58 = vsel %vm4683_vm8, %v1921_v18, %v4866_v59  ;;  %v2454_v6 = vld [vmem:[#allocation2 + $0x8c] sm:$0x1]  ;;  %v1331_v59 = vshrl.u32 %v1165_v3, 16  ;;  %v1318_v18 = vshrl.u32 %v1164_v40, 16 }
 0x203   : > { %5521 = vst [vmem:[#allocation28_spill] sm:$0xff] %v4891_v12  ;;  %5522 = vst [vmem:[#allocation29_spill] sm:$0xff] %v4893_v5  ;;  %v2595_v5 = vshrl.u32 %v2453_v45, 16  ;;  %v4922_v45 = vrot.slane %v2591_v63, 5  ;;  %v1327_v12 = vshll.u32 %v1165_v3, 16  ;;  %v1321_v30 = vshll.u32 %v1164_v40, 16 }
 0x204   : > { %1383 = vrot.lane.b32.xlu1 %v1292_v1, %s3914_s6  ;;  %1381 = vrot.lane.b32.xlu0 %v1282_v33, %s3914_s6  ;;  %v1316_v1 = vsel %vm4683_vm8, %v1311_v7, %v1315_v47  ;;  %v1945_v47 = vrot.slane %v1944_v62, 4  ;;  %v1168_v33 = vld [vmem:[#allocation2 + $0x88] sm:$0xf]  ;;  %v2564_v7 = vor.u32 %v2563_v31, %v2560_v29  ;;  %v2579_v28 = vrot.slane %v2577_v8, 5  ;;  %v1166_v8 = vld [vmem:[#allocation2 + $0x7c] sm:$0x1] }
 0x205   : > { %v2597_v13 = vrot.slane %v2595_v5, 4  ;;  %v1351_v62 = vshll.u32 %v1168_v33, 16  ;;  %v1355_v21 = vshrl.u32 %v1168_v33, 16  ;;  %v1960_v5 = vsel %vm4683_vm8, %v1955_v37, %v1959_v23  ;;  %v1812_v40 = vld [vmem:[#allocation2 + $0x88] sm:$0xf] }
 0x206   : > { %v4905_v57 = vpop.permute.xlu1 %1633  ;;  %v4907_v19 = vpop.permute.xlu0 %1631  ;;  %v1342_v29 = vshrl.u32 %v1167_v14, 16  ;;  %v1345_v31 = vshll.u32 %v1167_v14, 16  ;;  %v1950_v63 = vsel %vm4683_vm8, %v1945_v47, %v4887_v56  ;;  %v2601_v3 = vshll.u32 %v2454_v6, 16  ;;  %v1811_v37 = vld [vmem:[#allocation2 + $0x84] sm:$0xf] }
 0x207   : > { %v4940_v17 = vrot.slane %v1327_v12, 5  ;;  %v1333_v23 = vrot.slane %v1331_v59, 4  ;;  %v1320_v14 = vrot.slane %v1318_v18, 4  ;;  %v1323_v15 = vrot.slane %v1321_v30, 5  ;;  %v1169_v47 = vld [vmem:[#allocation2 + $0x8c] sm:$0x1] }
 0x208   : > { %1387 = vrot.lane.b32.xlu1 %v1316_v1, %s3914_s6  ;;  %1385 = vrot.lane.b32.xlu0 %v1306_v20, %s3914_s6  ;;  %v2584_v1 = vrot.slane %v2582_v38, 4  ;;  %v2587_v20 = vrot.slane %v2585_v61, 5  ;;  %v2575_v38 = vrot.slane %v2574_v24, 4  ;;  %v2598_v61 = vor.u32 %v2597_v13, %v4922_v45 }
 0x209   : > { %v4942_v55 = vrot.slane %v1351_v62, 5  ;;  %v1357_v56 = vrot.slane %v1355_v21, 4  ;;  %v1344_v24 = vrot.slane %v1342_v29, 4  ;;  %v1347_v13 = vrot.slane %v1345_v31, 5 }
 0x20a   : > { %v4924_v16 = vpop.permute.xlu1 %1637  ;;  %v4926_v0 = vpop.permute.xlu0 %1635  ;;  %v2588_v51 = vor.u32 %v2587_v20, %v2584_v1  ;;  %v1971_v6 = vshll.u32 %v1812_v40, 16  ;;  %v2603_v1 = vrot.slane %v2601_v3, 5  ;;  %v1962_v12 = vshrl.u32 %v1811_v37, 16 }
 0x20b   : > { %v1965_v20 = vshll.u32 %v1811_v37, 16  ;;  %v2580_v18 = vsel %vm4683_vm8, %v2575_v38, %v2579_v28  ;;  %v2599_v62 = vrot.slane %v2598_v61, 4  ;;  %v1337_v21 = vshll.u32 %v1166_v8, 16 }
 0x20c   : > { %2027 = vrot.lane.b32.xlu1 %v1936_v10, %s3915_s29  ;;  %2025 = vrot.lane.b32.xlu0 %v1926_v58, %s3915_s29  ;;  %v2565_v58 = vrot.slane %v2564_v7, 4  ;;  %v1975_v7 = vshrl.u32 %v1812_v40, 16  ;;  %v2589_v29 = vrot.slane %v2588_v51, 4  ;;  %v1334_v31 = vor.u32 %v1333_v23, %v4940_v17  ;;  %v1814_v40 = vld [vmem:[#allocation2 + $0x94] sm:$0xf] }
 0x20d   : > { %v1361_v3 = vshll.u32 %v1169_v47, 16  ;;  %v1358_v37 = vor.u32 %v1357_v56, %v4942_v55  ;;  %v1348_v28 = vor.u32 %v1347_v13, %v1344_v24  ;;  %v4959_v38 = vrot.slane %v1971_v6, 5  ;;  %v2456_v56 = vld [vmem:[#allocation2 + $0x98] sm:$0xf] }
 0x20e   : > { %v4936_v33 = vpop.permute.xlu1 %2277  ;;  %v4938_v10 = vpop.permute.xlu0 %2275  ;;  %v2570_v30 = vsel %vm4683_vm8, %v2565_v58, %v4903_v26  ;;  %v1977_v9 = vrot.slane %v1975_v7, 4  ;;  %v1813_v26 = vld [vmem:[#allocation2 + $0x8c] sm:$0x1]  ;;  %v1964_v61 = vrot.slane %v1962_v12, 4  ;;  %v1967_v58 = vrot.slane %v1965_v20, 5 }
 0x20f   : > { %v2604_v23 = vsel %vm4683_vm8, %v2599_v62, %v2603_v1  ;;  %v1986_v47 = vshrl.u32 %v1814_v40, 16  ;;  %v2594_v24 = vsel %vm4683_vm8, %v2589_v29, %v4922_v45  ;;  %v1335_v13 = vrot.slane %v1334_v31, 4  ;;  %v2455_v12 = vld [vmem:[#allocation2 + $0x94] sm:$0xf] }
 0x210   : > { %2031 = vrot.lane.b32.xlu1 %v1960_v5, %s3915_s29  ;;  %2029 = vrot.lane.b32.xlu0 %v1950_v63, %s3915_s29  ;;  %v1815_v5 = vld [vmem:[#allocation2 + $0x98] sm:$0xf]  ;;  %v1324_v63 = vor.u32 %v1323_v15, %v1320_v14  ;;  %v1339_v14 = vrot.slane %v1337_v21, 5  ;;  %v1363_v7 = vrot.slane %v1361_v3, 5  ;;  %v1359_v20 = vrot.slane %v1358_v37, 4 }
 0x211   : > { %v1995_v8 = vshll.u32 %v1815_v5, 16  ;;  %v1999_v51 = vshrl.u32 %v1815_v5, 16  ;;  %v1978_v1 = vor.u32 %v1977_v9, %v4959_v38  ;;  %v1981_v62 = vshll.u32 %v1813_v26, 16  ;;  %v2459_v26 = vld [vmem:[#allocation2 + $0xa8] sm:$0xf] }
 0x212   : > { %v4946_v59 = vpop.permute.xlu1 %2281  ;;  %v4948_v43 = vpop.permute.xlu0 %2279  ;;  %v1325_v6 = vrot.slane %v1324_v63, 4  ;;  %v1968_v21 = vor.u32 %v1967_v58, %v1964_v61  ;;  %v2615_v53 = vshll.u32 %v2456_v56, 16  ;;  %v1988_v29 = vrot.slane %v1986_v47, 4  ;;  %v1816_v47 = vld [vmem:[#allocation2 + $0x9c] sm:$0x1] }
 0x213   : > { %v4973_v5 = vrot.slane %v1995_v8, 5  ;;  %v2619_v63 = vshrl.u32 %v2456_v56, 16  ;;  %v2606_v3 = vshrl.u32 %v2455_v12, 16  ;;  %v1340_v37 = vsel %vm4683_vm8, %v1335_v13, %v1339_v14 }
 0x214   : > { %2671 = vrot.lane.b32.xlu1 %v2580_v18, %s3916_s22  ;;  %2669 = vrot.lane.b32.xlu0 %v2570_v30, %s3916_s22  ;;  %v1989_v18 = vshll.u32 %v1814_v40, 16  ;;  %v1349_v30 = vrot.slane %v1348_v28, 4  ;;  %v2001_v40 = vrot.slane %v1999_v51, 4  ;;  %v1330_v9 = vsel %vm4683_vm8, %v1325_v6, %v4940_v17  ;;  %v2458_v51 = vld [vmem:[#allocation2 + $0xa4] sm:$0xf] }
 0x215   : > { %v2609_v28 = vshll.u32 %v2455_v12, 16  ;;  %v1364_v61 = vsel %vm4683_vm8, %v1359_v20, %v1363_v7  ;;  %v1983_v8 = vrot.slane %v1981_v62, 5  ;;  %v1969_v14 = vrot.slane %v1968_v21, 4 }
 0x216   : > { %v4961_v35 = vpop.permute.xlu1 %1641  ;;  %v4963_v15 = vpop.permute.xlu0 %1639  ;;  %v1991_v31 = vrot.slane %v1989_v18, 5  ;;  %v1354_v58 = vsel %vm4683_vm8, %v1349_v30, %v4942_v55  ;;  %v2002_v17 = vor.u32 %v2001_v40, %v4973_v5  ;;  %v2617_v18 = vrot.slane %v2615_v53, 5 }
 0x217   : > { %v2621_v6 = vrot.slane %v2619_v63, 4  ;;  %v2608_v12 = vrot.slane %v2606_v3, 4  ;;  %v2639_v7 = vshll.u32 %v2459_v26, 16  ;;  %v2611_v20 = vrot.slane %v2609_v28, 5 }
 0x218   : > { %2675 = vrot.lane.b32.xlu1 %v2604_v23, %s3916_s22  ;;  %2673 = vrot.lane.b32.xlu0 %v2594_v24, %s3916_s22  ;;  %v1979_v23 = vrot.slane %v1978_v1, 4  ;;  %v1992_v13 = vor.u32 %v1991_v31, %v1988_v29  ;;  %v2633_v55 = vshll.u32 %v2458_v51, 16  ;;  %v2005_v30 = vshll.u32 %v1816_v47, 16  ;;  %v2457_v31 = vld [vmem:[#allocation2 + $0x9c] sm:$0x1] }
 0x219   : > { %v1974_v1 = vsel %vm4683_vm8, %v1969_v14, %v4959_v38  ;;  %v2003_v40 = vrot.slane %v2002_v17, 4  ;;  %v2622_v63 = vor.u32 %v2621_v6, %v2617_v18  ;;  %v2641_v3 = vrot.slane %v2639_v7, 5  ;;  %v2460_v17 = vld [vmem:[#allocation2 + $0xac] sm:$0x1] }
 0x21a   : > { %v4975_v46 = vpop.permute.xlu1 %1645  ;;  %v4977_v45 = vpop.permute.xlu0 %1643  ;;  %v1984_v53 = vsel %vm4683_vm8, %v1979_v23, %v1983_v8  ;;  %v1993_v29 = vrot.slane %v1992_v13, 4  ;;  %v2612_v28 = vor.u32 %v2611_v20, %v2608_v12  ;;  %v2007_v8 = vrot.slane %v2005_v30, 5 }
 0x21b   : > { %v2623_v47 = vrot.slane %v2622_v63, 4 }
 0x21c   : > { %1391 = vrot.lane.b32.xlu1 %v1340_v37, %s3914_s6  ;;  %1389 = vrot.lane.b32.xlu0 %v1330_v9, %s3914_s6  ;;  %v2643_v37 = vshrl.u32 %v2459_v26, 16  ;;  %v2630_v9 = vshrl.u32 %v2458_v51, 16  ;;  %v2625_v51 = vshll.u32 %v2457_v31, 16  ;;  %v2008_v14 = vsel %vm4683_vm8, %v2003_v40, %v2007_v8 }
 0x21d   : > { %v1998_v13 = vsel %vm4683_vm8, %v1993_v29, %v4973_v5  ;;  %v2613_v6 = vrot.slane %v2612_v28, 4 }
 0x21e   : > { %v4992_v56 = vpop.permute.xlu1 %2285  ;;  %v4994_v24 = vpop.permute.xlu0 %2283  ;;  %v2645_v26 = vrot.slane %v2643_v37, 4  ;;  %v2627_v20 = vrot.slane %v2625_v51, 5  ;;  %v2649_v37 = vshll.u32 %v2460_v17, 16 }
 0x220   : > { %1395 = vrot.lane.b32.xlu1 %v1364_v61, %s3914_s6  ;;  %1393 = vrot.lane.b32.xlu0 %v1354_v58, %s3914_s6  ;;  %v2632_v61 = vrot.slane %v2630_v9, 4  ;;  %v2635_v58 = vrot.slane %v2633_v55, 5  ;;  %v2646_v12 = vor.u32 %v2645_v26, %v2641_v3  ;;  %v2628_v30 = vsel %vm4683_vm8, %v2623_v47, %v2627_v20  ;;  %v5528_v20 = vld [vmem:[#allocation21_spill] sm:$0xff]  ;;  %s5307_s6 = scalar_lea.vmem %s355_s16, %s3516_s10 [#allocation4]  ;;  %s5540_s16 = sld [smem:[#allocation10_spill]] }
 0x221   : > { %v2651_v40 = vrot.slane %v2649_v37, 5 }
 0x222   : > { %v5003_v62 = vpop.permute.xlu1 %2289  ;;  %v5005_v21 = vpop.permute.xlu0 %2287  ;;  %v2636_v7 = vor.u32 %v2635_v58, %v2632_v61  ;;  %v2647_v5 = vrot.slane %v2646_v12, 4 }
 0x224   : > { %2035 = vrot.lane.b32.xlu1 %v1984_v53, %s3915_s29  ;;  %2033 = vrot.lane.b32.xlu0 %v1974_v1, %s3915_s29  ;;  %v2618_v53 = vsel %vm4683_vm8, %v2613_v6, %v2617_v18  ;;  %v2637_v1 = vrot.slane %v2636_v7, 4  ;;  %v2652_v63 = vsel %vm4683_vm8, %v2647_v5, %v2651_v40  ;;  %v5527_v7 = vld [vmem:[#allocation20_spill] sm:$0xff]  ;;  %v5529_v40 = vld [vmem:[#allocation22_spill] sm:$0xff] }
 0x226   : > { %v5009_v38 = vpop.permute.xlu1 %1649  ;;  %v5011_v23 = vpop.permute.xlu0 %1647  ;;  %v2642_v28 = vsel %vm4683_vm8, %v2637_v1, %v2641_v3  ;;  %s3489_s10 = sshll.u32 %s5540_s16, 5 }
 0x228   : > { %2039 = vrot.lane.b32.xlu1 %v2008_v14, %s3915_s29  ;;  %2037 = vrot.lane.b32.xlu0 %v1998_v13, %s3915_s29  ;;  %s389_s29 = sand.u32 1, %s3867_s14  }
 0x229   : > { %s3364_s11 = sshll.u32 %s389_s29, 7 }
 0x22a   : > { %v5020_v9 = vpop.permute.xlu1 %1653  ;;  %v5022_v55 = vpop.permute.xlu0 %1651  ;;  %s5328_s24 = scalar_lea.vmem [#allocation7], %s3364_s11  ;;  %s5411_s11 = scalar_lea.sflag [#allocation6], %s389_s29 }
 0x22b   : > { %s3261_s30 = sshll.u32 %s5328_s24, 4  ;;  %s5398_s30 = int_to_ptr.vmem [resolvable:$true] %s3261_s30 }
 0x22c   : > { %2679 = vrot.lane.b32.xlu1 %v2628_v30, %s3916_s22  ;;  %2677 = vrot.lane.b32.xlu0 %v2618_v53, %s3916_s22  ;;  %s3783_s16 = scalar_lea.vmem %s5398_s30, 2048 }
 0x22d   : > { %p3784_p7 = scmp.ne.s32.totalorder %s5398_s30, %s3783_s16 }
 0x22e   : > { %v5030_v29 = vpop.permute.xlu1 %2293  ;;  %v5032_v31 = vpop.permute.xlu0 %2291 }
 0x22f   : > { %p3785_p8 = pnand %p3784_p7, %p4056_p12 }
 0x230   : > { %2683 = vrot.lane.b32.xlu1 %v2652_v63, %s3916_s22  ;;  %2681 = vrot.lane.b32.xlu0 %v2642_v28, %s3916_s22 }
 0x231   : > { %p3786_p9 = pneg %p3785_p8 }
 0x232   : > { %v5040_v18 = vpop.permute.xlu1 %2297  ;;  %v5042_v26 = vpop.permute.xlu0 %2295 }
 0x236   : > { %v5044_v61 = vpop.permute.xlu1 %1657  ;;  %v5046_v58 = vpop.permute.xlu0 %1655 }
 0x23a   : > { %v5048_v8 = vpop.permute.xlu1 %1661  ;;  %v5050_v51 = vpop.permute.xlu0 %1659 }
 0x23e   : > { %v5052_v14 = vpop.permute.xlu1 %2301  ;;  %v5054_v27 = vpop.permute.xlu0 %2299 }
 0x242   : > { %v5056_v3 = vpop.permute.xlu1 %2305  ;;  %v5058_v47 = vpop.permute.xlu0 %2303 }
 0x246   : > { %v1368_v17 = vpop.permute.xlu1 %1367  ;;  %v1366_v13 = vpop.permute.xlu0 %1365 }
 0x247   : > { %1415 = vst.msk [vmem:[#allocation3 + $0x4] sm:$0xf] %vm1413_vm10, %v1368_v17  ;;  %1414 = vst.msk [vmem:[#allocation3] sm:$0xf] %vm1413_vm10, %v1366_v13 }
 0x248   : > { %1681 = vst.msk [vmem:[#allocation3 + $0x4] sm:$0xf] %vm1679_vm11, %v4905_v57  ;;  %1680 = vst.msk [vmem:[#allocation3] sm:$0xf] %vm1679_vm11, %v4907_v19 }
 0x249   : > { %1778 = vst.msk [vmem:[#allocation3 + $0x4] sm:$0xf] %vm1776_vm12, %v4528_v32  ;;  %1777 = vst.msk [vmem:[#allocation3] sm:$0xf] %vm1776_vm12, %v4530_v36 }
 0x24a   : > { %v1372_v6 = vpop.permute.xlu1 %1371  ;;  %v1370_v12 = vpop.permute.xlu0 %1369 }
 0x24b   : > { %1417 = vst.msk [vmem:[#allocation3 + $0xc] sm:$0xf] %vm1413_vm10, %v1372_v6  ;;  %1416 = vst.msk [vmem:[#allocation3 + $0x8] sm:$0xf] %vm1413_vm10, %v1370_v12 }
 0x24c   : > { %1683 = vst.msk [vmem:[#allocation3 + $0xc] sm:$0xf] %vm1679_vm11, %v4924_v16  ;;  %1682 = vst.msk [vmem:[#allocation3 + $0x8] sm:$0xf] %vm1679_vm11, %v4926_v0 }
 0x24d   : > { %1779 = vst.msk [vmem:[#allocation3 + $0x8] sm:$0xf] %vm1776_vm12, %v4551_v60  ;;  %1780 = vst.msk [vmem:[#allocation3 + $0xc] sm:$0xf] %vm1776_vm12, %v4549_v48 }
 0x24e   : > { %v2012_v32 = vpop.permute.xlu1 %2011  ;;  %v2010_v36 = vpop.permute.xlu0 %2009 }
 0x24f   : > { %2059 = vst.msk [vmem:[#allocation3 + $0x4] sm:$0xf] %vm2057_vm13, %v2012_v32  ;;  %2058 = vst.msk [vmem:[#allocation3] sm:$0xf] %vm2057_vm13, %v2010_v36 }
 0x250   : > { %2325 = vst.msk [vmem:[#allocation3 + $0x4] sm:$0xf] %vm2323_vm14, %v4936_v33  ;;  %2324 = vst.msk [vmem:[#allocation3] sm:$0xf] %vm2323_vm14, %v4938_v10 }
 0x251   : > { %2422 = vst.msk [vmem:[#allocation3 + $0x4] sm:$0xf] %vm2420_vm15, %v4582_v54  ;;  %2421 = vst.msk [vmem:[#allocation3] sm:$0xf] %vm2420_vm15, %v4584_v34 }
 0x252   : > { %v2016_v48 = vpop.permute.xlu1 %2015  ;;  %v2014_v60 = vpop.permute.xlu0 %2013 }
 0x253   : > { %2061 = vst.msk [vmem:[#allocation3 + $0xc] sm:$0xf] %vm2057_vm13, %v2016_v48  ;;  %2060 = vst.msk [vmem:[#allocation3 + $0x8] sm:$0xf] %vm2057_vm13, %v2014_v60  ;;  %v3006_v48 = vld [vmem:[%s5479_s7] sm:$0xf] }
 0x254   : > { %2327 = vst.msk [vmem:[#allocation3 + $0xc] sm:$0xf] %vm2323_vm14, %v4946_v59  ;;  %2326 = vst.msk [vmem:[#allocation3 + $0x8] sm:$0xf] %vm2323_vm14, %v4948_v43  ;;  %3625 = vmatprep.subr.msk.bf16.mxu0 %vm2835_vm9, %v3006_v48  ;;  %v3033_v60 = vsel %vm2835_vm9, %v3006_v48, 0 }
 0x255   : > { %2423 = vst.msk [vmem:[#allocation3 + $0x8] sm:$0xf] %vm2420_vm15, %v4604_v42  ;;  %2424 = vst.msk [vmem:[#allocation3 + $0xc] sm:$0xf] %vm2420_vm15, %v4602_v41  ;;  %3603 = vmatpush3.bf16.msra.mxu0 %v3033_v60 }
 0x256   : > { %v2656_v54 = vpop.permute.xlu1 %2655  ;;  %v2654_v34 = vpop.permute.xlu0 %2653 }
 0x257   : > { %2703 = vst.msk [vmem:[#allocation3 + $0x4] sm:$0xf] %vm2701_vm1, %v2656_v54  ;;  %2702 = vst.msk [vmem:[#allocation3] sm:$0xf] %vm2701_vm1, %v2654_v34  ;;  %v5252_v34 = vld [vmem:[%s5477_s5] ss:$0 sm:$0xff] }
 0x25a   : > { %v2660_v57 = vpop.permute.xlu1 %2659  ;;  %v2658_v19 = vpop.permute.xlu0 %2657 }
 0x25b   : > { %2705 = vst.msk [vmem:[#allocation3 + $0xc] sm:$0xf] %vm2701_vm1, %v2660_v57  ;;  %2704 = vst.msk [vmem:[#allocation3 + $0x8] sm:$0xf] %vm2701_vm1, %v2658_v19 }
 0x25e   : > { %v1376_v43 = vpop.permute.xlu1 %1375  ;;  %v1374_v16 = vpop.permute.xlu0 %1373  ;;  %v3747_v0 = vld [vmem:[#allocation3] sm:$0xff]  }
 0x25f   : > { %1419 = vst.msk [vmem:[#allocation3 + $0x14] sm:$0xf] %vm1413_vm10, %v1376_v43  ;;  %1418 = vst.msk [vmem:[#allocation3 + $0x10] sm:$0xf] %vm1413_vm10, %v1374_v16  ;;  %3586 = vmatprep.mubr.msk.bf16.mxu1 %vm2810_vm2, %v3747_v0  ;;  %v5259_v0 = vld [vmem:[%s5537_s27] ss:$0 sm:$0xff] }
 0x260   : > { %1685 = vst.msk [vmem:[#allocation3 + $0x14] sm:$0xf] %vm1679_vm11, %v4961_v35  ;;  %1684 = vst.msk [vmem:[#allocation3 + $0x10] sm:$0xf] %vm1679_vm11, %v4963_v15  ;;  %s3517_s27 = sshll.u32 %s3887_s19, 4 }
 0x261   : > { %1782 = vst.msk [vmem:[#allocation3 + $0x14] sm:$0xf] %vm1776_vm12, %v4647_v49  ;;  %1781 = vst.msk [vmem:[#allocation3 + $0x10] sm:$0xf] %vm1776_vm12, %v4649_v50  ;;  %s3258_s12 = sadd.s32 %s3517_s27, %s3489_s10  ;;  %s3917_s27 = smov [#allocation7]  }
 0x262   : > { %v1380_v41 = vpop.permute.xlu1 %1379  ;;  %v1378_v42 = vpop.permute.xlu0 %1377  ;;  %v3748_v33 = vld [vmem:[#allocation3 + $0x8] sm:$0xff]   ;;  %s3787_s10 = sshll.u32 %s3917_s27, 4  ;;  %s3788_s10 = int_to_ptr.vmem [resolvable:$false] %s3787_s10 }
 0x263   : > { %1421 = vst.msk [vmem:[#allocation3 + $0x1c] sm:$0xf] %vm1413_vm10, %v1380_v41  ;;  %1420 = vst.msk [vmem:[#allocation3 + $0x18] sm:$0xf] %vm1413_vm10, %v1378_v42  ;;  %3587 = vmatmul.mubr.msk.bf16.vlgmr.msra.gmra.mxu1 %vm2810_vm2, %v3748_v33  ;;  %p3790_p10 = scmp.lt.s32.totalorder %s5398_s30, %s3788_s10 }
 0x264   : > { %1687 = vst.msk [vmem:[#allocation3 + $0x1c] sm:$0xf] %vm1679_vm11, %v4975_v46  ;;  %1686 = vst.msk [vmem:[#allocation3 + $0x18] sm:$0xf] %vm1679_vm11, %v4977_v45 }
 0x265   : > { %1784 = vst.msk [vmem:[#allocation3 + $0x1c] sm:$0xf] %vm1776_vm12, %v4668_v4  ;;  %1783 = vst.msk [vmem:[#allocation3 + $0x18] sm:$0xf] %vm1776_vm12, %v4670_v2 }
 0x266   : > { %v2020_v49 = vpop.permute.xlu1 %2019  ;;  %v2018_v50 = vpop.permute.xlu0 %2017 }
 0x267   : > { %2063 = vst.msk [vmem:[#allocation3 + $0x14] sm:$0xf] %vm2057_vm13, %v2020_v49  ;;  %2062 = vst.msk [vmem:[#allocation3 + $0x10] sm:$0xf] %vm2057_vm13, %v2018_v50 }
 0x268   : > { %2329 = vst.msk [vmem:[#allocation3 + $0x14] sm:$0xf] %vm2323_vm14, %v4992_v56  ;;  %2328 = vst.msk [vmem:[#allocation3 + $0x10] sm:$0xf] %vm2323_vm14, %v4994_v24  ;;  %v5523_v56 = vld [vmem:[#allocation16_spill] sm:$0xff] }
 0x269   : > { %2426 = vst.msk [vmem:[#allocation3 + $0x14] sm:$0xf] %vm2420_vm15, %v4677_v25  ;;  %2425 = vst.msk [vmem:[#allocation3 + $0x10] sm:$0xf] %vm2420_vm15, %v4679_v22 }
 0x26a   : > { %v2024_v4 = vpop.permute.xlu1 %2023  ;;  %v2022_v2 = vpop.permute.xlu0 %2021 }
 0x26b   : > { %2065 = vst.msk [vmem:[#allocation3 + $0x1c] sm:$0xf] %vm2057_vm13, %v2024_v4  ;;  %2064 = vst.msk [vmem:[#allocation3 + $0x18] sm:$0xf] %vm2057_vm13, %v2022_v2 }
 0x26c   : > { %2331 = vst.msk [vmem:[#allocation3 + $0x1c] sm:$0xf] %vm2323_vm14, %v5003_v62  ;;  %2330 = vst.msk [vmem:[#allocation3 + $0x18] sm:$0xf] %vm2323_vm14, %v5005_v21  ;;  %v5525_v62 = vld [vmem:[#allocation18_spill] sm:$0xff]  ;;  %v5526_v21 = vld [vmem:[#allocation19_spill] sm:$0xff] }
 0x26d   : > { %2428 = vst.msk [vmem:[#allocation3 + $0x1c] sm:$0xf] %vm2420_vm15, %v4694_v52  ;;  %2427 = vst.msk [vmem:[#allocation3 + $0x18] sm:$0xf] %vm2420_vm15, %v4696_v44 }
 0x26e   : > { %v2664_v25 = vpop.permute.xlu1 %2663  ;;  %v2662_v22 = vpop.permute.xlu0 %2661 }
 0x26f   : > { %2707 = vst.msk [vmem:[#allocation3 + $0x14] sm:$0xf] %vm2701_vm1, %v2664_v25  ;;  %2706 = vst.msk [vmem:[#allocation3 + $0x10] sm:$0xf] %vm2701_vm1, %v2662_v22 }
 0x272   : > { %v2668_v46 = vpop.permute.xlu1 %2667  ;;  %v2666_v35 = vpop.permute.xlu0 %2665 }
 0x273   : > { %2709 = vst.msk [vmem:[#allocation3 + $0x1c] sm:$0xf] %vm2701_vm1, %v2668_v46  ;;  %2708 = vst.msk [vmem:[#allocation3 + $0x18] sm:$0xf] %vm2701_vm1, %v2666_v35 }
 0x276   : > { %v1384_v10 = vpop.permute.xlu1 %1383  ;;  %v1382_v59 = vpop.permute.xlu0 %1381  ;;  %v3749_v15 = vld [vmem:[#allocation3 + $0x10] sm:$0xff]  }
 0x277   : > { %1423 = vst.msk [vmem:[#allocation3 + $0x24] sm:$0xf] %vm1413_vm10, %v1384_v10  ;;  %1422 = vst.msk [vmem:[#allocation3 + $0x20] sm:$0xf] %vm1413_vm10, %v1382_v59  ;;  %3590 = vmatprep.mubr.msk.bf16.mxu1 %vm2810_vm2, %v3749_v15 }
 0x278   : > { %1689 = vst.msk [vmem:[#allocation3 + $0x24] sm:$0xf] %vm1679_vm11, %v5009_v38  ;;  %1688 = vst.msk [vmem:[#allocation3 + $0x20] sm:$0xf] %vm1679_vm11, %v5011_v23 }
 0x279   : > { %1786 = vst.msk [vmem:[#allocation3 + $0x24] sm:$0xf] %vm1776_vm12, %v4746_v39  ;;  %1785 = vst.msk [vmem:[#allocation3 + $0x20] sm:$0xf] %vm1776_vm12, %v4748_v11  ;;  %v5524_v39 = vld [vmem:[#allocation17_spill] sm:$0xff] }
 0x27a   : > { %v1388_v52 = vpop.permute.xlu1 %1387  ;;  %v1386_v44 = vpop.permute.xlu0 %1385  ;;  %v3750_v45 = vld [vmem:[#allocation3 + $0x18] sm:$0xff]  }
 0x27b   : > { %1425 = vst.msk [vmem:[#allocation3 + $0x2c] sm:$0xf] %vm1413_vm10, %v1388_v52  ;;  %1424 = vst.msk [vmem:[#allocation3 + $0x28] sm:$0xf] %vm1413_vm10, %v1386_v44  ;;  %3591 = vmatmul.mubr.msk.bf16.gmra.mxu1 %vm2810_vm2, %v3750_v45 }
 0x27c   : > { %1691 = vst.msk [vmem:[#allocation3 + $0x2c] sm:$0xf] %vm1679_vm11, %v5020_v9  ;;  %1690 = vst.msk [vmem:[#allocation3 + $0x28] sm:$0xf] %vm1679_vm11, %v5022_v55 }
 0x27d   : > { %1788 = vst.msk [vmem:[#allocation3 + $0x2c] sm:$0xf] %vm1776_vm12, %v5523_v56  ;;  %1787 = vst.msk [vmem:[#allocation3 + $0x28] sm:$0xf] %vm1776_vm12, %v5524_v39 }
 0x27e   : > { %v2028_v11 = vpop.permute.xlu1 %2027  ;;  %v2026_v24 = vpop.permute.xlu0 %2025 }
 0x27f   : > { %2067 = vst.msk [vmem:[#allocation3 + $0x24] sm:$0xf] %vm2057_vm13, %v2028_v11  ;;  %2066 = vst.msk [vmem:[#allocation3 + $0x20] sm:$0xf] %vm2057_vm13, %v2026_v24 }
 0x280   : > { %2333 = vst.msk [vmem:[#allocation3 + $0x24] sm:$0xf] %vm2323_vm14, %v5030_v29  ;;  %2332 = vst.msk [vmem:[#allocation3 + $0x20] sm:$0xf] %vm2323_vm14, %v5032_v31  ;;  %v5530_v29 = vld [vmem:[#allocation23_spill] sm:$0xff] }
 0x281   : > { %2430 = vst.msk [vmem:[#allocation3 + $0x24] sm:$0xf] %vm2420_vm15, %v5525_v62  ;;  %2429 = vst.msk [vmem:[#allocation3 + $0x20] sm:$0xf] %vm2420_vm15, %v5526_v21 }
 0x282   : > { %v2032_v38 = vpop.permute.xlu1 %2031  ;;  %v2030_v23 = vpop.permute.xlu0 %2029 }
 0x283   : > { %2069 = vst.msk [vmem:[#allocation3 + $0x2c] sm:$0xf] %vm2057_vm13, %v2032_v38  ;;  %2068 = vst.msk [vmem:[#allocation3 + $0x28] sm:$0xf] %vm2057_vm13, %v2030_v23 }
 0x284   : > { %2335 = vst.msk [vmem:[#allocation3 + $0x2c] sm:$0xf] %vm2323_vm14, %v5040_v18  ;;  %2334 = vst.msk [vmem:[#allocation3 + $0x28] sm:$0xf] %vm2323_vm14, %v5042_v26  ;;  %v5531_v18 = vld [vmem:[#allocation24_spill] sm:$0xff]  ;;  %v5532_v26 = vld [vmem:[#allocation25_spill] sm:$0xff] }
 0x285   : > { %2432 = vst.msk [vmem:[#allocation3 + $0x2c] sm:$0xf] %vm2420_vm15, %v5527_v7  ;;  %2431 = vst.msk [vmem:[#allocation3 + $0x28] sm:$0xf] %vm2420_vm15, %v5528_v20 }
 0x286   : > { %v2672_v37 = vpop.permute.xlu1 %2671  ;;  %v2670_v9 = vpop.permute.xlu0 %2669 }
 0x287   : > { %2711 = vst.msk [vmem:[#allocation3 + $0x24] sm:$0xf] %vm2701_vm1, %v2672_v37  ;;  %2710 = vst.msk [vmem:[#allocation3 + $0x20] sm:$0xf] %vm2701_vm1, %v2670_v9 }
 0x28a   : > { %v2676_v55 = vpop.permute.xlu1 %2675  ;;  %v2674_v30 = vpop.permute.xlu0 %2673 }
 0x28b   : > { %2713 = vst.msk [vmem:[#allocation3 + $0x2c] sm:$0xf] %vm2701_vm1, %v2676_v55  ;;  %2712 = vst.msk [vmem:[#allocation3 + $0x28] sm:$0xf] %vm2701_vm1, %v2674_v30 }
 0x28e   : > { %v1392_v53 = vpop.permute.xlu1 %1391  ;;  %v1390_v5 = vpop.permute.xlu0 %1389  ;;  %v3751_v1 = vld [vmem:[#allocation3 + $0x20] sm:$0xff]  }
 0x28f   : > { %1427 = vst.msk [vmem:[#allocation3 + $0x34] sm:$0xf] %vm1413_vm10, %v1392_v53  ;;  %1426 = vst.msk [vmem:[#allocation3 + $0x30] sm:$0xf] %vm1413_vm10, %v1390_v5  ;;  %3594 = vmatprep.mubr.msk.bf16.mxu1 %vm2810_vm2, %v3751_v1 }
 0x290   : > { %1693 = vst.msk [vmem:[#allocation3 + $0x34] sm:$0xf] %vm1679_vm11, %v5044_v61  ;;  %1692 = vst.msk [vmem:[#allocation3 + $0x30] sm:$0xf] %vm1679_vm11, %v5046_v58 }
 0x291   : > { %1790 = vst.msk [vmem:[#allocation3 + $0x34] sm:$0xf] %vm1776_vm12, %v5529_v40  ;;  %1789 = vst.msk [vmem:[#allocation3 + $0x30] sm:$0xf] %vm1776_vm12, %v5530_v29 }
 0x292   : > { %v1396_v31 = vpop.permute.xlu1 %1395  ;;  %v1394_v63 = vpop.permute.xlu0 %1393  ;;  %v3752_v28 = vld [vmem:[#allocation3 + $0x28] sm:$0xff]  }
 0x293   : > { %1429 = vst.msk [vmem:[#allocation3 + $0x3c] sm:$0xf] %vm1413_vm10, %v1396_v31  ;;  %1428 = vst.msk [vmem:[#allocation3 + $0x38] sm:$0xf] %vm1413_vm10, %v1394_v63  ;;  %3595 = vmatmul.mubr.msk.bf16.gmra.mxu1 %vm2810_vm2, %v3752_v28 }
 0x294   : > { %1695 = vst.msk [vmem:[#allocation3 + $0x3c] sm:$0xf] %vm1679_vm11, %v5048_v8  ;;  %1694 = vst.msk [vmem:[#allocation3 + $0x38] sm:$0xf] %vm1679_vm11, %v5050_v51  ;;  %v5533_v8 = vld [vmem:[#allocation26_spill] sm:$0xff]  ;;  %v5534_v51 = vld [vmem:[#allocation27_spill] sm:$0xff] }
 0x295   : > { %1792 = vst.msk [vmem:[#allocation3 + $0x3c] sm:$0xf] %vm1776_vm12, %v5531_v18  ;;  %1791 = vst.msk [vmem:[#allocation3 + $0x38] sm:$0xf] %vm1776_vm12, %v5532_v26 }
 0x296   : > { %v2036_v61 = vpop.permute.xlu1 %2035  ;;  %v2034_v58 = vpop.permute.xlu0 %2033 }
 0x297   : > { %2071 = vst.msk [vmem:[#allocation3 + $0x34] sm:$0xf] %vm2057_vm13, %v2036_v61  ;;  %2070 = vst.msk [vmem:[#allocation3 + $0x30] sm:$0xf] %vm2057_vm13, %v2034_v58 }
 0x298   : > { %2337 = vst.msk [vmem:[#allocation3 + $0x34] sm:$0xf] %vm2323_vm14, %v5052_v14  ;;  %2336 = vst.msk [vmem:[#allocation3 + $0x30] sm:$0xf] %vm2323_vm14, %v5054_v27  ;;  %v5535_v14 = vld [vmem:[#allocation28_spill] sm:$0xff]  ;;  %v5536_v27 = vld [vmem:[#allocation29_spill] sm:$0xff] }
 0x299   : > { %2434 = vst.msk [vmem:[#allocation3 + $0x34] sm:$0xf] %vm2420_vm15, %v5533_v8  ;;  %2433 = vst.msk [vmem:[#allocation3 + $0x30] sm:$0xf] %vm2420_vm15, %v5534_v51 }
 0x29a   : > { %v2040_v17 = vpop.permute.xlu1 %2039  ;;  %v2038_v13 = vpop.permute.xlu0 %2037 }
 0x29b   : > { %2073 = vst.msk [vmem:[#allocation3 + $0x3c] sm:$0xf] %vm2057_vm13, %v2040_v17  ;;  %2072 = vst.msk [vmem:[#allocation3 + $0x38] sm:$0xf] %vm2057_vm13, %v2038_v13 }
 0x29c   : > { %2339 = vst.msk [vmem:[#allocation3 + $0x3c] sm:$0xf] %vm2323_vm14, %v5056_v3  ;;  %2338 = vst.msk [vmem:[#allocation3 + $0x38] sm:$0xf] %vm2323_vm14, %v5058_v47 }
 0x29d   : > { %2436 = vst.msk [vmem:[#allocation3 + $0x3c] sm:$0xf] %vm2420_vm15, %v5535_v14  ;;  %2435 = vst.msk [vmem:[#allocation3 + $0x38] sm:$0xf] %vm2420_vm15, %v5536_v27 }
 0x29e   : > { %v2680_v6 = vpop.permute.xlu1 %2679  ;;  %v2678_v12 = vpop.permute.xlu0 %2677 }
 0x29f   : > { %2715 = vst.msk [vmem:[#allocation3 + $0x34] sm:$0xf] %vm2701_vm1, %v2680_v6  ;;  %2714 = vst.msk [vmem:[#allocation3 + $0x30] sm:$0xf] %vm2701_vm1, %v2678_v12 }
 0x2a2   : > { %v2684_v32 = vpop.permute.xlu1 %2683  ;;  %v2682_v36 = vpop.permute.xlu0 %2681 }
 0x2a3   : > { %2717 = vst.msk [vmem:[#allocation3 + $0x3c] sm:$0xf] %vm2701_vm1, %v2684_v32  ;;  %2716 = vst.msk [vmem:[#allocation3 + $0x38] sm:$0xf] %vm2701_vm1, %v2682_v36 }
 0x2a6   : > { %v3753_v3 = vld [vmem:[#allocation3 + $0x30] sm:$0xff]  }
 0x2a7   : > { %3598 = vmatprep.mubr.msk.bf16.mxu1 %vm2810_vm2, %v3753_v3 }
 0x2aa   : > { %v3754_v47 = vld [vmem:[#allocation3 + $0x38] sm:$0xff]  }
 0x2ab   : > { %3599 = vmatmul.mubr.msk.bf16.gmra.mxu1 %vm2810_vm2, %v3754_v47 }
 0x323   : > { %v3588_v54 = vpop.f32.mrf.mxu1 }
 0x324   : > { %v2945_v43 = vmul.f32 %v3588_v54, %v5252_v34 }
 0x325   : > { %v2873_v57 = vpop.f32.mrf.mxu1 }
 0x326   : > { %v2943_v19 = vmul.f32 %v5252_v34, %v2873_v57  ;;  %v2968_v4 = vadd.f32 %v5259_v0, %v2945_v43 }
 0x327   : > { %v3589_v16 = vpop.f32.mrf.mxu1 }
 0x328   : > { %v2946_v41 = vmul.f32 %v3589_v16, %v5252_v34  ;;  %v2966_v33 = vadd.f32 %v5259_v0, %v2943_v19  ;;  %v2984_v35 = vmax.f32 %v2968_v4, 0.0  ;;  %v5313_v4 = vld [vmem:[%s5539_s28] ss:$0 sm:$0xff] }
 0x329   : > { %v2876_v42 = vpop.f32.mrf.mxu1 }
 0x32a   : > { %v2969_v49 = vadd.f32 %v5259_v0, %v2946_v41  ;;  %v2944_v50 = vmul.f32 %v5252_v34, %v2876_v42  ;;  %v2982_v22 = vmax.f32 %v2966_v33, 0.0 }
 0x32c   : > { %v2967_v2 = vadd.f32 %v5259_v0, %v2944_v50  ;;  %v2985_v25 = vmax.f32 %v2969_v49, 0.0 }
 0x32e   : > { %v2983_v46 = vmax.f32 %v2967_v2, 0.0  ;;  %v2999_v59 = vpack.c.bf16 %v2985_v25, %v2984_v35  ;;  %v3182_v25 = vld [vmem:[%s5307_s6 + $0x10] sm:$0xff] }
 0x330   : > { %v2998_v10 = vpack.c.bf16 %v2983_v46, %v2982_v22 }
 0x332   : > { %3604 = vmatprep.mubr.msk.bf16.mxu0 %vm3007_vm3, %v2998_v10  ;;  %v3180_v10 = vld [vmem:[%s5307_s6] sm:$0xff] }
 0x333   : > { %3605 = vmatmul.mubr.msk.bf16.vlgmr.msra.gmra.mxu0 %vm3007_vm3, %v2999_v59 }
 0x33b   : > { %v3592_v15 = vpop.f32.mrf.mxu1 }
 0x33c   : > { %v2949_v45 = vmul.f32 %v3592_v15, %v5252_v34 }
 0x33d   : > { %v2889_v52 = vpop.f32.mrf.mxu1 }
 0x33e   : > { %v2947_v44 = vmul.f32 %v5252_v34, %v2889_v52  ;;  %v2972_v38 = vadd.f32 %v5259_v0, %v2949_v45  ;;  %v3183_v45 = vld [vmem:[%s5307_s6 + $0x18] sm:$0xff] }
 0x33f   : > { %v3593_v56 = vpop.f32.mrf.mxu1 }
 0x340   : > { %v2950_v39 = vmul.f32 %v3593_v56, %v5252_v34  ;;  %v2970_v24 = vadd.f32 %v5259_v0, %v2947_v44  ;;  %v2988_v9 = vmax.f32 %v2972_v38, 0.0 }
 0x341   : > { %v2892_v11 = vpop.f32.mrf.mxu1 }
 0x342   : > { %v2973_v62 = vadd.f32 %v5259_v0, %v2950_v39  ;;  %v2948_v21 = vmul.f32 %v5252_v34, %v2892_v11  ;;  %v2986_v20 = vmax.f32 %v2970_v24, 0.0 }
 0x344   : > { %v2971_v23 = vadd.f32 %v5259_v0, %v2948_v21  ;;  %v2989_v7 = vmax.f32 %v2973_v62, 0.0  ;;  %v3181_v21 = vld [vmem:[%s5307_s6 + $0x8] sm:$0xff] }
 0x346   : > { %v2987_v37 = vmax.f32 %v2971_v23, 0.0  ;;  %v3001_v30 = vpack.c.bf16 %v2989_v7, %v2988_v9 }
 0x348   : > { %v3000_v55 = vpack.c.bf16 %v2987_v37, %v2986_v20 }
 0x34a   : > { %3608 = vmatprep.mubr.msk.bf16.mxu0 %vm3007_vm3, %v3000_v55 }
 0x34b   : > { %3609 = vmatmul.mubr.msk.bf16.gmra.mxu0 %vm3007_vm3, %v3001_v30 }
 0x353   : > { %v3596_v53 = vpop.f32.mrf.mxu1 }
 0x354   : > { %v2953_v40 = vmul.f32 %v3596_v53, %v5252_v34  ;;  %v3186_v53 = vld [vmem:[%s5307_s6 + $0x30] sm:$0xff] }
 0x355   : > { %v2905_v5 = vpop.f32.mrf.mxu1 }
 0x356   : > { %v2951_v1 = vmul.f32 %v5252_v34, %v2905_v5  ;;  %v2976_v61 = vadd.f32 %v5259_v0, %v2953_v40 }
 0x357   : > { %v3597_v29 = vpop.f32.mrf.mxu1 }
 0x358   : > { %v2954_v31 = vmul.f32 %v3597_v29, %v5252_v34  ;;  %v2974_v28 = vadd.f32 %v5259_v0, %v2951_v1  ;;  %v2992_v13 = vmax.f32 %v2976_v61, 0.0  ;;  %v3184_v29 = vld [vmem:[%s5307_s6 + $0x20] sm:$0xff] }
 0x359   : > { %v2908_v63 = vpop.f32.mrf.mxu1 }
 0x35a   : > { %v2977_v18 = vadd.f32 %v5259_v0, %v2954_v31  ;;  %v2952_v26 = vmul.f32 %v5252_v34, %v2908_v63  ;;  %v2990_v51 = vmax.f32 %v2974_v28, 0.0 }
 0x35c   : > { %v2975_v58 = vadd.f32 %v5259_v0, %v2952_v26  ;;  %v2993_v8 = vmax.f32 %v2977_v18, 0.0  ;;  %v3187_v26 = vld [vmem:[%s5307_s6 + $0x38] sm:$0xff] }
 0x35e   : > { %v2991_v17 = vmax.f32 %v2975_v58, 0.0  ;;  %v3003_v27 = vpack.c.bf16 %v2993_v8, %v2992_v13  ;;  %v3185_v13 = vld [vmem:[%s5307_s6 + $0x28] sm:$0xff] }
 0x360   : > { %v3002_v14 = vpack.c.bf16 %v2991_v17, %v2990_v51 }
 0x362   : > { %3612 = vmatprep.mubr.msk.bf16.mxu0 %vm3007_vm3, %v3002_v14 }
 0x363   : > { %3613 = vmatmul.mubr.msk.bf16.gmra.mxu0 %vm3007_vm3, %v3003_v27 }
 0x36b   : > { %v3600_v6 = vpop.f32.mrf.mxu1 }
 0x36c   : > { %v2957_v36 = vmul.f32 %v3600_v6, %v5252_v34 }
 0x36d   : > { %v2921_v12 = vpop.f32.mrf.mxu1 }
 0x36e   : > { %v2955_v32 = vmul.f32 %v5252_v34, %v2921_v12  ;;  %v2980_v19 = vadd.f32 %v5259_v0, %v2957_v36 }
 0x36f   : > { %v3601_v3 = vpop.f32.mrf.mxu1 }
 0x370   : > { %v2958_v47 = vmul.f32 %v3601_v3, %v5252_v34  ;;  %v2978_v60 = vadd.f32 %v5259_v0, %v2955_v32  ;;  %v2996_v33 = vmax.f32 %v2980_v19, 0.0  ;;  %v3188_v19 = vld [vmem:[%s5307_s6 + $0x40] sm:$0xff] }
 0x371   : > { %v2924_v48 = vpop.f32.mrf.mxu1 }
 0x372   : > { %v2981_v54 = vadd.f32 %v5259_v0, %v2958_v47  ;;  %v2956_v57 = vmul.f32 %v5252_v34, %v2924_v48  ;;  %v2994_v41 = vmax.f32 %v2978_v60, 0.0  ;;  %v5303_v34 = vld [vmem:[%s5538_s8] ss:$0 sm:$0xff]  ;;  %v3190_v48 = vld [vmem:[%s5307_s6 + $0x50] sm:$0xff]  ;;  %s3490_s8 = sshll.u32 %s3258_s12, 7  ;;  %s3789_s12 = scalar_lea.vmem %s3788_s10, 4096 }
 0x373   : > { %s5405_s28 = scalar_lea.hbm %s5542_s26, %s3490_s8  ;;  %p3791_p11 = scmp.lt.s32.totalorder %s3789_s12, %s3783_s16 }
 0x374   : > { %v2979_v43 = vadd.f32 %v5259_v0, %v2956_v57  ;;  %v2997_v16 = vmax.f32 %v2981_v54, 0.0 }
 0x375   : > { %p3792_p13 = por %p3791_p11, %p3790_p10 }
 0x376   : > { %v2995_v42 = vmax.f32 %v2979_v43, 0.0  ;;  %v3005_v50 = vpack.c.bf16 %v2997_v16, %v2996_v33  ;;  %v3191_v33 = vld [vmem:[%s5307_s6 + $0x58] sm:$0xff] }
 0x377   : > { %p3793_p0 = pnand %p3792_p13, %p3786_p9 }
 0x378   : > { %v3004_v49 = vpack.c.bf16 %v2995_v42, %v2994_v41 }
 0x37a   : > { %3616 = vmatprep.mubr.msk.bf16.mxu0 %vm3007_vm3, %v3004_v49 }
 0x37b   : > { %3617 = vmatmul.mubr.msk.bf16.gmra.mxu0 %vm3007_vm3, %v3005_v50 }
 0x3f3   : > { %v3606_v0 = vpop.f32.mrf.mxu0 }
 0x3f4   : > { %v3141_v2 = vmul.f32 %v3606_v0, %v5303_v34 }
 0x3f5   : > { %v3069_v22 = vpop.f32.mrf.mxu0 }
 0x3f6   : > { %v3164_v46 = vadd.f32 %v5313_v4, %v3141_v2  ;;  %v3139_v35 = vmul.f32 %v5303_v34, %v3069_v22  ;;  %v3189_v22 = vld [vmem:[%s5307_s6 + $0x48] sm:$0xff] }
 0x3f7   : > { %v3607_v59 = vpop.f32.mrf.mxu0 }
 0x3f8   : > { %v3198_v15 = vadd.f32 %v3182_v25, %v3164_v46  ;;  %v3162_v52 = vadd.f32 %v5313_v4, %v3139_v35  ;;  %v3142_v44 = vmul.f32 %v3607_v59, %v5303_v34 }
 0x3f9   : > { %v3072_v56 = vpop.f32.mrf.mxu0 }
 0x3fa   : > { %v3214_v39 = vmax.f32 %v3198_v15, 0.0  ;;  %v3196_v11 = vadd.f32 %v3180_v10, %v3162_v52  ;;  %v3165_v24 = vadd.f32 %v5313_v4, %v3142_v44  ;;  %v3140_v62 = vmul.f32 %v5303_v34, %v3072_v56  ;;  %v3194_v56 = vld [vmem:[%s5307_s6 + $0x70] sm:$0xff] }
 0x3fc   : > { %3230 = vst.msk [vmem:[%s5328_s24 + $0x10] sm:$0xff] %vm492_vm0, %v3214_v39  ;;  %v3212_v38 = vmax.f32 %v3196_v11, 0.0  ;;  %v3199_v23 = vadd.f32 %v3183_v45, %v3165_v24  ;;  %v3163_v7 = vadd.f32 %v5313_v4, %v3140_v62  ;;  %v3192_v62 = vld [vmem:[%s5307_s6 + $0x60] sm:$0xff] }
 0x3fe   : > { %3228 = vst.msk [vmem:[%s5328_s24] sm:$0xff] %vm492_vm0, %v3212_v38  ;;  %v3215_v20 = vmax.f32 %v3199_v23, 0.0  ;;  %v3197_v37 = vadd.f32 %v3181_v21, %v3163_v7 }
 0x400   : > { %3231 = vst.msk [vmem:[%s5328_s24 + $0x18] sm:$0xff] %vm492_vm0, %v3215_v20  ;;  %v3213_v9 = vmax.f32 %v3197_v37, 0.0  ;;  %v3195_v20 = vld [vmem:[%s5307_s6 + $0x78] sm:$0xff] }
 0x402   : > { %3229 = vst.msk [vmem:[%s5328_s24 + $0x8] sm:$0xff] %vm492_vm0, %v3213_v9 }
 0x40b   : > { %v3610_v55 = vpop.f32.mrf.mxu0 }
 0x40c   : > { %v3145_v30 = vmul.f32 %v3610_v55, %v5303_v34 }
 0x40d   : > { %v3085_v5 = vpop.f32.mrf.mxu0 }
 0x40e   : > { %v3168_v1 = vadd.f32 %v5313_v4, %v3145_v30  ;;  %v3143_v40 = vmul.f32 %v5303_v34, %v3085_v5  ;;  %v3193_v5 = vld [vmem:[%s5307_s6 + $0x68] sm:$0xff] }
 0x40f   : > { %v3611_v31 = vpop.f32.mrf.mxu0 }
 0x410   : > { %v3202_v63 = vadd.f32 %v3186_v53, %v3168_v1  ;;  %v3166_v28 = vadd.f32 %v5313_v4, %v3143_v40  ;;  %v3146_v18 = vmul.f32 %v3611_v31, %v5303_v34 }
 0x411   : > { %v3088_v61 = vpop.f32.mrf.mxu0 }
 0x412   : > { %v3218_v58 = vmax.f32 %v3202_v63, 0.0  ;;  %v3200_v8 = vadd.f32 %v3184_v29, %v3166_v28  ;;  %v3169_v51 = vadd.f32 %v5313_v4, %v3146_v18  ;;  %v3144_v17 = vmul.f32 %v5303_v34, %v3088_v61 }
 0x414   : > { %3234 = vst.msk [vmem:[%s5328_s24 + $0x30] sm:$0xff] %vm492_vm0, %v3218_v58  ;;  %v3216_v14 = vmax.f32 %v3200_v8, 0.0  ;;  %v3203_v27 = vadd.f32 %v3187_v26, %v3169_v51  ;;  %v3167_v6 = vadd.f32 %v5313_v4, %v3144_v17 }
 0x416   : > { %3232 = vst.msk [vmem:[%s5328_s24 + $0x20] sm:$0xff] %vm492_vm0, %v3216_v14  ;;  %v3219_v12 = vmax.f32 %v3203_v27, 0.0  ;;  %v3201_v32 = vadd.f32 %v3185_v13, %v3167_v6 }
 0x418   : > { %3235 = vst.msk [vmem:[%s5328_s24 + $0x38] sm:$0xff] %vm492_vm0, %v3219_v12  ;;  %v3217_v36 = vmax.f32 %v3201_v32, 0.0 }
 0x41a   : > { %3233 = vst.msk [vmem:[%s5328_s24 + $0x28] sm:$0xff] %vm492_vm0, %v3217_v36 }
 0x423   : > { %v3614_v3 = vpop.f32.mrf.mxu0 }
 0x424   : > { %v3149_v47 = vmul.f32 %v3614_v3, %v5303_v34 }
 0x425   : > { %v3101_v60 = vpop.f32.mrf.mxu0 }
 0x426   : > { %v3172_v54 = vadd.f32 %v5313_v4, %v3149_v47  ;;  %v3147_v57 = vmul.f32 %v5303_v34, %v3101_v60 }
 0x427   : > { %v3615_v43 = vpop.f32.mrf.mxu0 }
 0x428   : > { %v3206_v16 = vadd.f32 %v3190_v48, %v3172_v54  ;;  %v3170_v41 = vadd.f32 %v5313_v4, %v3147_v57  ;;  %v3150_v42 = vmul.f32 %v3615_v43, %v5303_v34 }
 0x429   : > { %v3104_v49 = vpop.f32.mrf.mxu0 }
 0x42a   : > { %v3222_v50 = vmax.f32 %v3206_v16, 0.0  ;;  %v3204_v0 = vadd.f32 %v3188_v19, %v3170_v41  ;;  %v3173_v2 = vadd.f32 %v5313_v4, %v3150_v42  ;;  %v3148_v25 = vmul.f32 %v5303_v34, %v3104_v49 }
 0x42c   : > { %3238 = vst.msk [vmem:[%s5328_s24 + $0x50] sm:$0xff] %vm492_vm0, %v3222_v50  ;;  %v3220_v46 = vmax.f32 %v3204_v0, 0.0  ;;  %v3207_v35 = vadd.f32 %v3191_v33, %v3173_v2  ;;  %v3171_v10 = vadd.f32 %v5313_v4, %v3148_v25 }
 0x42e   : > { %3236 = vst.msk [vmem:[%s5328_s24 + $0x40] sm:$0xff] %vm492_vm0, %v3220_v46  ;;  %v3223_v59 = vmax.f32 %v3207_v35, 0.0  ;;  %v3205_v15 = vadd.f32 %v3189_v22, %v3171_v10 }
 0x430   : > { %3239 = vst.msk [vmem:[%s5328_s24 + $0x58] sm:$0xff] %vm492_vm0, %v3223_v59  ;;  %v3221_v52 = vmax.f32 %v3205_v15, 0.0 }
 0x432   : > { %3237 = vst.msk [vmem:[%s5328_s24 + $0x48] sm:$0xff] %vm492_vm0, %v3221_v52 }
 0x43b   : > { %v3618_v44 = vpop.f32.mrf.mxu0 }
 0x43c   : > { %v3153_v45 = vmul.f32 %v3618_v44, %v5303_v34 }
 0x43d   : > { %v3117_v39 = vpop.f32.mrf.mxu0 }
 0x43e   : > { %v3176_v11 = vadd.f32 %v5313_v4, %v3153_v45  ;;  %v3151_v24 = vmul.f32 %v5303_v34, %v3117_v39 }
 0x43f   : > { %v3619_v21 = vpop.f32.mrf.mxu0 }
 0x440   : > { %v3210_v38 = vadd.f32 %v3194_v56, %v3176_v11  ;;  %v3174_v23 = vadd.f32 %v5313_v4, %v3151_v24  ;;  %v3154_v7 = vmul.f32 %v3619_v21, %v5303_v34 }
 0x441   : > { %v3120_v37 = vpop.f32.mrf.mxu0 }
 0x442   : > { %v3226_v9 = vmax.f32 %v3210_v38, 0.0  ;;  %v3208_v55 = vadd.f32 %v3192_v62, %v3174_v23  ;;  %v3177_v30 = vadd.f32 %v5313_v4, %v3154_v7  ;;  %v3152_v53 = vmul.f32 %v5303_v34, %v3120_v37 }
 0x444   : > { %3242 = vst.msk [vmem:[%s5328_s24 + $0x70] sm:$0xff] %vm492_vm0, %v3226_v9  ;;  %v3224_v1 = vmax.f32 %v3208_v55, 0.0  ;;  %v3211_v40 = vadd.f32 %v3195_v20, %v3177_v30  ;;  %v3175_v29 = vadd.f32 %v5313_v4, %v3152_v53 }
 0x446   : > { %3240 = vst.msk [vmem:[%s5328_s24 + $0x60] sm:$0xff] %vm492_vm0, %v3224_v1  ;;  %v3227_v31 = vmax.f32 %v3211_v40, 0.0  ;;  %v3209_v63 = vadd.f32 %v3193_v5, %v3175_v29 }
 0x448   : > { %3243 = vst.msk [vmem:[%s5328_s24 + $0x78] sm:$0xff] %vm492_vm0, %v3227_v31  ;;  %v3225_v34 = vmax.f32 %v3209_v63, 0.0 }
 0x44a   : > { %3241 = vst.msk [vmem:[%s5328_s24 + $0x68] sm:$0xff] %vm492_vm0, %v3225_v34 }
 0x44b   : > { %3796 = shalt.err (!%p3793_p0)
}
 0x44c   : > { %s3797_s29 = scalar_lea.hbm %s5405_s28, 2048  ;;  %s3801_s6 = scalar_lea.hbm %s5542_s26, 8192 }
 0x44d   : > { %p3798_p3 = scmp.ne.s32.totalorder %s5405_s28, %s3797_s29  ;;  %p3802_p4 = scmp.lt.s32.totalorder %s5405_s28, %s5542_s26 }
 0x44e   : > { %p3803_p5 = scmp.lt.s32.totalorder %s3801_s6, %s3797_s29 }
 0x44f   : > { %p3799_p1 = pnand %p3798_p3, %p4056_p12 }
 0x450   : > { %p3804_p7 = por %p3803_p5, %p3802_p4 }
 0x451   : > { %p3800_p6 = pneg %p3799_p1 }
 0x453   : > { %p3805_p8 = pnand %p3804_p7, %p3800_p6 }
 0x455   : > { %3808 = shalt.err (!%p3805_p8)
}
 0x456   : > { %s3918_s16 = smov 128  }
 0x457   : > { %3628 = dma.vmem_to_hbm [thread:$0]  (%p4056_p12), %s5398_s30, 2048, %s5405_s28, %s5411_s11, %s3918_s16, %s3918_s16, %s3909_s25  }
 0x458 PF: > { %p3639_p9 = scmp.ge.s32.totalorder %s3903_s23, 2  ;;  %s3276_s10 = sand.u32 1, %s3863_s13  }
 0x459   : > { %s3277_s12 = scalar_lea.sflag [#allocation6], %s3276_s10 }
 0x45a   : > { %p3635_p10 = pnand %p3639_p9, %p4069_p2 }
 0x45c   : > { %p3636_p11 = pneg %p3635_p10 }
 0x45e   : > { %3858 = dma.done.wait (%p3636_p11), %s3277_s12, 2048  }
 0x45f   : > { %3860 = vsyncadd (%p3636_p11), %s3277_s12, 4294965248  ;;  %s26_s23 = sadd.s32 1, %s3903_s23   ;;  %s5543_s19 = sld [smem:[#allocation11_spill]] }
 0x460   : > { %p23_p13 = scmp.ge.s32.totalorder %s26_s23, 6   ;;  %s5544_s25 = sld [smem:[#allocation12_spill]] }
 0x461   : > { %s5545_s30 = sld [smem:[#allocation13_spill]]  ;;  %s5547_s13 = smov %s3867_s14 }
 0x462   : > { %s5546_s22 = sld [smem:[#allocation14_spill]]  ;;  %s5548_s14 = smov %s3871_s15 }
 0x463   : > { %s5549_s15 = smov %s4064_s20  ;;  %s5550_s16 = smov %s3879_s17 }
 0x464   : > { %s5551_s17 = smov %s3883_s18  ;;  %s5552_s18 = smov %s4061_s21 }
 0x465   :  { %25 = sbr.rel (!%p23_p13) target bundleno = 14 (0xe), region = 112 }
 0x466   : > { %s5553_s20 = smov %s5544_s25 }
 0x467   : > { %s5554_s21 = smov %s5545_s30 }
 0x46a   :  { %3282 = vsyncpa [#allocation5], 1 }
 0x46b   :  { %3284 = vsyncpa [#allocation5 + $0x1], 1 }
 0x46c   :  { %3285 = vsyncpa [#allocation6], 1 }
 0x46d   :  { %3287 = vsyncpa [#allocation6 + $0x1], 1 }

</bundles_post_ra>
